<compile_context>
chip_gen: v7x
topology: tpu7x:2x2x1
jax: 0.10.0
libtpu: 0.0.40
codegen_flags: <defaults>
</compile_context>

<pallas_src>
from collections import namedtuple

import numpy as np
import jax
import jax.numpy as jnp
from jax.experimental import pallas as pl
from jax.experimental.pallas import tpu as pltpu


# ----------------------------------------------------------------------------
# Layer table (matches the PyTorch nn.Sequential exactly)
#   name, kind, cin, cout, k, stride, pad, output_pad, activation
# ----------------------------------------------------------------------------
_LAYERS = (
    ("enc1", "conv",    3, 16, 3, 2, 1, 0, "relu"),
    ("enc2", "conv",   16, 32, 3, 2, 1, 0, "relu"),
    ("enc3", "conv",   32, 64, 7, 1, 0, 0, "none"),
    ("dec1", "deconv", 64, 32, 7, 1, 0, 0, "relu"),
    ("dec2", "deconv", 32, 16, 3, 2, 1, 1, "relu"),
    ("dec3", "deconv", 16,  3, 3, 2, 1, 1, "sigmoid"),
)

_BLOCK_BATCH = 8      # samples per grid step; multiple of 8 keeps sublane tiles aligned
_LANE = 128


def _pad_to(n, m=_LANE):
    return ((n + m - 1) // m) * m


def _src_index(o, t, size, stride, padding, transposed):
    """Input index feeding output position `o` through kernel tap `t` (None if no tap)."""
    if transposed:
        num = o + padding - t
        if num < 0 or num % stride != 0:
            return None
        s = num // stride
        return s if s < size else None
    s = stride * o + t - padding
    return s if 0 <= s < size else None


_Geom = namedtuple("_Geom", "kind act hin win oh ow kh stride pad cin cout wcp owcp")


def _layer_geometry(input_hw):
    H, W = input_hw
    geoms = []
    for _name, kind, cin, cout, k, stride, pad, outpad, act in _LAYERS:
        if kind == "deconv":
            OH = (H - 1) * stride - 2 * pad + k + outpad
            OW = (W - 1) * stride - 2 * pad + k + outpad
        else:
            OH = (H + 2 * pad - k) // stride + 1
            OW = (W + 2 * pad - k) // stride + 1
        geoms.append(_Geom(kind, act, H, W, OH, OW, k, stride, pad, cin, cout,
                           _pad_to(W * cin), _pad_to(OW * cout)))
        H, W = OH, OW
    return tuple(geoms), (H, W)


# ----------------------------------------------------------------------------
# In-kernel layer blocks (everything static: plain 2-D dots + aligned slices/concats)
# ----------------------------------------------------------------------------
def _conv_block(h, g, bias, gm, B):
    """Conv2d: gather the KH row-taps (static, zero-padded), fuse along K, one matmul."""
    zero_row = jnp.zeros((B, gm.wcp), h.dtype)
    taps = []
    for i in range(gm.kh):
        pieces = []
        for o in range(gm.oh):
            r = gm.stride * o + i - gm.pad
            pieces.append(h[r * B:(r + 1) * B, :] if 0 <= r < gm.hin else zero_row)
        taps.append(jnp.concatenate(pieces, axis=0))          # (OH*B, wcp)
    rows_cat = jnp.concatenate(taps, axis=-1).astype(jnp.bfloat16)   # (OH*B, KH*wcp)
    acc = jnp.dot(rows_cat, g, preferred_element_type=jnp.float32)   # (OH*B, owcp)
    return acc + bias


def _deconv_block(h, g, bias, gm, B):
    """ConvTranspose2d: X @ G_stack first (batch in M, taps fused along N), then a pure
    slice/add row scatter in f32 (no MXU work, no intermediate bf16 rounding)."""
    tmp = jnp.dot(h.astype(jnp.bfloat16), g,
                  preferred_element_type=jnp.float32)          # (Hin*B, KH*owcp)
    zero_row = jnp.zeros((B, gm.owcp), jnp.float32)
    out_rows = []
    for o in range(gm.oh):
        contrib = None
        for i in range(gm.kh):
            s = _src_index(o, i, gm.hin, gm.stride, gm.pad, True)
            if s is None:
                continue
            piece = tmp[s * B:(s + 1) * B, i * gm.owcp:(i + 1) * gm.owcp]
            contrib = piece if contrib is None else contrib + piece
        out_rows.append(contrib if contrib is not None else zero_row)
    acc = jnp.concatenate(out_rows, axis=0)                    # (OH*B, owcp)
    return acc + bias


def _make_kernel(geoms, bsz):
    def kernel(x_ref, *rest):
        out_ref = rest[-1]
        h = x_ref[0]                                           # (H0*bsz, WC0p) f32
        for li, gm in enumerate(geoms):
            g = rest[2 * li][...]                              # bf16 weights (VMEM)
            bias = rest[2 * li + 1][...]                       # (1, owcp) f32
            if gm.kind == "conv":
                acc = _conv_block(h, g, bias, gm, bsz)
            else:
                acc = _deconv_block(h, g, bias, gm, bsz)
            if gm.act == "relu":
                h = jnp.maximum(acc, 0.0)                      # f32 elementwise
            elif gm.act == "sigmoid":
                # exp on the EUP, approx reciprocal instead of a VALU divide
                h = pl.reciprocal(1.0 + jnp.exp(-acc), approx=True)
            else:
                h = acc
        out_ref[0] = h.astype(out_ref.dtype)                   # lane-dense (last dim 128)
    return kernel


# ----------------------------------------------------------------------------
# Parameter-dependent operand preparation (done ONCE, outside the hot path).
#   Per layer: G_stack (taps fused, zero-padded to 128-lane multiples) + tiled bias.
# ----------------------------------------------------------------------------
def prepare_operands(params, input_hw=(28, 28)):
    geoms, _ = _layer_geometry(input_hw)
    ops = []
    for (name, kind, cin, cout, k, stride, pad, _outpad, _act), gm in zip(_LAYERS, geoms):
        w, b = params[name]
        transposed = kind == "deconv"
        if transposed:
            kern = jnp.transpose(w, (2, 3, 0, 1))              # (KH,KW,Cin,Cout)
        else:
            kern = jnp.transpose(w, (2, 3, 1, 0))              # (KH,KW,Cin,Cout)
        # Column selector: scatter the KW taps over output columns (padding/stride folded in).
        col_sel = np.zeros((k, gm.ow, gm.win), np.float32)
        for j in range(k):
            for ow in range(gm.ow):
                s = _src_index(ow, j, gm.win, stride, pad, transposed)
                if s is not None:
                    col_sel[j, ow, s] = 1.0
        wc, owc = gm.win * cin, gm.ow * cout
        g = jnp.einsum("jow,ijcd->iwcod", jnp.asarray(col_sel), kern)
        g = g.reshape(k, wc, owc)
        g = jnp.pad(g, ((0, 0), (0, gm.wcp - wc), (0, gm.owcp - owc)))
        if transposed:
            # taps fused along N: columns [i*owcp, (i+1)*owcp) hold tap i
            g_stack = jnp.transpose(g, (1, 0, 2)).reshape(gm.wcp, k * gm.owcp)
        else:
            # taps fused along K: rows [i*wcp, (i+1)*wcp) hold tap i
            g_stack = g.reshape(k * gm.wcp, gm.owcp)
        bias = jnp.pad(jnp.tile(b, gm.ow), (0, gm.owcp - owc)).reshape(1, gm.owcp)
        ops.append((g_stack.astype(jnp.bfloat16), bias.astype(jnp.float32)))
    return ops


# ----------------------------------------------------------------------------
# Forward pass: single pallas_call, batch blocked onto a "parallel" grid axis.
# ----------------------------------------------------------------------------
@jax.jit
def autoencoder_forward(operands, x):
    """x: (N, C, H, W) float32 NCHW -> (N, C, H, W) float32 (sigmoid output)."""
    N, C, H, W = x.shape
    geoms, (Hout, Wout) = _layer_geometry((H, W))
    B = _BLOCK_BATCH
    wc0p = geoms[0].wcp
    owclp = geoms[-1].owcp
    cout_last = _LAYERS[-1][3]

    nb = -(-N // B)                      # number of batch blocks (grid length)
    Np = nb * B

    # NCHW -> per-block channels-last slabs (nb, H*B, WC0p); relayout happens once.
    xt = jnp.transpose(x, (2, 0, 3, 1)).reshape(H, N, W * C)
    xt = jnp.pad(xt, ((0, 0), (0, Np - N), (0, wc0p - W * C)))
    xt = jnp.transpose(xt.reshape(H, nb, B, wc0p), (1, 0, 2, 3)).reshape(nb, H * B, wc0p)

    flat = [a for layer in operands for a in layer]
    in_specs = [pl.BlockSpec((1, H * B, wc0p), lambda n: (n, 0, 0))]
    for a in flat:
        in_specs.append(pl.BlockSpec(a.shape, lambda n, _nd=a.ndim: (0,) * _nd))

    y = pl.pallas_call(
        _make_kernel(geoms, B),
        grid=(nb,),
        in_specs=in_specs,
        out_specs=pl.BlockSpec((1, Hout * B, owclp), lambda n: (n, 0, 0)),
        out_shape=jax.ShapeDtypeStruct((nb, Hout * B, owclp), jnp.float32),
        compiler_params=pltpu.CompilerParams(
            dimension_semantics=("parallel",),
        ),
    )(xt, *flat)

    # Undo the block layout, drop padded samples / lanes, back to NCHW.
    y = jnp.transpose(y.reshape(nb, Hout, B, owclp), (1, 0, 2, 3)).reshape(Hout, Np, owclp)
    y = y[:, :N, :Wout * cout_last].reshape(Hout, N, Wout, cout_last)
    return jnp.transpose(y, (1, 3, 0, 2))


# ----------------------------------------------------------------------------
# Deterministic PyTorch-style parameter init (U(-1/sqrt(fan_in), 1/sqrt(fan_in)))
# ----------------------------------------------------------------------------
def make_params(seed=0):
    key = jax.random.PRNGKey(seed)
    keys = jax.random.split(key, 2 * len(_LAYERS))

    def conv_p(kw_, kb_, cout, cin, k):
        fan_in = cin * k * k
        bound = 1.0 / float(fan_in) ** 0.5
        w = jax.random.uniform(kw_, (cout, cin, k, k), jnp.float32, -bound, bound)
        b = jax.random.uniform(kb_, (cout,), jnp.float32, -bound, bound)
        return w, b

    def deconv_p(kw_, kb_, cin, cout, k):
        fan_in = cout * k * k            # PyTorch: weight.size(1) * kH * kW
        bound = 1.0 / float(fan_in) ** 0.5
        w = jax.random.uniform(kw_, (cin, cout, k, k), jnp.float32, -bound, bound)
        b = jax.random.uniform(kb_, (cout,), jnp.float32, -bound, bound)
        return w, b

    return {
        "enc1": conv_p(keys[0], keys[1], 16, 3, 3),
        "enc2": conv_p(keys[2], keys[3], 32, 16, 3),
        "enc3": conv_p(keys[4], keys[5], 64, 32, 7),
        "dec1": deconv_p(keys[6], keys[7], 64, 32, 7),
        "dec2": deconv_p(keys[8], keys[9], 32, 16, 3),
        "dec3": deconv_p(keys[10], keys[11], 16, 3, 3),
    }


# ----------------------------------------------------------------------------
# Pure-XLA f32 reference (PyTorch semantics) -- validation only.
# ----------------------------------------------------------------------------
def _ref_conv2d(x, w, b, stride, padding):
    y = jax.lax.conv_general_dilated(
        x, w, window_strides=(stride, stride),
        padding=((padding, padding), (padding, padding)),
        dimension_numbers=("NCHW", "OIHW", "NCHW"),
        precision=jax.lax.Precision.HIGHEST)
    return y + b.reshape(1, -1, 1, 1)


def _ref_deconv2d(x, w, b, stride, padding, output_padding):
    kh, kw = w.shape[2], w.shape[3]
    w_conv = jnp.transpose(jnp.flip(w, axis=(2, 3)), (1, 0, 2, 3))
    y = jax.lax.conv_general_dilated(
        x, w_conv, window_strides=(1, 1),
        padding=((kh - 1 - padding, kh - 1 - padding + output_padding),
                 (kw - 1 - padding, kw - 1 - padding + output_padding)),
        lhs_dilation=(stride, stride),
        dimension_numbers=("NCHW", "OIHW", "NCHW"),
        precision=jax.lax.Precision.HIGHEST)
    return y + b.reshape(1, -1, 1, 1)


def reference_forward(params, x):
    h = x
    for name, kind, _cin, _cout, _k, stride, pad, outpad, act in _LAYERS:
        w, b = params[name]
        if kind == "conv":
            h = _ref_conv2d(h, w, b, stride, pad)
        else:
            h = _ref_deconv2d(h, w, b, stride, pad, outpad)
        if act == "relu":
            h = jax.nn.relu(h)
        elif act == "sigmoid":
            h = jax.nn.sigmoid(h)
    return h


if __name__ == "__main__":
    # 28x28 is the natural spatial size for this module: 28 -> 14 -> 7 -> 1 -> 7 -> 14 -> 28.
    # batch=16 with _BLOCK_BATCH=8 gives a 2-step grid (exercises megacore sharding on v7x).
    x = jax.random.normal(jax.random.PRNGKey(0), (16, 3, 28, 28), jnp.float32)
    params = make_params(seed=0)
    operands = prepare_operands(params, input_hw=(28, 28))     # once, outside hot path

    y = autoencoder_forward(operands, x)
    jax.block_until_ready(y)

    assert y.shape == (16, 3, 28, 28), y.shape
    assert y.dtype == jnp.float32
    assert bool(jnp.all(jnp.isfinite(y)))
    # sigmoid output range (small slack for the approximate reciprocal)
    assert bool(jnp.all((y >= 0.0) & (y <= 1.0 + 1e-3)))

    # Validate against the pure-XLA f32 reference (kernel feeds the MXU bf16 -> loose tol).
    y_ref = reference_forward(params, x)
    err = float(jnp.max(jnp.abs(y - y_ref)))
    assert err < 5e-2, f"max |pallas - reference| too large: {err}"

    print("KERNEL_OK")
</pallas_src>

<mosaic_0001>
module attributes {stable_mosaic.version = 11 : i64} {
  func.func @kernel(%arg0: i32, %arg1: memref<1x224x128xf32, #tpu.memory_space<vmem>>, %arg2: memref<384x256xbf16, #tpu.memory_space<vmem>>, %arg3: memref<1x256xf32, #tpu.memory_space<vmem>>, %arg4: memref<768x256xbf16, #tpu.memory_space<vmem>>, %arg5: memref<1x256xf32, #tpu.memory_space<vmem>>, %arg6: memref<1792x128xbf16, #tpu.memory_space<vmem>>, %arg7: memref<1x128xf32, #tpu.memory_space<vmem>>, %arg8: memref<128x1792xbf16, #tpu.memory_space<vmem>>, %arg9: memref<1x256xf32, #tpu.memory_space<vmem>>, %arg10: memref<256x768xbf16, #tpu.memory_space<vmem>>, %arg11: memref<1x256xf32, #tpu.memory_space<vmem>>, %arg12: memref<256x384xbf16, #tpu.memory_space<vmem>>, %arg13: memref<1x128xf32, #tpu.memory_space<vmem>>, %arg14: memref<1x224x128xf32, #tpu.memory_space<vmem>>) attributes {dimension_semantics = [#tpu.dimension_semantics<parallel>], iteration_bounds = array<i64: 2>, scalar_prefetch = 0 : i64, scratch_operands = 0 : i64, tpu.core_type = #tpu.core_type<tc>, window_params = [{transform_indices = @transform_0, window_bounds = array<i64: 1, 224, 128>}, {pipeline_mode = #tpu.pipeline_mode<synchronous>, transform_indices = @transform_1, window_bounds = array<i64: 384, 256>}, {pipeline_mode = #tpu.pipeline_mode<synchronous>, transform_indices = @transform_2, window_bounds = array<i64: 1, 256>}, {pipeline_mode = #tpu.pipeline_mode<synchronous>, transform_indices = @transform_3, window_bounds = array<i64: 768, 256>}, {pipeline_mode = #tpu.pipeline_mode<synchronous>, transform_indices = @transform_4, window_bounds = array<i64: 1, 256>}, {pipeline_mode = #tpu.pipeline_mode<synchronous>, transform_indices = @transform_5, window_bounds = array<i64: 1792, 128>}, {pipeline_mode = #tpu.pipeline_mode<synchronous>, transform_indices = @transform_6, window_bounds = array<i64: 1, 128>}, {pipeline_mode = #tpu.pipeline_mode<synchronous>, transform_indices = @transform_7, window_bounds = array<i64: 128, 1792>}, {pipeline_mode = #tpu.pipeline_mode<synchronous>, transform_indices = @transform_8, window_bounds = array<i64: 1, 256>}, {pipeline_mode = #tpu.pipeline_mode<synchronous>, transform_indices = @transform_9, window_bounds = array<i64: 256, 768>}, {pipeline_mode = #tpu.pipeline_mode<synchronous>, transform_indices = @transform_10, window_bounds = array<i64: 1, 256>}, {pipeline_mode = #tpu.pipeline_mode<synchronous>, transform_indices = @transform_11, window_bounds = array<i64: 256, 384>}, {pipeline_mode = #tpu.pipeline_mode<synchronous>, transform_indices = @transform_12, window_bounds = array<i64: 1, 128>}, {transform_indices = @transform_13, window_bounds = array<i64: 1, 224, 128>}]} {
    %c0 = arith.constant 0 : index
    %c0_0 = arith.constant 0 : index
    %c0_1 = arith.constant 0 : index
    %0 = vector.load %arg1[%c0, %c0_0, %c0_1] : memref<1x224x128xf32, #tpu.memory_space<vmem>>, vector<1x224x128xf32>
    %1 = vector.shape_cast %0 : vector<1x224x128xf32> to vector<224x128xf32>
    %c0_2 = arith.constant 0 : index
    %c0_3 = arith.constant 0 : index
    %2 = vector.load %arg2[%c0_2, %c0_3] : memref<384x256xbf16, #tpu.memory_space<vmem>>, vector<384x256xbf16>
    %c0_4 = arith.constant 0 : index
    %c0_5 = arith.constant 0 : index
    %3 = vector.load %arg3[%c0_4, %c0_5] : memref<1x256xf32, #tpu.memory_space<vmem>>, vector<1x256xf32>
    %cst = arith.constant 0.000000e+00 : f32
    %4 = vector.broadcast %cst : f32 to vector<8x128xf32>
    %5 = vector.extract_strided_slice %1 {offsets = [8, 0], sizes = [8, 128], strides = [1, 1]} : vector<224x128xf32> to vector<8x128xf32>
    %6 = vector.extract_strided_slice %1 {offsets = [24, 0], sizes = [8, 128], strides = [1, 1]} : vector<224x128xf32> to vector<8x128xf32>
    %7 = vector.extract_strided_slice %1 {offsets = [40, 0], sizes = [8, 128], strides = [1, 1]} : vector<224x128xf32> to vector<8x128xf32>
    %8 = vector.extract_strided_slice %1 {offsets = [56, 0], sizes = [8, 128], strides = [1, 1]} : vector<224x128xf32> to vector<8x128xf32>
    %9 = vector.extract_strided_slice %1 {offsets = [72, 0], sizes = [8, 128], strides = [1, 1]} : vector<224x128xf32> to vector<8x128xf32>
    %10 = vector.extract_strided_slice %1 {offsets = [88, 0], sizes = [8, 128], strides = [1, 1]} : vector<224x128xf32> to vector<8x128xf32>
    %11 = vector.extract_strided_slice %1 {offsets = [104, 0], sizes = [8, 128], strides = [1, 1]} : vector<224x128xf32> to vector<8x128xf32>
    %12 = vector.extract_strided_slice %1 {offsets = [120, 0], sizes = [8, 128], strides = [1, 1]} : vector<224x128xf32> to vector<8x128xf32>
    %13 = vector.extract_strided_slice %1 {offsets = [136, 0], sizes = [8, 128], strides = [1, 1]} : vector<224x128xf32> to vector<8x128xf32>
    %14 = vector.extract_strided_slice %1 {offsets = [152, 0], sizes = [8, 128], strides = [1, 1]} : vector<224x128xf32> to vector<8x128xf32>
    %15 = vector.extract_strided_slice %1 {offsets = [168, 0], sizes = [8, 128], strides = [1, 1]} : vector<224x128xf32> to vector<8x128xf32>
    %16 = vector.extract_strided_slice %1 {offsets = [184, 0], sizes = [8, 128], strides = [1, 1]} : vector<224x128xf32> to vector<8x128xf32>
    %17 = vector.extract_strided_slice %1 {offsets = [200, 0], sizes = [8, 128], strides = [1, 1]} : vector<224x128xf32> to vector<8x128xf32>
    %18 = tpu.concatenate %4, %5, %6, %7, %8, %9, %10, %11, %12, %13, %14, %15, %16, %17 in 0 : vector<8x128xf32>, vector<8x128xf32>, vector<8x128xf32>, vector<8x128xf32>, vector<8x128xf32>, vector<8x128xf32>, vector<8x128xf32>, vector<8x128xf32>, vector<8x128xf32>, vector<8x128xf32>, vector<8x128xf32>, vector<8x128xf32>, vector<8x128xf32>, vector<8x128xf32> -> vector<112x128xf32>
    %19 = vector.extract_strided_slice %1 {offsets = [0, 0], sizes = [8, 128], strides = [1, 1]} : vector<224x128xf32> to vector<8x128xf32>
    %20 = vector.extract_strided_slice %1 {offsets = [16, 0], sizes = [8, 128], strides = [1, 1]} : vector<224x128xf32> to vector<8x128xf32>
    %21 = vector.extract_strided_slice %1 {offsets = [32, 0], sizes = [8, 128], strides = [1, 1]} : vector<224x128xf32> to vector<8x128xf32>
    %22 = vector.extract_strided_slice %1 {offsets = [48, 0], sizes = [8, 128], strides = [1, 1]} : vector<224x128xf32> to vector<8x128xf32>
    %23 = vector.extract_strided_slice %1 {offsets = [64, 0], sizes = [8, 128], strides = [1, 1]} : vector<224x128xf32> to vector<8x128xf32>
    %24 = vector.extract_strided_slice %1 {offsets = [80, 0], sizes = [8, 128], strides = [1, 1]} : vector<224x128xf32> to vector<8x128xf32>
    %25 = vector.extract_strided_slice %1 {offsets = [96, 0], sizes = [8, 128], strides = [1, 1]} : vector<224x128xf32> to vector<8x128xf32>
    %26 = vector.extract_strided_slice %1 {offsets = [112, 0], sizes = [8, 128], strides = [1, 1]} : vector<224x128xf32> to vector<8x128xf32>
    %27 = vector.extract_strided_slice %1 {offsets = [128, 0], sizes = [8, 128], strides = [1, 1]} : vector<224x128xf32> to vector<8x128xf32>
    %28 = vector.extract_strided_slice %1 {offsets = [144, 0], sizes = [8, 128], strides = [1, 1]} : vector<224x128xf32> to vector<8x128xf32>
    %29 = vector.extract_strided_slice %1 {offsets = [160, 0], sizes = [8, 128], strides = [1, 1]} : vector<224x128xf32> to vector<8x128xf32>
    %30 = vector.extract_strided_slice %1 {offsets = [176, 0], sizes = [8, 128], strides = [1, 1]} : vector<224x128xf32> to vector<8x128xf32>
    %31 = vector.extract_strided_slice %1 {offsets = [192, 0], sizes = [8, 128], strides = [1, 1]} : vector<224x128xf32> to vector<8x128xf32>
    %32 = vector.extract_strided_slice %1 {offsets = [208, 0], sizes = [8, 128], strides = [1, 1]} : vector<224x128xf32> to vector<8x128xf32>
    %33 = tpu.concatenate %19, %20, %21, %22, %23, %24, %25, %26, %27, %28, %29, %30, %31, %32 in 0 : vector<8x128xf32>, vector<8x128xf32>, vector<8x128xf32>, vector<8x128xf32>, vector<8x128xf32>, vector<8x128xf32>, vector<8x128xf32>, vector<8x128xf32>, vector<8x128xf32>, vector<8x128xf32>, vector<8x128xf32>, vector<8x128xf32>, vector<8x128xf32>, vector<8x128xf32> -> vector<112x128xf32>
    %34 = vector.extract_strided_slice %1 {offsets = [8, 0], sizes = [8, 128], strides = [1, 1]} : vector<224x128xf32> to vector<8x128xf32>
    %35 = vector.extract_strided_slice %1 {offsets = [24, 0], sizes = [8, 128], strides = [1, 1]} : vector<224x128xf32> to vector<8x128xf32>
    %36 = vector.extract_strided_slice %1 {offsets = [40, 0], sizes = [8, 128], strides = [1, 1]} : vector<224x128xf32> to vector<8x128xf32>
    %37 = vector.extract_strided_slice %1 {offsets = [56, 0], sizes = [8, 128], strides = [1, 1]} : vector<224x128xf32> to vector<8x128xf32>
    %38 = vector.extract_strided_slice %1 {offsets = [72, 0], sizes = [8, 128], strides = [1, 1]} : vector<224x128xf32> to vector<8x128xf32>
    %39 = vector.extract_strided_slice %1 {offsets = [88, 0], sizes = [8, 128], strides = [1, 1]} : vector<224x128xf32> to vector<8x128xf32>
    %40 = vector.extract_strided_slice %1 {offsets = [104, 0], sizes = [8, 128], strides = [1, 1]} : vector<224x128xf32> to vector<8x128xf32>
    %41 = vector.extract_strided_slice %1 {offsets = [120, 0], sizes = [8, 128], strides = [1, 1]} : vector<224x128xf32> to vector<8x128xf32>
    %42 = vector.extract_strided_slice %1 {offsets = [136, 0], sizes = [8, 128], strides = [1, 1]} : vector<224x128xf32> to vector<8x128xf32>
    %43 = vector.extract_strided_slice %1 {offsets = [152, 0], sizes = [8, 128], strides = [1, 1]} : vector<224x128xf32> to vector<8x128xf32>
    %44 = vector.extract_strided_slice %1 {offsets = [168, 0], sizes = [8, 128], strides = [1, 1]} : vector<224x128xf32> to vector<8x128xf32>
    %45 = vector.extract_strided_slice %1 {offsets = [184, 0], sizes = [8, 128], strides = [1, 1]} : vector<224x128xf32> to vector<8x128xf32>
    %46 = vector.extract_strided_slice %1 {offsets = [200, 0], sizes = [8, 128], strides = [1, 1]} : vector<224x128xf32> to vector<8x128xf32>
    %47 = vector.extract_strided_slice %1 {offsets = [216, 0], sizes = [8, 128], strides = [1, 1]} : vector<224x128xf32> to vector<8x128xf32>
    %48 = tpu.concatenate %34, %35, %36, %37, %38, %39, %40, %41, %42, %43, %44, %45, %46, %47 in 0 : vector<8x128xf32>, vector<8x128xf32>, vector<8x128xf32>, vector<8x128xf32>, vector<8x128xf32>, vector<8x128xf32>, vector<8x128xf32>, vector<8x128xf32>, vector<8x128xf32>, vector<8x128xf32>, vector<8x128xf32>, vector<8x128xf32>, vector<8x128xf32>, vector<8x128xf32> -> vector<112x128xf32>
    %49 = tpu.concatenate %18, %33, %48 in 1 : vector<112x128xf32>, vector<112x128xf32>, vector<112x128xf32> -> vector<112x384xf32>
    %50 = arith.truncf %49 : vector<112x384xf32> to vector<112x384xbf16>
    %cst_6 = arith.constant dense<0.000000e+00> : vector<112x256xf32>
    %51 = tpu.matmul %50, %2, %cst_6 {dimension_numbers = #tpu.dot_dimension_numbers<[1], [0], [0], [1], [0, 0, 1, 1], [], []>} : vector<112x384xbf16>, vector<384x256xbf16>, vector<112x256xf32> -> vector<112x256xf32>
    %52 = vector.broadcast %3 : vector<1x256xf32> to vector<112x256xf32>
    %53 = arith.addf %51, %52 : vector<112x256xf32>
    %cst_7 = arith.constant 0.000000e+00 : f32
    %54 = vector.broadcast %cst_7 : f32 to vector<112x256xf32>
    %55 = arith.maximumf %53, %54 : vector<112x256xf32>
    %c0_8 = arith.constant 0 : index
    %c0_9 = arith.constant 0 : index
    %56 = vector.load %arg4[%c0_8, %c0_9] : memref<768x256xbf16, #tpu.memory_space<vmem>>, vector<768x256xbf16>
    %c0_10 = arith.constant 0 : index
    %c0_11 = arith.constant 0 : index
    %57 = vector.load %arg5[%c0_10, %c0_11] : memref<1x256xf32, #tpu.memory_space<vmem>>, vector<1x256xf32>
    %cst_12 = arith.constant 0.000000e+00 : f32
    %58 = vector.broadcast %cst_12 : f32 to vector<8x256xf32>
    %59 = vector.extract_strided_slice %55 {offsets = [8, 0], sizes = [8, 256], strides = [1, 1]} : vector<112x256xf32> to vector<8x256xf32>
    %60 = vector.extract_strided_slice %55 {offsets = [24, 0], sizes = [8, 256], strides = [1, 1]} : vector<112x256xf32> to vector<8x256xf32>
    %61 = vector.extract_strided_slice %55 {offsets = [40, 0], sizes = [8, 256], strides = [1, 1]} : vector<112x256xf32> to vector<8x256xf32>
    %62 = vector.extract_strided_slice %55 {offsets = [56, 0], sizes = [8, 256], strides = [1, 1]} : vector<112x256xf32> to vector<8x256xf32>
    %63 = vector.extract_strided_slice %55 {offsets = [72, 0], sizes = [8, 256], strides = [1, 1]} : vector<112x256xf32> to vector<8x256xf32>
    %64 = vector.extract_strided_slice %55 {offsets = [88, 0], sizes = [8, 256], strides = [1, 1]} : vector<112x256xf32> to vector<8x256xf32>
    %65 = tpu.concatenate %58, %59, %60, %61, %62, %63, %64 in 0 : vector<8x256xf32>, vector<8x256xf32>, vector<8x256xf32>, vector<8x256xf32>, vector<8x256xf32>, vector<8x256xf32>, vector<8x256xf32> -> vector<56x256xf32>
    %66 = vector.extract_strided_slice %55 {offsets = [0, 0], sizes = [8, 256], strides = [1, 1]} : vector<112x256xf32> to vector<8x256xf32>
    %67 = vector.extract_strided_slice %55 {offsets = [16, 0], sizes = [8, 256], strides = [1, 1]} : vector<112x256xf32> to vector<8x256xf32>
    %68 = vector.extract_strided_slice %55 {offsets = [32, 0], sizes = [8, 256], strides = [1, 1]} : vector<112x256xf32> to vector<8x256xf32>
    %69 = vector.extract_strided_slice %55 {offsets = [48, 0], sizes = [8, 256], strides = [1, 1]} : vector<112x256xf32> to vector<8x256xf32>
    %70 = vector.extract_strided_slice %55 {offsets = [64, 0], sizes = [8, 256], strides = [1, 1]} : vector<112x256xf32> to vector<8x256xf32>
    %71 = vector.extract_strided_slice %55 {offsets = [80, 0], sizes = [8, 256], strides = [1, 1]} : vector<112x256xf32> to vector<8x256xf32>
    %72 = vector.extract_strided_slice %55 {offsets = [96, 0], sizes = [8, 256], strides = [1, 1]} : vector<112x256xf32> to vector<8x256xf32>
    %73 = tpu.concatenate %66, %67, %68, %69, %70, %71, %72 in 0 : vector<8x256xf32>, vector<8x256xf32>, vector<8x256xf32>, vector<8x256xf32>, vector<8x256xf32>, vector<8x256xf32>, vector<8x256xf32> -> vector<56x256xf32>
    %74 = vector.extract_strided_slice %55 {offsets = [8, 0], sizes = [8, 256], strides = [1, 1]} : vector<112x256xf32> to vector<8x256xf32>
    %75 = vector.extract_strided_slice %55 {offsets = [24, 0], sizes = [8, 256], strides = [1, 1]} : vector<112x256xf32> to vector<8x256xf32>
    %76 = vector.extract_strided_slice %55 {offsets = [40, 0], sizes = [8, 256], strides = [1, 1]} : vector<112x256xf32> to vector<8x256xf32>
    %77 = vector.extract_strided_slice %55 {offsets = [56, 0], sizes = [8, 256], strides = [1, 1]} : vector<112x256xf32> to vector<8x256xf32>
    %78 = vector.extract_strided_slice %55 {offsets = [72, 0], sizes = [8, 256], strides = [1, 1]} : vector<112x256xf32> to vector<8x256xf32>
    %79 = vector.extract_strided_slice %55 {offsets = [88, 0], sizes = [8, 256], strides = [1, 1]} : vector<112x256xf32> to vector<8x256xf32>
    %80 = vector.extract_strided_slice %55 {offsets = [104, 0], sizes = [8, 256], strides = [1, 1]} : vector<112x256xf32> to vector<8x256xf32>
    %81 = tpu.concatenate %74, %75, %76, %77, %78, %79, %80 in 0 : vector<8x256xf32>, vector<8x256xf32>, vector<8x256xf32>, vector<8x256xf32>, vector<8x256xf32>, vector<8x256xf32>, vector<8x256xf32> -> vector<56x256xf32>
    %82 = tpu.concatenate %65, %73, %81 in 1 : vector<56x256xf32>, vector<56x256xf32>, vector<56x256xf32> -> vector<56x768xf32>
    %83 = arith.truncf %82 : vector<56x768xf32> to vector<56x768xbf16>
    %cst_13 = arith.constant dense<0.000000e+00> : vector<56x256xf32>
    %84 = tpu.matmul %83, %56, %cst_13 {dimension_numbers = #tpu.dot_dimension_numbers<[1], [0], [0], [1], [0, 0, 1, 1], [], []>} : vector<56x768xbf16>, vector<768x256xbf16>, vector<56x256xf32> -> vector<56x256xf32>
    %85 = vector.broadcast %57 : vector<1x256xf32> to vector<56x256xf32>
    %86 = arith.addf %84, %85 : vector<56x256xf32>
    %cst_14 = arith.constant 0.000000e+00 : f32
    %87 = vector.broadcast %cst_14 : f32 to vector<56x256xf32>
    %88 = arith.maximumf %86, %87 : vector<56x256xf32>
    %c0_15 = arith.constant 0 : index
    %c0_16 = arith.constant 0 : index
    %89 = vector.load %arg6[%c0_15, %c0_16] : memref<1792x128xbf16, #tpu.memory_space<vmem>>, vector<1792x128xbf16>
    %c0_17 = arith.constant 0 : index
    %c0_18 = arith.constant 0 : index
    %90 = vector.load %arg7[%c0_17, %c0_18] : memref<1x128xf32, #tpu.memory_space<vmem>>, vector<1x128xf32>
    %91 = vector.extract_strided_slice %88 {offsets = [0, 0], sizes = [8, 256], strides = [1, 1]} : vector<56x256xf32> to vector<8x256xf32>
    %92 = vector.extract_strided_slice %88 {offsets = [8, 0], sizes = [8, 256], strides = [1, 1]} : vector<56x256xf32> to vector<8x256xf32>
    %93 = vector.extract_strided_slice %88 {offsets = [16, 0], sizes = [8, 256], strides = [1, 1]} : vector<56x256xf32> to vector<8x256xf32>
    %94 = vector.extract_strided_slice %88 {offsets = [24, 0], sizes = [8, 256], strides = [1, 1]} : vector<56x256xf32> to vector<8x256xf32>
    %95 = vector.extract_strided_slice %88 {offsets = [32, 0], sizes = [8, 256], strides = [1, 1]} : vector<56x256xf32> to vector<8x256xf32>
    %96 = vector.extract_strided_slice %88 {offsets = [40, 0], sizes = [8, 256], strides = [1, 1]} : vector<56x256xf32> to vector<8x256xf32>
    %97 = vector.extract_strided_slice %88 {offsets = [48, 0], sizes = [8, 256], strides = [1, 1]} : vector<56x256xf32> to vector<8x256xf32>
    %98 = tpu.concatenate %91, %92, %93, %94, %95, %96, %97 in 1 : vector<8x256xf32>, vector<8x256xf32>, vector<8x256xf32>, vector<8x256xf32>, vector<8x256xf32>, vector<8x256xf32>, vector<8x256xf32> -> vector<8x1792xf32>
    %99 = arith.truncf %98 : vector<8x1792xf32> to vector<8x1792xbf16>
    %cst_19 = arith.constant dense<0.000000e+00> : vector<8x128xf32>
    %100 = tpu.matmul %99, %89, %cst_19 {dimension_numbers = #tpu.dot_dimension_numbers<[1], [0], [0], [1], [0, 0, 1, 1], [], []>} : vector<8x1792xbf16>, vector<1792x128xbf16>, vector<8x128xf32> -> vector<8x128xf32>
    %101 = vector.broadcast %90 : vector<1x128xf32> to vector<8x128xf32>
    %102 = arith.addf %100, %101 : vector<8x128xf32>
    %c0_20 = arith.constant 0 : index
    %c0_21 = arith.constant 0 : index
    %103 = vector.load %arg8[%c0_20, %c0_21] : memref<128x1792xbf16, #tpu.memory_space<vmem>>, vector<128x1792xbf16>
    %c0_22 = arith.constant 0 : index
    %c0_23 = arith.constant 0 : index
    %104 = vector.load %arg9[%c0_22, %c0_23] : memref<1x256xf32, #tpu.memory_space<vmem>>, vector<1x256xf32>
    %105 = arith.truncf %102 : vector<8x128xf32> to vector<8x128xbf16>
    %cst_24 = arith.constant dense<0.000000e+00> : vector<8x1792xf32>
    %106 = tpu.matmul %105, %103, %cst_24 {dimension_numbers = #tpu.dot_dimension_numbers<[1], [0], [0], [1], [0, 0, 1, 1], [], []>} : vector<8x128xbf16>, vector<128x1792xbf16>, vector<8x1792xf32> -> vector<8x1792xf32>
    %107 = vector.extract_strided_slice %106 {offsets = [0, 0], sizes = [8, 256], strides = [1, 1]} : vector<8x1792xf32> to vector<8x256xf32>
    %108 = vector.extract_strided_slice %106 {offsets = [0, 256], sizes = [8, 256], strides = [1, 1]} : vector<8x1792xf32> to vector<8x256xf32>
    %109 = vector.extract_strided_slice %106 {offsets = [0, 512], sizes = [8, 256], strides = [1, 1]} : vector<8x1792xf32> to vector<8x256xf32>
    %110 = vector.extract_strided_slice %106 {offsets = [0, 768], sizes = [8, 256], strides = [1, 1]} : vector<8x1792xf32> to vector<8x256xf32>
    %111 = vector.extract_strided_slice %106 {offsets = [0, 1024], sizes = [8, 256], strides = [1, 1]} : vector<8x1792xf32> to vector<8x256xf32>
    %112 = vector.extract_strided_slice %106 {offsets = [0, 1280], sizes = [8, 256], strides = [1, 1]} : vector<8x1792xf32> to vector<8x256xf32>
    %113 = vector.extract_strided_slice %106 {offsets = [0, 1536], sizes = [8, 256], strides = [1, 1]} : vector<8x1792xf32> to vector<8x256xf32>
    %114 = tpu.concatenate %107, %108, %109, %110, %111, %112, %113 in 0 : vector<8x256xf32>, vector<8x256xf32>, vector<8x256xf32>, vector<8x256xf32>, vector<8x256xf32>, vector<8x256xf32>, vector<8x256xf32> -> vector<56x256xf32>
    %115 = vector.broadcast %104 : vector<1x256xf32> to vector<56x256xf32>
    %116 = arith.addf %114, %115 : vector<56x256xf32>
    %cst_25 = arith.constant 0.000000e+00 : f32
    %117 = vector.broadcast %cst_25 : f32 to vector<56x256xf32>
    %118 = arith.maximumf %116, %117 : vector<56x256xf32>
    %c0_26 = arith.constant 0 : index
    %c0_27 = arith.constant 0 : index
    %119 = vector.load %arg10[%c0_26, %c0_27] : memref<256x768xbf16, #tpu.memory_space<vmem>>, vector<256x768xbf16>
    %c0_28 = arith.constant 0 : index
    %c0_29 = arith.constant 0 : index
    %120 = vector.load %arg11[%c0_28, %c0_29] : memref<1x256xf32, #tpu.memory_space<vmem>>, vector<1x256xf32>
    %121 = arith.truncf %118 : vector<56x256xf32> to vector<56x256xbf16>
    %cst_30 = arith.constant dense<0.000000e+00> : vector<56x768xf32>
    %122 = tpu.matmul %121, %119, %cst_30 {dimension_numbers = #tpu.dot_dimension_numbers<[1], [0], [0], [1], [0, 0, 1, 1], [], []>} : vector<56x256xbf16>, vector<256x768xbf16>, vector<56x768xf32> -> vector<56x768xf32>
    %123 = vector.extract_strided_slice %122 {offsets = [0, 256], sizes = [8, 256], strides = [1, 1]} : vector<56x768xf32> to vector<8x256xf32>
    %124 = vector.extract_strided_slice %122 {offsets = [8, 0], sizes = [8, 256], strides = [1, 1]} : vector<56x768xf32> to vector<8x256xf32>
    %125 = vector.extract_strided_slice %122 {offsets = [0, 512], sizes = [8, 256], strides = [1, 1]} : vector<56x768xf32> to vector<8x256xf32>
    %126 = arith.addf %124, %125 : vector<8x256xf32>
    %127 = vector.extract_strided_slice %122 {offsets = [8, 256], sizes = [8, 256], strides = [1, 1]} : vector<56x768xf32> to vector<8x256xf32>
    %128 = vector.extract_strided_slice %122 {offsets = [16, 0], sizes = [8, 256], strides = [1, 1]} : vector<56x768xf32> to vector<8x256xf32>
    %129 = vector.extract_strided_slice %122 {offsets = [8, 512], sizes = [8, 256], strides = [1, 1]} : vector<56x768xf32> to vector<8x256xf32>
    %130 = arith.addf %128, %129 : vector<8x256xf32>
    %131 = vector.extract_strided_slice %122 {offsets = [16, 256], sizes = [8, 256], strides = [1, 1]} : vector<56x768xf32> to vector<8x256xf32>
    %132 = vector.extract_strided_slice %122 {offsets = [24, 0], sizes = [8, 256], strides = [1, 1]} : vector<56x768xf32> to vector<8x256xf32>
    %133 = vector.extract_strided_slice %122 {offsets = [16, 512], sizes = [8, 256], strides = [1, 1]} : vector<56x768xf32> to vector<8x256xf32>
    %134 = arith.addf %132, %133 : vector<8x256xf32>
    %135 = vector.extract_strided_slice %122 {offsets = [24, 256], sizes = [8, 256], strides = [1, 1]} : vector<56x768xf32> to vector<8x256xf32>
    %136 = vector.extract_strided_slice %122 {offsets = [32, 0], sizes = [8, 256], strides = [1, 1]} : vector<56x768xf32> to vector<8x256xf32>
    %137 = vector.extract_strided_slice %122 {offsets = [24, 512], sizes = [8, 256], strides = [1, 1]} : vector<56x768xf32> to vector<8x256xf32>
    %138 = arith.addf %136, %137 : vector<8x256xf32>
    %139 = vector.extract_strided_slice %122 {offsets = [32, 256], sizes = [8, 256], strides = [1, 1]} : vector<56x768xf32> to vector<8x256xf32>
    %140 = vector.extract_strided_slice %122 {offsets = [40, 0], sizes = [8, 256], strides = [1, 1]} : vector<56x768xf32> to vector<8x256xf32>
    %141 = vector.extract_strided_slice %122 {offsets = [32, 512], sizes = [8, 256], strides = [1, 1]} : vector<56x768xf32> to vector<8x256xf32>
    %142 = arith.addf %140, %141 : vector<8x256xf32>
    %143 = vector.extract_strided_slice %122 {offsets = [40, 256], sizes = [8, 256], strides = [1, 1]} : vector<56x768xf32> to vector<8x256xf32>
    %144 = vector.extract_strided_slice %122 {offsets = [48, 0], sizes = [8, 256], strides = [1, 1]} : vector<56x768xf32> to vector<8x256xf32>
    %145 = vector.extract_strided_slice %122 {offsets = [40, 512], sizes = [8, 256], strides = [1, 1]} : vector<56x768xf32> to vector<8x256xf32>
    %146 = arith.addf %144, %145 : vector<8x256xf32>
    %147 = vector.extract_strided_slice %122 {offsets = [48, 256], sizes = [8, 256], strides = [1, 1]} : vector<56x768xf32> to vector<8x256xf32>
    %148 = vector.extract_strided_slice %122 {offsets = [48, 512], sizes = [8, 256], strides = [1, 1]} : vector<56x768xf32> to vector<8x256xf32>
    %149 = tpu.concatenate %123, %126, %127, %130, %131, %134, %135, %138, %139, %142, %143, %146, %147, %148 in 0 : vector<8x256xf32>, vector<8x256xf32>, vector<8x256xf32>, vector<8x256xf32>, vector<8x256xf32>, vector<8x256xf32>, vector<8x256xf32>, vector<8x256xf32>, vector<8x256xf32>, vector<8x256xf32>, vector<8x256xf32>, vector<8x256xf32>, vector<8x256xf32>, vector<8x256xf32> -> vector<112x256xf32>
    %150 = vector.broadcast %120 : vector<1x256xf32> to vector<112x256xf32>
    %151 = arith.addf %149, %150 : vector<112x256xf32>
    %cst_31 = arith.constant 0.000000e+00 : f32
    %152 = vector.broadcast %cst_31 : f32 to vector<112x256xf32>
    %153 = arith.maximumf %151, %152 : vector<112x256xf32>
    %c0_32 = arith.constant 0 : index
    %c0_33 = arith.constant 0 : index
    %154 = vector.load %arg12[%c0_32, %c0_33] : memref<256x384xbf16, #tpu.memory_space<vmem>>, vector<256x384xbf16>
    %c0_34 = arith.constant 0 : index
    %c0_35 = arith.constant 0 : index
    %155 = vector.load %arg13[%c0_34, %c0_35] : memref<1x128xf32, #tpu.memory_space<vmem>>, vector<1x128xf32>
    %156 = arith.truncf %153 : vector<112x256xf32> to vector<112x256xbf16>
    %cst_36 = arith.constant dense<0.000000e+00> : vector<112x384xf32>
    %157 = tpu.matmul %156, %154, %cst_36 {dimension_numbers = #tpu.dot_dimension_numbers<[1], [0], [0], [1], [0, 0, 1, 1], [], []>} : vector<112x256xbf16>, vector<256x384xbf16>, vector<112x384xf32> -> vector<112x384xf32>
    %158 = vector.extract_strided_slice %157 {offsets = [0, 128], sizes = [8, 128], strides = [1, 1]} : vector<112x384xf32> to vector<8x128xf32>
    %159 = vector.extract_strided_slice %157 {offsets = [8, 0], sizes = [8, 128], strides = [1, 1]} : vector<112x384xf32> to vector<8x128xf32>
    %160 = vector.extract_strided_slice %157 {offsets = [0, 256], sizes = [8, 128], strides = [1, 1]} : vector<112x384xf32> to vector<8x128xf32>
    %161 = arith.addf %159, %160 : vector<8x128xf32>
    %162 = vector.extract_strided_slice %157 {offsets = [8, 128], sizes = [8, 128], strides = [1, 1]} : vector<112x384xf32> to vector<8x128xf32>
    %163 = vector.extract_strided_slice %157 {offsets = [16, 0], sizes = [8, 128], strides = [1, 1]} : vector<112x384xf32> to vector<8x128xf32>
    %164 = vector.extract_strided_slice %157 {offsets = [8, 256], sizes = [8, 128], strides = [1, 1]} : vector<112x384xf32> to vector<8x128xf32>
    %165 = arith.addf %163, %164 : vector<8x128xf32>
    %166 = vector.extract_strided_slice %157 {offsets = [16, 128], sizes = [8, 128], strides = [1, 1]} : vector<112x384xf32> to vector<8x128xf32>
    %167 = vector.extract_strided_slice %157 {offsets = [24, 0], sizes = [8, 128], strides = [1, 1]} : vector<112x384xf32> to vector<8x128xf32>
    %168 = vector.extract_strided_slice %157 {offsets = [16, 256], sizes = [8, 128], strides = [1, 1]} : vector<112x384xf32> to vector<8x128xf32>
    %169 = arith.addf %167, %168 : vector<8x128xf32>
    %170 = vector.extract_strided_slice %157 {offsets = [24, 128], sizes = [8, 128], strides = [1, 1]} : vector<112x384xf32> to vector<8x128xf32>
    %171 = vector.extract_strided_slice %157 {offsets = [32, 0], sizes = [8, 128], strides = [1, 1]} : vector<112x384xf32> to vector<8x128xf32>
    %172 = vector.extract_strided_slice %157 {offsets = [24, 256], sizes = [8, 128], strides = [1, 1]} : vector<112x384xf32> to vector<8x128xf32>
    %173 = arith.addf %171, %172 : vector<8x128xf32>
    %174 = vector.extract_strided_slice %157 {offsets = [32, 128], sizes = [8, 128], strides = [1, 1]} : vector<112x384xf32> to vector<8x128xf32>
    %175 = vector.extract_strided_slice %157 {offsets = [40, 0], sizes = [8, 128], strides = [1, 1]} : vector<112x384xf32> to vector<8x128xf32>
    %176 = vector.extract_strided_slice %157 {offsets = [32, 256], sizes = [8, 128], strides = [1, 1]} : vector<112x384xf32> to vector<8x128xf32>
    %177 = arith.addf %175, %176 : vector<8x128xf32>
    %178 = vector.extract_strided_slice %157 {offsets = [40, 128], sizes = [8, 128], strides = [1, 1]} : vector<112x384xf32> to vector<8x128xf32>
    %179 = vector.extract_strided_slice %157 {offsets = [48, 0], sizes = [8, 128], strides = [1, 1]} : vector<112x384xf32> to vector<8x128xf32>
    %180 = vector.extract_strided_slice %157 {offsets = [40, 256], sizes = [8, 128], strides = [1, 1]} : vector<112x384xf32> to vector<8x128xf32>
    %181 = arith.addf %179, %180 : vector<8x128xf32>
    %182 = vector.extract_strided_slice %157 {offsets = [48, 128], sizes = [8, 128], strides = [1, 1]} : vector<112x384xf32> to vector<8x128xf32>
    %183 = vector.extract_strided_slice %157 {offsets = [56, 0], sizes = [8, 128], strides = [1, 1]} : vector<112x384xf32> to vector<8x128xf32>
    %184 = vector.extract_strided_slice %157 {offsets = [48, 256], sizes = [8, 128], strides = [1, 1]} : vector<112x384xf32> to vector<8x128xf32>
    %185 = arith.addf %183, %184 : vector<8x128xf32>
    %186 = vector.extract_strided_slice %157 {offsets = [56, 128], sizes = [8, 128], strides = [1, 1]} : vector<112x384xf32> to vector<8x128xf32>
    %187 = vector.extract_strided_slice %157 {offsets = [64, 0], sizes = [8, 128], strides = [1, 1]} : vector<112x384xf32> to vector<8x128xf32>
    %188 = vector.extract_strided_slice %157 {offsets = [56, 256], sizes = [8, 128], strides = [1, 1]} : vector<112x384xf32> to vector<8x128xf32>
    %189 = arith.addf %187, %188 : vector<8x128xf32>
    %190 = vector.extract_strided_slice %157 {offsets = [64, 128], sizes = [8, 128], strides = [1, 1]} : vector<112x384xf32> to vector<8x128xf32>
    %191 = vector.extract_strided_slice %157 {offsets = [72, 0], sizes = [8, 128], strides = [1, 1]} : vector<112x384xf32> to vector<8x128xf32>
    %192 = vector.extract_strided_slice %157 {offsets = [64, 256], sizes = [8, 128], strides = [1, 1]} : vector<112x384xf32> to vector<8x128xf32>
    %193 = arith.addf %191, %192 : vector<8x128xf32>
    %194 = vector.extract_strided_slice %157 {offsets = [72, 128], sizes = [8, 128], strides = [1, 1]} : vector<112x384xf32> to vector<8x128xf32>
    %195 = vector.extract_strided_slice %157 {offsets = [80, 0], sizes = [8, 128], strides = [1, 1]} : vector<112x384xf32> to vector<8x128xf32>
    %196 = vector.extract_strided_slice %157 {offsets = [72, 256], sizes = [8, 128], strides = [1, 1]} : vector<112x384xf32> to vector<8x128xf32>
    %197 = arith.addf %195, %196 : vector<8x128xf32>
    %198 = vector.extract_strided_slice %157 {offsets = [80, 128], sizes = [8, 128], strides = [1, 1]} : vector<112x384xf32> to vector<8x128xf32>
    %199 = vector.extract_strided_slice %157 {offsets = [88, 0], sizes = [8, 128], strides = [1, 1]} : vector<112x384xf32> to vector<8x128xf32>
    %200 = vector.extract_strided_slice %157 {offsets = [80, 256], sizes = [8, 128], strides = [1, 1]} : vector<112x384xf32> to vector<8x128xf32>
    %201 = arith.addf %199, %200 : vector<8x128xf32>
    %202 = vector.extract_strided_slice %157 {offsets = [88, 128], sizes = [8, 128], strides = [1, 1]} : vector<112x384xf32> to vector<8x128xf32>
    %203 = vector.extract_strided_slice %157 {offsets = [96, 0], sizes = [8, 128], strides = [1, 1]} : vector<112x384xf32> to vector<8x128xf32>
    %204 = vector.extract_strided_slice %157 {offsets = [88, 256], sizes = [8, 128], strides = [1, 1]} : vector<112x384xf32> to vector<8x128xf32>
    %205 = arith.addf %203, %204 : vector<8x128xf32>
    %206 = vector.extract_strided_slice %157 {offsets = [96, 128], sizes = [8, 128], strides = [1, 1]} : vector<112x384xf32> to vector<8x128xf32>
    %207 = vector.extract_strided_slice %157 {offsets = [104, 0], sizes = [8, 128], strides = [1, 1]} : vector<112x384xf32> to vector<8x128xf32>
    %208 = vector.extract_strided_slice %157 {offsets = [96, 256], sizes = [8, 128], strides = [1, 1]} : vector<112x384xf32> to vector<8x128xf32>
    %209 = arith.addf %207, %208 : vector<8x128xf32>
    %210 = vector.extract_strided_slice %157 {offsets = [104, 128], sizes = [8, 128], strides = [1, 1]} : vector<112x384xf32> to vector<8x128xf32>
    %211 = vector.extract_strided_slice %157 {offsets = [104, 256], sizes = [8, 128], strides = [1, 1]} : vector<112x384xf32> to vector<8x128xf32>
    %212 = tpu.concatenate %158, %161, %162, %165, %166, %169, %170, %173, %174, %177, %178, %181, %182, %185, %186, %189 in 0 : vector<8x128xf32>, vector<8x128xf32>, vector<8x128xf32>, vector<8x128xf32>, vector<8x128xf32>, vector<8x128xf32>, vector<8x128xf32>, vector<8x128xf32>, vector<8x128xf32>, vector<8x128xf32>, vector<8x128xf32>, vector<8x128xf32>, vector<8x128xf32>, vector<8x128xf32>, vector<8x128xf32>, vector<8x128xf32> -> vector<128x128xf32>
    %213 = tpu.concatenate %190, %193, %194, %197, %198, %201, %202, %205, %206, %209, %210, %211 in 0 : vector<8x128xf32>, vector<8x128xf32>, vector<8x128xf32>, vector<8x128xf32>, vector<8x128xf32>, vector<8x128xf32>, vector<8x128xf32>, vector<8x128xf32>, vector<8x128xf32>, vector<8x128xf32>, vector<8x128xf32>, vector<8x128xf32> -> vector<96x128xf32>
    %214 = tpu.concatenate %212, %213 in 0 : vector<128x128xf32>, vector<96x128xf32> -> vector<224x128xf32>
    %215 = vector.broadcast %155 : vector<1x128xf32> to vector<224x128xf32>
    %216 = arith.addf %214, %215 : vector<224x128xf32>
    %cst_37 = arith.constant 0.000000e+00 : f32
    %217 = vector.broadcast %cst_37 : f32 to vector<224x128xf32>
    %218 = arith.subf %217, %216 : vector<224x128xf32>
    %219 = math.exp %218 : vector<224x128xf32>
    %cst_38 = arith.constant 1.000000e+00 : f32
    %220 = vector.broadcast %cst_38 : f32 to vector<224x128xf32>
    %221 = arith.addf %220, %219 : vector<224x128xf32>
    %222 = tpu.reciprocal %221 {approx = true} : vector<224x128xf32> -> vector<224x128xf32>
    %c0_39 = arith.constant 0 : index
    %c0_40 = arith.constant 0 : index
    %c0_41 = arith.constant 0 : index
    %223 = vector.load %arg14[%c0_39, %c0_40, %c0_41] : memref<1x224x128xf32, #tpu.memory_space<vmem>>, vector<1x224x128xf32>
    %224 = vector.shape_cast %223 : vector<1x224x128xf32> to vector<224x128xf32>
    %225 = vector.shape_cast %222 : vector<224x128xf32> to vector<1x224x128xf32>
    tpu.vector_store %arg14[%c0_39, %c0_40, %c0_41], %225 {strides = array<i32>} : memref<1x224x128xf32, #tpu.memory_space<vmem>>, vector<1x224x128xf32>,
    return
  }
  func.func @transform_0(%arg0: i32) -> (i32, i32, i32) {
    %c0_i32 = arith.constant 0 : i32
    %c0_i32_0 = arith.constant 0 : i32
    %c0_i32_1 = arith.constant 0 : i32
    return %arg0, %c0_i32, %c0_i32_0 : i32, i32, i32
  }
  func.func @transform_1(%arg0: i32) -> (i32, i32) {
    %c0_i32 = arith.constant 0 : i32
    %c0_i32_0 = arith.constant 0 : i32
    %c0_i32_1 = arith.constant 0 : i32
    return %c0_i32, %c0_i32_0 : i32, i32
  }
  func.func @transform_2(%arg0: i32) -> (i32, i32) {
    %c0_i32 = arith.constant 0 : i32
    %c0_i32_0 = arith.constant 0 : i32
    %c0_i32_1 = arith.constant 0 : i32
    return %c0_i32, %c0_i32_0 : i32, i32
  }
  func.func @transform_3(%arg0: i32) -> (i32, i32) {
    %c0_i32 = arith.constant 0 : i32
    %c0_i32_0 = arith.constant 0 : i32
    %c0_i32_1 = arith.constant 0 : i32
    return %c0_i32, %c0_i32_0 : i32, i32
  }
  func.func @transform_4(%arg0: i32) -> (i32, i32) {
    %c0_i32 = arith.constant 0 : i32
    %c0_i32_0 = arith.constant 0 : i32
    %c0_i32_1 = arith.constant 0 : i32
    return %c0_i32, %c0_i32_0 : i32, i32
  }
  func.func @transform_5(%arg0: i32) -> (i32, i32) {
    %c0_i32 = arith.constant 0 : i32
    %c0_i32_0 = arith.constant 0 : i32
    %c0_i32_1 = arith.constant 0 : i32
    return %c0_i32, %c0_i32_0 : i32, i32
  }
  func.func @transform_6(%arg0: i32) -> (i32, i32) {
    %c0_i32 = arith.constant 0 : i32
    %c0_i32_0 = arith.constant 0 : i32
    %c0_i32_1 = arith.constant 0 : i32
    return %c0_i32, %c0_i32_0 : i32, i32
  }
  func.func @transform_7(%arg0: i32) -> (i32, i32) {
    %c0_i32 = arith.constant 0 : i32
    %c0_i32_0 = arith.constant 0 : i32
    %c0_i32_1 = arith.constant 0 : i32
    return %c0_i32, %c0_i32_0 : i32, i32
  }
  func.func @transform_8(%arg0: i32) -> (i32, i32) {
    %c0_i32 = arith.constant 0 : i32
    %c0_i32_0 = arith.constant 0 : i32
    %c0_i32_1 = arith.constant 0 : i32
    return %c0_i32, %c0_i32_0 : i32, i32
  }
  func.func @transform_9(%arg0: i32) -> (i32, i32) {
    %c0_i32 = arith.constant 0 : i32
    %c0_i32_0 = arith.constant 0 : i32
    %c0_i32_1 = arith.constant 0 : i32
    return %c0_i32, %c0_i32_0 : i32, i32
  }
  func.func @transform_10(%arg0: i32) -> (i32, i32) {
    %c0_i32 = arith.constant 0 : i32
    %c0_i32_0 = arith.constant 0 : i32
    %c0_i32_1 = arith.constant 0 : i32
    return %c0_i32, %c0_i32_0 : i32, i32
  }
  func.func @transform_11(%arg0: i32) -> (i32, i32) {
    %c0_i32 = arith.constant 0 : i32
    %c0_i32_0 = arith.constant 0 : i32
    %c0_i32_1 = arith.constant 0 : i32
    return %c0_i32, %c0_i32_0 : i32, i32
  }
  func.func @transform_12(%arg0: i32) -> (i32, i32) {
    %c0_i32 = arith.constant 0 : i32
    %c0_i32_0 = arith.constant 0 : i32
    %c0_i32_1 = arith.constant 0 : i32
    return %c0_i32, %c0_i32_0 : i32, i32
  }
  func.func @transform_13(%arg0: i32) -> (i32, i32, i32) {
    %c0_i32 = arith.constant 0 : i32
    %c0_i32_0 = arith.constant 0 : i32
    %c0_i32_1 = arith.constant 0 : i32
    return %arg0, %c0_i32, %c0_i32_0 : i32, i32, i32
  }
}

</mosaic_0001>

<bundles_post_ra>
// kernel: autoencoder_forward.1
= control target key start
LH: loop header
LB: loop body
LE: loop exit
PB: predicated region body
PF: predicated region fallthrough
CT: control target
= control target key end

     0   :  { %s7492_s25 = smov 0   ;;  %s9520_s0 = inlined_call_operand.vmem [shape: f32[2,224,128], index: 0, kind: input, shape index: {}]   ;;  %s9521_s1 = inlined_call_operand.vmem [shape: bf16[384,256], index: 1, kind: input, shape index: {}]   ;;  %s9522_s2 = inlined_call_operand.vmem [shape: f32[1,256], index: 2, kind: input, shape index: {}]   ;;  %s9523_s3 = inlined_call_operand.vmem [shape: bf16[768,256], index: 3, kind: input, shape index: {}]   ;;  %s9524_s4 = inlined_call_operand.vmem [shape: f32[1,256], index: 4, kind: input, shape index: {}]   ;;  %s9525_s5 = inlined_call_operand.vmem [shape: bf16[1792,128], index: 5, kind: input, shape index: {}]   ;;  %s9526_s6 = inlined_call_operand.vmem [shape: f32[1,128], index: 6, kind: input, shape index: {}]   ;;  %s9527_s7 = inlined_call_operand.vmem [shape: bf16[128,1792], index: 7, kind: input, shape index: {}]   ;;  %s9528_s8 = inlined_call_operand.vmem [shape: f32[1,256], index: 8, kind: input, shape index: {}]   ;;  %s9529_s9 = inlined_call_operand.vmem [shape: bf16[256,768], index: 9, kind: input, shape index: {}]   ;;  %s9530_s10 = inlined_call_operand.vmem [shape: f32[1,256], index: 10, kind: input, shape index: {}]   ;;  %s9531_s11 = inlined_call_operand.vmem [shape: bf16[256,384], index: 11, kind: input, shape index: {}]   ;;  %s9532_s12 = inlined_call_operand.vmem [shape: f32[1,128], index: 12, kind: input, shape index: {}]   ;;  %s9533_s13 = inlined_call_operand.vmem [shape: f32[2,224,128], index: 13, kind: output, shape index: {}]  }
   0x1 LB: > { %s5732_s26 = sadd.s32 4294967295, %s7418_s25   ;;  %p5736_p0 = scmp.ge.s32.totalorder %s7418_s25, 1  ;;  %s7418_s25 = sphi %s7492_s25, %s23_s25  }
   0x2   : > { %p387_p1 = scmp.lt.s32.totalorder %s7418_s25, 3 }
   0x4   : > { %p388_p2 = pnand %p5736_p0, %p387_p1 }
   0x5   : > { %v6596_v0 = vld [vmem:[%s9521_s1 + $0x4] ss:$8 sps:$4 sm:$0xff] (!%p388_p2)   ;;  %v6598_v1 = vld [vmem:[%s9521_s1] ss:$8 sps:$4 sm:$0xff] (!%p388_p2)   ;;  %v6599_v2 = vld [vmem:[%s9521_s1 + $0x14] ss:$8 sps:$4 sm:$0xff] (!%p388_p2)  }
   0x6   : > { %391 = sbr.rel (%p388_p2) target bundleno = 1865 (0x749), region = 72  ;;  %791 = vmatprep.subr.bf16.mxu0 (!%p388_p2), %v6596_v0  ;;  %v6601_v3 = vld [vmem:[%s9521_s1 + $0x10] ss:$8 sps:$4 sm:$0xff] (!%p388_p2)   ;;  %v6602_v4 = vld [vmem:[%s9521_s1 + $0x24] ss:$8 sps:$4 sm:$0xff] (!%p388_p2)   ;;  %p431_p3 = scmp.lt.s32.totalorder (!%p388_p2), %s5732_s26, 1 }
   0x7   : > { %792 = vmatpush1.bf16.msra.mxu0 (!%p388_p2), %v6598_v1  ;;  %v6604_v5 = vld [vmem:[%s9521_s1 + $0x20] ss:$8 sps:$4 sm:$0xff] (!%p388_p2)   ;;  %v6605_v6 = vld [vmem:[%s9521_s1 + $0x34] ss:$8 sps:$4 sm:$0xff] (!%p388_p2)   ;;  %v6607_v7 = vld [vmem:[%s9521_s1 + $0x30] ss:$8 sps:$4 sm:$0xff] (!%p388_p2)  }
   0x8   : > { %793 = vmatprep.subr.bf16.mxu0 (!%p388_p2), %v6599_v2  ;;  %v6608_v8 = vld [vmem:[%s9521_s1 + $0x44] ss:$8 sps:$4 sm:$0xff] (!%p388_p2)   ;;  %v6610_v9 = vld [vmem:[%s9521_s1 + $0x40] ss:$8 sps:$4 sm:$0xff] (!%p388_p2)   ;;  %v6611_v10 = vld [vmem:[%s9521_s1 + $0x54] ss:$8 sps:$4 sm:$0xff] (!%p388_p2)  }
   0x9   : > { %v6613_v11 = vld [vmem:[%s9521_s1 + $0x50] ss:$8 sps:$4 sm:$0xff] (!%p388_p2)   ;;  %v6614_v12 = vld [vmem:[%s9521_s1 + $0x64] ss:$8 sps:$4 sm:$0xff] (!%p388_p2)   ;;  %v6616_v16 = vld [vmem:[%s9521_s1 + $0x60] ss:$8 sps:$4 sm:$0xff] (!%p388_p2)  }
   0xa   : > { %v6617_v17 = vld [vmem:[%s9521_s1 + $0x74] ss:$8 sps:$4 sm:$0xff] (!%p388_p2)   ;;  %v6619_v18 = vld [vmem:[%s9521_s1 + $0x70] ss:$8 sps:$4 sm:$0xff] (!%p388_p2)   ;;  %v6620_v19 = vld [vmem:[%s9521_s1 + $0x84] ss:$8 sps:$4 sm:$0xff] (!%p388_p2)  }
   0xb   : > { %794 = vmatpush1.bf16.msra.mxu0 (!%p388_p2), %v6601_v3  ;;  %v6622_v20 = vld [vmem:[%s9521_s1 + $0x80] ss:$8 sps:$4 sm:$0xff] (!%p388_p2)   ;;  %v6623_v21 = vld [vmem:[%s9521_s1 + $0x94] ss:$8 sps:$4 sm:$0xff] (!%p388_p2)   ;;  %v6625_v22 = vld [vmem:[%s9521_s1 + $0x90] ss:$8 sps:$4 sm:$0xff] (!%p388_p2)  }
   0xc   : > { %795 = vmatprep.subr.bf16.mxu0 (!%p388_p2), %v6602_v4  ;;  %v6626_v23 = vld [vmem:[%s9521_s1 + $0xa4] ss:$8 sps:$4 sm:$0xff] (!%p388_p2)   ;;  %v6628_v24 = vld [vmem:[%s9521_s1 + $0xa0] ss:$8 sps:$4 sm:$0xff] (!%p388_p2)   ;;  %v6629_v25 = vld [vmem:[%s9521_s1 + $0xb4] ss:$8 sps:$4 sm:$0xff] (!%p388_p2)  }
   0xd   : > { %s9535_s26 = smov (!%p431_p3, %s5732_s26), 1  ;;  %v6668_v26 = vld [vmem:[%s9523_s3 + $0x4] ss:$8 sps:$4 sm:$0xff]   ;;  %v6670_v27 = vld [vmem:[%s9523_s3] ss:$8 sps:$4 sm:$0xff]   ;;  %v7420_v53 = vmov 0.0  }
   0xe   : > { %s6585_s30 = smul.u32 224, %s9535_s26  ;;  %v6631_v28 = vld [vmem:[%s9521_s1 + $0xb0] ss:$8 sps:$4 sm:$0xff]   ;;  %v6671_v29 = vld [vmem:[%s9523_s3 + $0x14] ss:$8 sps:$4 sm:$0xff]   ;;  %1637 = vmatprep.subr.bf16.mxu1 %v6668_v26 }
   0xf   : > { %796 = vmatpush1.bf16.msra.mxu0 %v6604_v5  ;;  %v6632_v30 = vld [vmem:[%s9521_s1 + $0xc4] ss:$8 sps:$4 sm:$0xff]   ;;  %1638 = vmatpush1.bf16.msra.mxu1 %v6670_v27  ;;  %v6673_v31 = vld [vmem:[%s9523_s3 + $0x10] ss:$8 sps:$4 sm:$0xff]   ;;  %v6634_v33 = vld [vmem:[%s9521_s1 + $0xc0] ss:$8 sps:$4 sm:$0xff]  }
  0x10   : > { %797 = vmatprep.subr.bf16.mxu0 %v6605_v6  ;;  %s7541_s20 = scalar_lea.vmem %s9520_s0, %s6585_s30  ;;  %1639 = vmatprep.subr.bf16.mxu1 %v6671_v29  ;;  %v6674_v32 = vld [vmem:[%s9523_s3 + $0x24] ss:$8 sps:$4 sm:$0xff]   ;;  %v6635_v34 = vld [vmem:[%s9521_s1 + $0xd4] ss:$8 sps:$4 sm:$0xff]   ;;  %v6676_v35 = vld [vmem:[%s9523_s3 + $0x20] ss:$8 sps:$4 sm:$0xff]   ;;  %s9469_s27 = scalar_lea.vmem %s9533_s13, %s6585_s30 }
  0x11   : > { %v442_v13 = vld [vmem:[%s7541_s20] sm:$0xff]  ;;  %v444_v14 = vld [vmem:[%s7541_s20 + $0x10] sm:$0xff]  ;;  %v7636_v44 = vld [vmem:[%s7541_s20 + $0x8] sm:$0xff] }
  0x12   : > { %v520_v15 = vpack.c.bf16 %v444_v14, %v442_v13  ;;  %v6677_v36 = vld [vmem:[%s9523_s3 + $0x34] ss:$8 sps:$4 sm:$0xff]   ;;  %v6637_v37 = vld [vmem:[%s9521_s1 + $0xd0] ss:$8 sps:$4 sm:$0xff]   ;;  %v6638_v38 = vld [vmem:[%s9521_s1 + $0xe4] ss:$8 sps:$4 sm:$0xff]   ;;  %v519_v54 = vpack.c.bf16 %v7636_v44, %v7420_v53 }
  0x13   : > { %798 = vmatpush1.bf16.msra.mxu0 %v6607_v7  ;;  %1640 = vmatpush1.bf16.msra.mxu1 %v6673_v31  ;;  %v6679_v39 = vld [vmem:[%s9523_s3 + $0x30] ss:$8 sps:$4 sm:$0xff]   ;;  %v6680_v40 = vld [vmem:[%s9523_s3 + $0x44] ss:$8 sps:$4 sm:$0xff]   ;;  %v6640_v41 = vld [vmem:[%s9521_s1 + $0xe0] ss:$8 sps:$4 sm:$0xff]  }
  0x14   : > { %799 = vmatprep.subr.bf16.mxu0 %v6608_v8  ;;  %823 = vmatprep.mubr.bf16.mxu0 %v520_v15  ;;  %v6641_v42 = vld [vmem:[%s9521_s1 + $0xf4] ss:$8 sps:$4 sm:$0xff]   ;;  %v6643_v43 = vld [vmem:[%s9521_s1 + $0xf0] ss:$8 sps:$4 sm:$0xff]   ;;  %v6682_v45 = vld [vmem:[%s9523_s3 + $0x40] ss:$8 sps:$4 sm:$0xff]  }
  0x15   : > { %1641 = vmatprep.subr.bf16.mxu1 %v6674_v32  ;;  %v6646_v46 = vld [vmem:[%s9521_s1 + $0x104] ss:$8 sps:$4 sm:$0xff]   ;;  %v6683_v48 = vld [vmem:[%s9523_s3 + $0x54] ss:$8 sps:$4 sm:$0xff]   ;;  %v6685_v50 = vld [vmem:[%s9523_s3 + $0x50] ss:$8 sps:$4 sm:$0xff]  }
  0x16   : > { %v446_v47 = vld [vmem:[%s7541_s20 + $0x20] sm:$0xff]  ;;  %v448_v49 = vld [vmem:[%s7541_s20 + $0x30] sm:$0xff]  ;;  %v7673_v60 = vld [vmem:[%s7541_s20 + $0x18] sm:$0xff] }
  0x17   : > { %800 = vmatpush1.bf16.msra.mxu0 %v6610_v9  ;;  %1642 = vmatpush1.bf16.msra.mxu1 %v6676_v35  ;;  %v6686_v51 = vld [vmem:[%s9523_s3 + $0x64] ss:$8 sps:$4 sm:$0xff]   ;;  %v6644_v52 = vld [vmem:[%s9521_s1 + $0x100] ss:$8 sps:$4 sm:$0xff]   ;;  %v6649_v55 = vld [vmem:[%s9521_s1 + $0x114] ss:$8 sps:$4 sm:$0xff]   ;;  %v523_v56 = vpack.c.bf16 %v448_v49, %v446_v47 }
  0x18   : > { %801 = vmatprep.subr.bf16.mxu0 %v6611_v10  ;;  %1643 = vmatprep.subr.bf16.mxu1 %v6677_v36  ;;  %v6688_v57 = vld [vmem:[%s9523_s3 + $0x60] ss:$8 sps:$4 sm:$0xff]   ;;  %v6689_v58 = vld [vmem:[%s9523_s3 + $0x74] ss:$8 sps:$4 sm:$0xff]   ;;  %v6647_v59 = vld [vmem:[%s9521_s1 + $0x110] ss:$8 sps:$4 sm:$0xff]  }
  0x19   : > { %v7676_v61 = vld [vmem:[%s7541_s20 + $0x28] sm:$0xff]  ;;  %v450_v63 = vld [vmem:[%s7541_s20 + $0x40] sm:$0xff]  ;;  %v452_v0 = vld [vmem:[%s7541_s20 + $0x50] sm:$0xff] }
  0x1a   : > { %v6652_v62 = vld [vmem:[%s9521_s1 + $0x124] ss:$8 sps:$4 sm:$0xff]   ;;  %v6691_v1 = vld [vmem:[%s9523_s3 + $0x70] ss:$8 sps:$4 sm:$0xff]   ;;  %v6650_v3 = vld [vmem:[%s9521_s1 + $0x120] ss:$8 sps:$4 sm:$0xff]   ;;  %v522_v4 = vpack.c.bf16 %v7676_v61, %v7673_v60  ;;  %v526_v6 = vpack.c.bf16 %v452_v0, %v450_v63 }
  0x1b   : > { %802 = vmatpush1.bf16.msra.mxu0 %v6613_v11  ;;  %1644 = vmatpush1.bf16.msra.mxu1 %v6679_v39  ;;  %v6692_v2 = vld [vmem:[%s9523_s3 + $0x84] ss:$8 sps:$4 sm:$0xff]   ;;  %v6655_v5 = vld [vmem:[%s9521_s1 + $0x134] ss:$8 sps:$4 sm:$0xff]   ;;  %v6694_v7 = vld [vmem:[%s9523_s3 + $0x80] ss:$8 sps:$4 sm:$0xff]  }
  0x1c   : > { %803 = vmatprep.subr.bf16.mxu0 %v6614_v12  ;;  %1645 = vmatprep.subr.bf16.mxu1 %v6680_v40  ;;  %v6695_v8 = vld [vmem:[%s9523_s3 + $0x94] ss:$8 sps:$4 sm:$0xff]   ;;  %v7707_v10 = vld [vmem:[%s7541_s20 + $0x48] sm:$0xff]  ;;  %v6653_v11 = vld [vmem:[%s9521_s1 + $0x130] ss:$8 sps:$4 sm:$0xff]  }
  0x1d   : > { %v7704_v9 = vld [vmem:[%s7541_s20 + $0x38] sm:$0xff]  ;;  %v454_v12 = vld [vmem:[%s7541_s20 + $0x60] sm:$0xff]  ;;  %v456_v13 = vld [vmem:[%s7541_s20 + $0x70] sm:$0xff] }
  0x1e   : > { %v6658_v14 = vld [vmem:[%s9521_s1 + $0x144] ss:$8 sps:$4 sm:$0xff]   ;;  %v6697_v15 = vld [vmem:[%s9523_s3 + $0x90] ss:$8 sps:$4 sm:$0xff]   ;;  %v6662_v31 = vld [vmem:[%s9521_s1 + $0x160] ss:$8 sps:$4 sm:$0xff]  }
  0x1f   : > { %804 = vmatpush1.bf16.msra.mxu0 %v6616_v16  ;;  %1646 = vmatpush1.bf16.msra.mxu1 %v6682_v45  ;;  %v6698_v16 = vld [vmem:[%s9523_s3 + $0xa4] ss:$8 sps:$4 sm:$0xff]   ;;  %v460_v27 = vld [vmem:[%s7541_s20 + $0x90] sm:$0xff]  ;;  %v6706_v35 = vld [vmem:[%s9523_s3 + $0xc0] ss:$8 sps:$4 sm:$0xff]  }
  0x20   : > { %805 = vmatprep.subr.bf16.mxu0 %v6617_v17  ;;  %1647 = vmatprep.subr.bf16.mxu1 %v6683_v48  ;;  %v6656_v17 = vld [vmem:[%s9521_s1 + $0x140] ss:$8 sps:$4 sm:$0xff]   ;;  %v6703_v29 = vld [vmem:[%s9523_s3 + $0xb0] ss:$8 sps:$4 sm:$0xff]   ;;  %v6707_v36 = vld [vmem:[%s9523_s3 + $0xd4] ss:$8 sps:$4 sm:$0xff]  }
  0x21   : > { %v458_v26 = vld [vmem:[%s7541_s20 + $0x80] sm:$0xff]  ;;  %v6665_v39 = vld [vmem:[%s9521_s1 + $0x170] ss:$8 sps:$4 sm:$0xff]   ;;  %v463_v47 = vld [vmem:[%s7541_s20 + $0xa8] sm:$0xff] }
  0x22   : > { %v462_v40 = vld [vmem:[%s7541_s20 + $0xa0] sm:$0xff]  ;;  %v468_v49 = vld [vmem:[%s7541_s20 + $0xd0] sm:$0xff] }
  0x23   : > { %806 = vmatpush1.bf16.msra.mxu0 %v6619_v18  ;;  %1648 = vmatpush1.bf16.msra.mxu1 %v6685_v50  ;;  %v525_v18 = vpack.c.bf16 %v7707_v10, %v7704_v9  ;;  %v466_v48 = vld [vmem:[%s7541_s20 + $0xc0] sm:$0xff] }
  0x24   : > { %807 = vmatprep.subr.bf16.mxu0 %v6620_v19  ;;  %1649 = vmatprep.subr.bf16.mxu1 %v6686_v51  ;;  %v6661_v19 = vld [vmem:[%s9521_s1 + $0x154] ss:$8 sps:$4 sm:$0xff]   ;;  %v538_v51 = vpack.c.bf16 %v468_v49, %v466_v48  ;;  %v6710_v0 = vld [vmem:[%s9523_s3 + $0xe4] ss:$8 sps:$4 sm:$0xff]  }
  0x27   : > { %808 = vmatpush1.bf16.msra.mxu0 %v6622_v20  ;;  %1650 = vmatpush1.bf16.msra.mxu1 %v6688_v57  ;;  %v529_v20 = vpack.c.bf16 %v456_v13, %v454_v12  ;;  %v521_v57 = vpack.c.bf16 %v7673_v60, %v7636_v44 }
  0x28   : > { %809 = vmatprep.subr.bf16.mxu0 %v6623_v21  ;;  %1651 = vmatprep.subr.bf16.mxu1 %v6689_v58  ;;  %v6700_v21 = vld [vmem:[%s9523_s3 + $0xa0] ss:$8 sps:$4 sm:$0xff]   ;;  %v524_v58 = vpack.c.bf16 %v7704_v9, %v7676_v61  ;;  %v469_v61 = vld [vmem:[%s7541_s20 + $0xd8] sm:$0xff] }
  0x2b   : > { %810 = vmatpush1.bf16.msra.mxu0 %v6625_v22  ;;  %1652 = vmatpush1.bf16.msra.mxu1 %v6691_v1  ;;  %v6701_v22 = vld [vmem:[%s9523_s3 + $0xb4] ss:$8 sps:$4 sm:$0xff]   ;;  %v6712_v1 = vld [vmem:[%s9523_s3 + $0xe0] ss:$8 sps:$4 sm:$0xff]  }
  0x2c   : > { %811 = vmatprep.subr.bf16.mxu0 %v6626_v23  ;;  %1653 = vmatprep.subr.bf16.mxu1 %v6692_v2  ;;  %v7738_v23 = vld [vmem:[%s7541_s20 + $0x58] sm:$0xff] }
  0x2d   : > { %v6713_v2 = vld [vmem:[%s9523_s3 + $0xf4] ss:$8 sps:$4 sm:$0xff]  }
  0x2f   : > { %812 = vmatpush1.bf16.msra.mxu0 %v6628_v24  ;;  %1654 = vmatpush1.bf16.msra.mxu1 %v6694_v7  ;;  %v7741_v24 = vld [vmem:[%s7541_s20 + $0x68] sm:$0xff] }
  0x30   : > { %813 = vmatprep.subr.bf16.mxu0 %v6629_v25  ;;  %1655 = vmatprep.subr.bf16.mxu1 %v6695_v8  ;;  %v6659_v25 = vld [vmem:[%s9521_s1 + $0x150] ss:$8 sps:$4 sm:$0xff]   ;;  %v528_v32 = vpack.c.bf16 %v7741_v24, %v7738_v23  ;;  %v518_v8 = vld [vmem:[%s9522_s2] sm:$0x3] }
  0x33   : > { %814 = vmatpush1.bf16.msra.mxu0 %v6631_v28  ;;  %1656 = vmatpush1.bf16.msra.mxu1 %v6697_v15  ;;  %v6664_v28 = vld [vmem:[%s9521_s1 + $0x164] ss:$8 sps:$4 sm:$0xff]  }
  0x34   : > { %815 = vmatprep.subr.bf16.mxu0 %v6632_v30  ;;  %1657 = vmatprep.subr.bf16.mxu1 %v6698_v16  ;;  %v6704_v30 = vld [vmem:[%s9523_s3 + $0xc4] ss:$8 sps:$4 sm:$0xff]  }
  0x37   : > { %816 = vmatpush1.bf16.msra.mxu0 %v6634_v33  ;;  %1658 = vmatpush1.bf16.msra.mxu1 %v6700_v21  ;;  %v6667_v33 = vld [vmem:[%s9521_s1 + $0x174] ss:$8 sps:$4 sm:$0xff]  }
  0x38   : > { %817 = vmatprep.subr.bf16.mxu0 %v6635_v34  ;;  %1659 = vmatprep.subr.bf16.mxu1 %v6701_v22  ;;  %v532_v34 = vpack.c.bf16 %v460_v27, %v458_v26 }
  0x3b   : > { %818 = vmatpush1.bf16.msra.mxu0 %v6637_v37  ;;  %v457_v37 = vld [vmem:[%s7541_s20 + $0x78] sm:$0xff]  ;;  %1660 = vmatpush1.bf16.msra.mxu1 %v6703_v29 }
  0x3c   : > { %819 = vmatprep.subr.bf16.mxu0 %v6638_v38  ;;  %v459_v38 = vld [vmem:[%s7541_s20 + $0x88] sm:$0xff]  ;;  %1661 = vmatprep.subr.bf16.mxu1 %v6704_v30 }
  0x3f   : > { %820 = vmatpush1.bf16.msra.mxu0 %v6640_v41  ;;  %v464_v41 = vld [vmem:[%s7541_s20 + $0xb0] sm:$0xff]  ;;  %1662 = vmatpush1.bf16.msra.mxu1 %v6706_v35 }
  0x40   : > { %821 = vmatprep.subr.bf16.mxu0 %v6641_v42  ;;  %v6709_v42 = vld [vmem:[%s9523_s3 + $0xd0] ss:$8 sps:$4 sm:$0xff]   ;;  %1663 = vmatprep.subr.bf16.mxu1 %v6707_v36  ;;  %v535_v45 = vpack.c.bf16 %v464_v41, %v462_v40  ;;  %v6724_v40 = vld [vmem:[%s9523_s3 + $0x124] ss:$8 sps:$4 sm:$0xff]  }
  0x43   : > { %822 = vmatpush1.bf16.msra.mxu0 %v6643_v43  ;;  %v531_v43 = vpack.c.bf16 %v459_v38, %v457_v37  ;;  %1664 = vmatpush1.bf16.msra.mxu1 %v6709_v42 }
  0x44   : > { %894 = vmatprep.subr.bf16.mxu0 %v6646_v46  ;;  %v461_v46 = vld [vmem:[%s7541_s20 + $0x98] sm:$0xff]  ;;  %1665 = vmatprep.subr.bf16.mxu1 %v6710_v0  ;;  %v6728_v0 = vld [vmem:[%s9523_s3 + $0x140] ss:$8 sps:$4 sm:$0xff]  }
  0x45   : > { %v534_v50 = vpack.c.bf16 %v463_v47, %v461_v46  ;;  %v533_v44 = vpack.c.bf16 %v461_v46, %v459_v38 }
  0x46   : > { %824 = vmatmul.mubr.bf16.vlgmr.msra.gmra.mrb[0].mxu0 %v519_v54  ;;  %v467_v54 = vld [vmem:[%s7541_s20 + $0xc8] sm:$0xff] }
  0x47   : > { %895 = vmatpush1.bf16.msra.mxu0 %v6644_v52  ;;  %833 = vmatprep.mubr.bf16.mxu0 %v523_v56  ;;  %v465_v52 = vld [vmem:[%s7541_s20 + $0xb8] sm:$0xff]  ;;  %v7421_v56 = vmov 0   ;;  %v539_v63 = vpack.c.bf16 %v469_v61, %v467_v54 }
  0x48   : > { %896 = vmatprep.subr.bf16.mxu0 %v6649_v55  ;;  %v537_v55 = vpack.c.bf16 %v467_v54, %v465_v52  ;;  %v536_v60 = vpack.c.bf16 %v465_v52, %v463_v47  ;;  %1666 = vmatpush1.bf16.msra.mxu1 %v6712_v1  ;;  %v6722_v47 = vld [vmem:[%s9523_s3 + $0x120] ss:$8 sps:$4 sm:$0xff]  }
  0x49   : > { %1667 = vmatprep.subr.bf16.mxu1 %v6713_v2 }
  0x4b   : > { %897 = vmatpush1.bf16.msra.mxu0 %v6647_v59  ;;  %v527_v59 = vpack.c.bf16 %v7738_v23, %v7707_v10 }
  0x4c   : > { %898 = vmatprep.subr.bf16.mxu0 %v6652_v62  ;;  %v530_v62 = vpack.c.bf16 %v457_v37, %v7741_v24  ;;  %v6716_v24 = vld [vmem:[%s9523_s3 + $0x100] ss:$8 sps:$4 sm:$0xff]   ;;  %v6719_v37 = vld [vmem:[%s9523_s3 + $0x110] ss:$8 sps:$4 sm:$0xff]  }
  0x4e   : > { %834 = vmatmul.mubr.bf16.gmra.mrb[4].mxu0 %v522_v4  ;;  %v6718_v4 = vld [vmem:[%s9523_s3 + $0x104] ss:$8 sps:$4 sm:$0xff]  }
  0x4f   : > { %843 = vmatprep.mubr.bf16.mxu0 %v526_v6  ;;  %899 = vmatpush1.bf16.msra.mxu0 %v6650_v3  ;;  %v6715_v3 = vld [vmem:[%s9523_s3 + $0xf0] ss:$8 sps:$4 sm:$0xff]  }
  0x50   : > { %900 = vmatprep.subr.bf16.mxu0 %v6655_v5  ;;  %1668 = vmatpush1.bf16.msra.mxu1 %v6715_v3  ;;  %v541_v5 = vlaneseq  ;;  %v6733_v3 = vld [vmem:[%s9523_s3 + $0x154] ss:$8 sps:$4 sm:$0xff]  }
  0x51   : > { %1708 = vmatprep.subr.bf16.mxu1 %v6718_v4 }
  0x52   : > { %v542_v6 = vshrl.u32 %v541_v5, 7 }
  0x53   : > { %901 = vmatpush1.bf16.msra.mxu0 %v6653_v11 }
  0x54   : > { %902 = vmatprep.subr.bf16.mxu0 %v6658_v14  ;;  %v7817_v7 = vsub.s32 0, %v542_v6  ;;  %v7825_v10 = vsub.s32 1, %v542_v6 }
  0x56   : > { %844 = vmatmul.mubr.bf16.gmra.mrb[8].mxu0 %v525_v18  ;;  %v7823_v9 = vrot.slane %v518_v8, %v7817_v7  ;;  %v7829_v14 = vrot.slane %v518_v8, %v7825_v10 }
  0x57   : > { %853 = vmatprep.mubr.bf16.mxu0 %v529_v20  ;;  %903 = vmatpush1.bf16.msra.mxu0 %v6656_v17 }
  0x58   : > { %904 = vmatprep.subr.bf16.mxu0 %v6661_v19 }
  0x5b   : > { %905 = vmatpush1.bf16.msra.mxu0 %v6659_v25 }
  0x5c   : > { %906 = vmatprep.subr.bf16.mxu0 %v6664_v28  ;;  %v6721_v28 = vld [vmem:[%s9523_s3 + $0x114] ss:$8 sps:$4 sm:$0xff]  }
  0x5e   : > { %854 = vmatmul.mubr.bf16.gmra.mrb[12].mxu0 %v528_v32 }
  0x5f   : > { %863 = vmatprep.mubr.bf16.mxu0 %v532_v34  ;;  %907 = vmatpush1.bf16.msra.mxu0 %v6662_v31 }
  0x60   : > { %908 = vmatprep.subr.bf16.mxu0 %v6667_v33 }
  0x63   : > { %909 = vmatpush1.bf16.msra.mxu0 %v6665_v39 }
  0x66   : > { %864 = vmatmul.mubr.bf16.gmra.mrb[16].mxu0 %v531_v43 }
  0x67   : > { %873 = vmatprep.mubr.bf16.mxu0 %v535_v45 }
  0x6e   : > { %874 = vmatmul.mubr.bf16.gmra.mrb[20].mxu0 %v534_v50  ;;  %v6727_v50 = vld [vmem:[%s9523_s3 + $0x134] ss:$8 sps:$4 sm:$0xff]  }
  0x6f   : > { %883 = vmatprep.mubr.bf16.mxu0 %v538_v51 }
  0x76   : > { %884 = vmatmul.mubr.bf16.gmra.mrb[24].mxu0 %v537_v55 }
  0x77   : > { %926 = vmatprep.mubr.bf16.mxu0 %v7421_v56 }
  0x7e   : > { %927 = vmatmul.mubr.bf16.vlgmr.msra.gmra.mrb[0].mxu0 %v521_v57 }
  0x7f   : > { %936 = vmatprep.mubr.bf16.mxu0 %v7421_v56 }
  0x86   : > { %937 = vmatmul.mubr.bf16.gmra.mrb[4].mxu0 %v524_v58  ;;  %v6725_v58 = vld [vmem:[%s9523_s3 + $0x130] ss:$8 sps:$4 sm:$0xff]  }
  0x87   : > { %946 = vmatprep.mubr.bf16.mxu0 %v7421_v56 }
  0x8e   : > { %947 = vmatmul.mubr.bf16.gmra.mrb[8].mxu0 %v527_v59 }
  0x8f   : > { %956 = vmatprep.mubr.bf16.mxu0 %v7421_v56 }
  0x96   : > { %957 = vmatmul.mubr.bf16.gmra.mrb[12].mxu0 %v530_v62  ;;  %v6730_v62 = vld [vmem:[%s9523_s3 + $0x144] ss:$8 sps:$4 sm:$0xff]  }
  0x97   : > { %966 = vmatprep.mubr.bf16.mxu0 %v7421_v56 }
  0x9e   : > { %967 = vmatmul.mubr.bf16.gmra.mrb[16].mxu0 %v533_v44 }
  0x9f   : > { %976 = vmatprep.mubr.bf16.mxu0 %v7421_v56 }
  0xa6   : > { %977 = vmatmul.mubr.bf16.gmra.mrb[20].mxu0 %v536_v60 }
  0xa7   : > { %986 = vmatprep.mubr.bf16.mxu0 %v7421_v56 }
  0xae   : > { %987 = vmatmul.mubr.bf16.gmra.mrb[24].mxu0 %v539_v63 }
 0x151   : > { %v928_v11 = vpop.f32.mrb[0].mxu0 }
 0x152   : > { %v6483_v12 = vadd.f32 %v928_v11, %v7823_v9  ;;  %v930_v13 = vpop.f32.mrb[1].mxu0 }
 0x153   : > { %v932_v15 = vpop.f32.mrb[2].mxu0  ;;  %v6484_v21 = vadd.f32 %v930_v13, %v7829_v14 }
 0x154   : > { %v6485_v16 = vadd.f32 %v932_v15, %v7823_v9  ;;  %v934_v17 = vpop.f32.mrb[3].mxu0  ;;  %v997_v31 = vmax.f32 %v6483_v12, 0.0 }
 0x155   : > { %v6486_v18 = vadd.f32 %v934_v17, %v7829_v14  ;;  %v998_v35 = vmax.f32 %v6484_v21, 0.0  ;;  %v6731_v17 = vld [vmem:[%s9523_s3 + $0x150] ss:$8 sps:$4 sm:$0xff]  }
 0x156   : > { %v999_v19 = vmax.f32 %v6485_v16, 0.0 }
 0x157   : > { %v1000_v20 = vmax.f32 %v6486_v18, 0.0 }
 0x158   : > { %v1122_v25 = vpack.c.bf16 %v999_v19, %v7420_v53 }
 0x159   : > { %v938_v22 = vpop.f32.mrb[4].mxu0  ;;  %v1123_v23 = vpack.c.bf16 %v1000_v20, %v7420_v53 }
 0x15a   : > { %v6487_v26 = vadd.f32 %v938_v22, %v7823_v9  ;;  %v940_v27 = vpop.f32.mrb[5].mxu0 }
 0x15b   : > { %v6488_v29 = vadd.f32 %v940_v27, %v7829_v14  ;;  %v942_v30 = vpop.f32.mrb[6].mxu0  ;;  %1669 = vmatprep.mubr.bf16.mxu1 %v1123_v23 }
 0x15c   : > { %v1001_v32 = vmax.f32 %v6487_v26, 0.0  ;;  %v6489_v33 = vadd.f32 %v942_v30, %v7823_v9  ;;  %v944_v34 = vpop.f32.mrb[7].mxu0  ;;  %1670 = vmatmul.mubr.bf16.vlgmr.msra.gmra.mrb[0].mxu1 %v1122_v25  ;;  %v6734_v26 = vld [vmem:[%s9523_s3 + $0x160] ss:$8 sps:$4 sm:$0xff]  }
 0x15d   : > { %v1002_v36 = vmax.f32 %v6488_v29, 0.0  ;;  %v6490_v53 = vadd.f32 %v944_v34, %v7829_v14  ;;  %1709 = vmatpush1.bf16.msra.mxu1 %v6716_v24  ;;  %v6739_v29 = vld [vmem:[%s9523_s3 + $0x174] ss:$8 sps:$4 sm:$0xff]   ;;  %v6812_v34 = vld [vmem:[%s9525_s5 + $0x40] sm:$0xff]  }
 0x15e   : > { %v7849_v38 = vpack.c.bf16 %v1001_v32, %v997_v31  ;;  %v1003_v39 = vmax.f32 %v6489_v33, 0.0  ;;  %1710 = vmatprep.subr.bf16.mxu1 %v6721_v28  ;;  %6255 = vmatprep.subr.bf16.mxu0 %v6812_v34 }
 0x15f   : > { %v7854_v41 = vpack.c.bf16 %v1002_v36, %v998_v35  ;;  %v1004_v42 = vmax.f32 %v6490_v53, 0.0  ;;  %v6813_v35 = vld [vmem:[%s9525_s5] sm:$0xff]   ;;  %v6814_v36 = vld [vmem:[%s9525_s5 + $0x48] sm:$0xff]  }
 0x160   : > { %v7856_v43 = vpack.c.bf16 %v1003_v39, %v999_v19  ;;  %6256 = vmatpush3.bf16.msra.mxu0 %v6813_v35  ;;  %v6749_v35 = vld [vmem:[%s9523_s3 + $0x1b0] ss:$8 sps:$4 sm:$0xff]  }
 0x161   : > { %v7858_v45 = vpack.c.bf16 %v1004_v42, %v1000_v20  ;;  %1711 = vmatpush1.bf16.msra.mxu1 %v6719_v37  ;;  %v948_v46 = vpop.f32.mrb[8].mxu0  ;;  %v6736_v20 = vld [vmem:[%s9523_s3 + $0x164] ss:$8 sps:$4 sm:$0xff]   ;;  %v6737_v37 = vld [vmem:[%s9523_s3 + $0x170] ss:$8 sps:$4 sm:$0xff]   ;;  %6257 = vmatprep.subr.bf16.mxu0 %v6814_v36 }
 0x162   : > { %v6491_v48 = vadd.f32 %v948_v46, %v7823_v9  ;;  %v950_v49 = vpop.f32.mrb[9].mxu0  ;;  %1712 = vmatprep.subr.bf16.mxu1 %v6724_v40  ;;  %v6742_v40 = vld [vmem:[%s9523_s3 + $0x184] ss:$8 sps:$4 sm:$0xff]  }
 0x163   : > { %v6492_v51 = vadd.f32 %v950_v49, %v7829_v14  ;;  %v952_v52 = vpop.f32.mrb[10].mxu0  ;;  %v6815_v46 = vld [vmem:[%s9525_s5 + $0x8] sm:$0xff]  }
 0x164   : > { %v6493_v54 = vadd.f32 %v952_v52, %v7823_v9  ;;  %v954_v55 = vpop.f32.mrb[11].mxu0  ;;  %v1005_v6 = vmax.f32 %v6491_v48, 0.0  ;;  %v6816_v48 = vld [vmem:[%s9525_s5 + $0x50] sm:$0xff]   ;;  %6258 = vmatpush3.bf16.msra.mxu0 %v6815_v46  ;;  %v6826_v36 = vld [vmem:[%s9525_s5 + $0x28] sm:$0xff]  }
 0x165   : > { %v6494_v57 = vadd.f32 %v954_v55, %v7829_v14  ;;  %1713 = vmatpush1.bf16.msra.mxu1 %v6722_v47  ;;  %v1006_v13 = vmax.f32 %v6492_v51, 0.0  ;;  %v6740_v51 = vld [vmem:[%s9523_s3 + $0x180] ss:$8 sps:$4 sm:$0xff]   ;;  %v6745_v55 = vld [vmem:[%s9523_s3 + $0x194] ss:$8 sps:$4 sm:$0xff]   ;;  %6259 = vmatprep.subr.bf16.mxu0 %v6816_v48 }
 0x166   : > { %v1007_v59 = vmax.f32 %v6493_v54, 0.0  ;;  %1714 = vmatprep.subr.bf16.mxu1 %v6727_v50  ;;  %v6763_v46 = vld [vmem:[%s9523_s3 + $0x1f4] ss:$8 sps:$4 sm:$0xff]   ;;  %v6766_v48 = vld [vmem:[%s9523_s3 + $0x204] ss:$8 sps:$4 sm:$0xff]  }
 0x167   : > { %v1008_v44 = vmax.f32 %v6494_v57, 0.0 }
 0x168   : > { %v1128_v60 = vpack.c.bf16 %v1007_v59, %v1003_v39 }
 0x169   : > { %v1129_v61 = vpack.c.bf16 %v1008_v44, %v1004_v42  ;;  %1715 = vmatpush1.bf16.msra.mxu1 %v6725_v58  ;;  %v958_v63 = vpop.f32.mrb[12].mxu0 }
 0x16a   : > { %v6495_v1 = vadd.f32 %v958_v63, %v7823_v9  ;;  %v960_v2 = vpop.f32.mrb[13].mxu0  ;;  %1716 = vmatprep.subr.bf16.mxu1 %v6730_v62  ;;  %v6818_v63 = vld [vmem:[%s9525_s5 + $0x58] sm:$0xff]  }
 0x16b   : > { %v6496_v4 = vadd.f32 %v960_v2, %v7829_v14  ;;  %v962_v5 = vpop.f32.mrb[14].mxu0  ;;  %1679 = vmatprep.mubr.bf16.mxu1 %v1129_v61 }
 0x16c   : > { %v1009_v8 = vmax.f32 %v6495_v1, 0.0  ;;  %v6497_v11 = vadd.f32 %v962_v5, %v7823_v9  ;;  %v964_v12 = vpop.f32.mrb[15].mxu0  ;;  %1680 = vmatmul.mubr.bf16.gmra.mrb[4].mxu1 %v1128_v60 }
 0x16d   : > { %v1010_v15 = vmax.f32 %v6496_v4, 0.0  ;;  %v6498_v16 = vadd.f32 %v964_v12, %v7829_v14  ;;  %1717 = vmatpush1.bf16.msra.mxu1 %v6728_v0  ;;  %v6819_v12 = vld [vmem:[%s9525_s5 + $0x18] sm:$0xff]  }
 0x16e   : > { %v7889_v18 = vpack.c.bf16 %v1009_v8, %v1005_v6  ;;  %v1011_v19 = vmax.f32 %v6497_v11, 0.0  ;;  %1718 = vmatprep.subr.bf16.mxu1 %v6733_v3  ;;  %v6743_v3 = vld [vmem:[%s9523_s3 + $0x190] ss:$8 sps:$4 sm:$0xff]   ;;  %v6748_v6 = vld [vmem:[%s9523_s3 + $0x1a4] ss:$8 sps:$4 sm:$0xff]  }
 0x16f   : > { %v7894_v21 = vpack.c.bf16 %v1010_v15, %v1006_v13  ;;  %v1012_v22 = vmax.f32 %v6498_v16, 0.0  ;;  %v6820_v15 = vld [vmem:[%s9525_s5 + $0x60] sm:$0xff]  }
 0x170   : > { %v7896_v23 = vpack.c.bf16 %v1011_v19, %v1007_v59  ;;  %v6817_v59 = vld [vmem:[%s9525_s5 + $0x10] sm:$0xff]  }
 0x171   : > { %v7898_v24 = vpack.c.bf16 %v1012_v22, %v1008_v44  ;;  %1719 = vmatpush1.bf16.msra.mxu1 %v6731_v17  ;;  %v968_v25 = vpop.f32.mrb[16].mxu0  ;;  %6260 = vmatpush3.bf16.msra.mxu0 %v6817_v59 }
 0x172   : > { %v6499_v27 = vadd.f32 %v968_v25, %v7823_v9  ;;  %v970_v28 = vpop.f32.mrb[17].mxu0  ;;  %1720 = vmatprep.subr.bf16.mxu1 %v6736_v20  ;;  %6261 = vmatprep.subr.bf16.mxu0 %v6818_v63  ;;  %v6746_v20 = vld [vmem:[%s9523_s3 + $0x1a0] ss:$8 sps:$4 sm:$0xff]  }
 0x173   : > { %v6500_v30 = vadd.f32 %v970_v28, %v7829_v14  ;;  %v972_v31 = vpop.f32.mrb[18].mxu0 }
 0x174   : > { %v6501_v32 = vadd.f32 %v972_v31, %v7823_v9  ;;  %v974_v33 = vpop.f32.mrb[19].mxu0  ;;  %v1013_v62 = vmax.f32 %v6499_v27, 0.0  ;;  %v6751_v27 = vld [vmem:[%s9523_s3 + $0x1b4] ss:$8 sps:$4 sm:$0xff]  }
 0x175   : > { %v6502_v53 = vadd.f32 %v974_v33, %v7829_v14  ;;  %1721 = vmatpush1.bf16.msra.mxu1 %v6734_v26  ;;  %v1014_v0 = vmax.f32 %v6500_v30, 0.0  ;;  %6262 = vmatpush3.bf16.msra.mxu0 %v6819_v12  ;;  %v6821_v30 = vld [vmem:[%s9525_s5 + $0x20] sm:$0xff]   ;;  %v6824_v33 = vld [vmem:[%s9525_s5 + $0x68] sm:$0xff]  }
 0x176   : > { %v1015_v39 = vmax.f32 %v6501_v32, 0.0  ;;  %1722 = vmatprep.subr.bf16.mxu1 %v6739_v29  ;;  %6263 = vmatprep.subr.bf16.mxu0 %v6820_v15  ;;  %v6802_v12 = vld [vmem:[%s9523_s3 + $0x2c4] ss:$8 sps:$4 sm:$0xff]   ;;  %v6800_v15 = vld [vmem:[%s9523_s3 + $0x2c0] ss:$8 sps:$4 sm:$0xff]  }
 0x177   : > { %v1016_v42 = vmax.f32 %v6502_v53, 0.0  ;;  %v6757_v53 = vld [vmem:[%s9523_s3 + $0x1d4] ss:$8 sps:$4 sm:$0xff]  }
 0x178   : > { %v1134_v47 = vpack.c.bf16 %v1015_v39, %v1011_v19 }
 0x179   : > { %v1135_v49 = vpack.c.bf16 %v1016_v42, %v1012_v22  ;;  %1723 = vmatpush1.bf16.msra.mxu1 %v6737_v37  ;;  %v978_v50 = vpop.f32.mrb[20].mxu0  ;;  %6264 = vmatpush3.bf16.msra.mxu0 %v6821_v30  ;;  %v6831_v37 = vld [vmem:[%s9525_s5 + $0x30] sm:$0xff]   ;;  %v6827_v30 = vld [vmem:[%s9525_s5 + $0x108] sm:$0xff]  }
 0x17a   : > { %v6503_v52 = vadd.f32 %v978_v50, %v7823_v9  ;;  %v980_v54 = vpop.f32.mrb[21].mxu0  ;;  %1724 = vmatprep.subr.bf16.mxu1 %v6742_v40  ;;  %6265 = vmatprep.subr.bf16.mxu0 %v6824_v33  ;;  %v6760_v40 = vld [vmem:[%s9523_s3 + $0x1e4] ss:$8 sps:$4 sm:$0xff]   ;;  %v6769_v50 = vld [vmem:[%s9523_s3 + $0x214] ss:$8 sps:$4 sm:$0xff]  }
 0x17b   : > { %v6504_v57 = vadd.f32 %v980_v54, %v7829_v14  ;;  %v982_v58 = vpop.f32.mrb[22].mxu0  ;;  %1689 = vmatprep.mubr.bf16.mxu1 %v1135_v49  ;;  %v6764_v49 = vld [vmem:[%s9523_s3 + $0x200] ss:$8 sps:$4 sm:$0xff]   ;;  %v6829_v33 = vld [vmem:[%s9525_s5 + $0x110] sm:$0xff]  }
 0x17c   : > { %v1017_v44 = vmax.f32 %v6503_v52, 0.0  ;;  %v6505_v60 = vadd.f32 %v982_v58, %v7823_v9  ;;  %v984_v61 = vpop.f32.mrb[23].mxu0  ;;  %1690 = vmatmul.mubr.bf16.gmra.mrb[8].mxu1 %v1134_v47  ;;  %v6761_v47 = vld [vmem:[%s9523_s3 + $0x1f0] ss:$8 sps:$4 sm:$0xff]   ;;  %v6772_v52 = vld [vmem:[%s9523_s3 + $0x224] ss:$8 sps:$4 sm:$0xff]  }
 0x17d   : > { %v1018_v1 = vmax.f32 %v6504_v57, 0.0  ;;  %v6506_v2 = vadd.f32 %v984_v61, %v7829_v14  ;;  %1725 = vmatpush1.bf16.msra.mxu1 %v6740_v51  ;;  %6266 = vmatpush3.bf16.msra.mxu0 %v6826_v36  ;;  %v6767_v51 = vld [vmem:[%s9523_s3 + $0x210] ss:$8 sps:$4 sm:$0xff]   ;;  %v6770_v54 = vld [vmem:[%s9523_s3 + $0x220] ss:$8 sps:$4 sm:$0xff]  }
 0x17e   : > { %v7950_v4 = vpack.c.bf16 %v1017_v44, %v1013_v62  ;;  %v1019_v5 = vmax.f32 %v6505_v60, 0.0  ;;  %1726 = vmatprep.subr.bf16.mxu1 %v6745_v55  ;;  %v6778_v55 = vld [vmem:[%s9523_s3 + $0x244] ss:$8 sps:$4 sm:$0xff]   ;;  %v6776_v58 = vld [vmem:[%s9523_s3 + $0x240] ss:$8 sps:$4 sm:$0xff]  }
 0x17f   : > { %v7955_v8 = vpack.c.bf16 %v1018_v1, %v1014_v0  ;;  %v1020_v11 = vmax.f32 %v6506_v2, 0.0  ;;  %v6779_v62 = vld [vmem:[%s9523_s3 + $0x250] ss:$8 sps:$4 sm:$0xff]   ;;  %v6784_v60 = vld [vmem:[%s9523_s3 + $0x264] ss:$8 sps:$4 sm:$0xff]  }
 0x180   : > { %v7960_v13 = vpack.c.bf16 %v1019_v5, %v1015_v39  ;;  %v1140_v22 = vpack.c.bf16 %v1019_v5, %v1019_v5  ;;  %v6755_v39 = vld [vmem:[%s9523_s3 + $0x1d0] ss:$8 sps:$4 sm:$0xff]   ;;  %v6782_v61 = vld [vmem:[%s9523_s3 + $0x260] ss:$8 sps:$4 sm:$0xff]   ;;  %v6787_v0 = vld [vmem:[%s9523_s3 + $0x274] ss:$8 sps:$4 sm:$0xff]  }
 0x181   : > { %v7965_v16 = vpack.c.bf16 %v1020_v11, %v1016_v42  ;;  %v1141_v17 = vpack.c.bf16 %v1020_v11, %v1020_v11  ;;  %1727 = vmatpush1.bf16.msra.mxu1 %v6743_v3  ;;  %v988_v19 = vpop.f32.mrb[24].mxu0  ;;  %v6758_v42 = vld [vmem:[%s9523_s3 + $0x1e0] ss:$8 sps:$4 sm:$0xff]   ;;  %v6785_v1 = vld [vmem:[%s9523_s3 + $0x270] ss:$8 sps:$4 sm:$0xff]  }
 0x182   : > { %v7971_v25 = vadd.f32 %v988_v19, %v7823_v9  ;;  %v990_v26 = vpop.f32.mrb[25].mxu0  ;;  %1728 = vmatprep.subr.bf16.mxu1 %v6748_v6  ;;  %v6790_v2 = vld [vmem:[%s9523_s3 + $0x284] ss:$8 sps:$4 sm:$0xff]   ;;  %v6788_v3 = vld [vmem:[%s9523_s3 + $0x280] ss:$8 sps:$4 sm:$0xff]  }
 0x183   : > { %v7977_v28 = vadd.f32 %v990_v26, %v7829_v14  ;;  %v992_v29 = vpop.f32.mrb[26].mxu0  ;;  %1699 = vmatprep.mubr.bf16.mxu1 %v1141_v17  ;;  %v6796_v5 = vld [vmem:[%s9523_s3 + $0x2a4] ss:$8 sps:$4 sm:$0xff]   ;;  %v6794_v6 = vld [vmem:[%s9523_s3 + $0x2a0] ss:$8 sps:$4 sm:$0xff]  }
 0x184   : > { %v7983_v31 = vadd.f32 %v992_v29, %v7823_v9  ;;  %v994_v32 = vpop.f32.mrb[27].mxu0  ;;  %1700 = vmatmul.mubr.bf16.gmra.mrb[12].mxu1 %v1140_v22  ;;  %v6754_v9 = vld [vmem:[%s9523_s3 + $0x1c4] ss:$8 sps:$4 sm:$0xff]   ;;  %v1021_v44 = vmax.f32 %v7971_v25, 0.0  ;;  %v6797_v11 = vld [vmem:[%s9523_s3 + $0x2b0] ss:$8 sps:$4 sm:$0xff]  }
 0x185   : > { %v7989_v34 = vadd.f32 %v994_v32, %v7829_v14  ;;  %1729 = vmatpush1.bf16.msra.mxu1 %v6746_v20  ;;  %1740 = vmatprep.mubr.bf16.mxu1 %v7854_v41  ;;  %v6830_v14 = vld [vmem:[%s9525_s5 + $0x70] sm:$0xff]   ;;  %v6752_v41 = vld [vmem:[%s9523_s3 + $0x1c0] ss:$8 sps:$4 sm:$0xff]   ;;  %v1022_v57 = vmax.f32 %v7977_v28, 0.0  ;;  %v6808_v20 = vld [vmem:[%s9523_s3 + $0x2e4] ss:$8 sps:$4 sm:$0xff]  }
 0x186   : > { %1730 = vmatprep.subr.bf16.mxu1 %v6751_v27  ;;  %6267 = vmatprep.subr.bf16.mxu0 %v6830_v14  ;;  %v1142_v63 = vpack.c.bf16 %v1021_v44, %v1021_v44  ;;  %v6805_v17 = vld [vmem:[%s9523_s3 + $0x2d4] ss:$8 sps:$4 sm:$0xff]   ;;  %v6803_v19 = vld [vmem:[%s9523_s3 + $0x2d0] ss:$8 sps:$4 sm:$0xff]   ;;  %v6806_v22 = vld [vmem:[%s9523_s3 + $0x2e0] ss:$8 sps:$4 sm:$0xff]  }
 0x187   : > { %6268 = vmatpush3.bf16.msra.mxu0 %v6831_v37  ;;  %v1143_v59 = vpack.c.bf16 %v1022_v57, %v1022_v57  ;;  %v6811_v25 = vld [vmem:[%s9523_s3 + $0x2f4] ss:$8 sps:$4 sm:$0xff]   ;;  %v6809_v26 = vld [vmem:[%s9523_s3 + $0x2f0] ss:$8 sps:$4 sm:$0xff]   ;;  %v6822_v27 = vld [vmem:[%s9525_s5 + $0x140] sm:$0xff]   ;;  %v1023_v36 = vmax.f32 %v7983_v31, 0.0 }
 0x188   : > { %v6823_v28 = vld [vmem:[%s9525_s5 + $0x100] sm:$0xff]   ;;  %v6825_v29 = vld [vmem:[%s9525_s5 + $0x148] sm:$0xff]   ;;  %v6828_v32 = vld [vmem:[%s9525_s5 + $0x150] sm:$0xff]  }
 0x189   : > { %1731 = vmatpush1.bf16.msra.mxu1 %v6749_v35  ;;  %v1024_v35 = vmax.f32 %v7989_v34, 0.0  ;;  %v1144_v14 = vpack.c.bf16 %v1023_v36, %v1023_v36  ;;  %v6836_v34 = vld [vmem:[%s9525_s5 + $0x78] sm:$0xff]   ;;  %v6841_v37 = vld [vmem:[%s9525_s5 + $0x170] sm:$0xff]  }
 0x18a   : > { %1732 = vmatprep.subr.bf16.mxu1 %v6754_v9  ;;  %v6837_v31 = vld [vmem:[%s9525_s5 + $0x38] sm:$0xff]   ;;  %6269 = vmatprep.subr.bf16.mxu0 %v6836_v34 }
 0x18b   : > { %v1145_v9 = vpack.c.bf16 %v1024_v35, %v1024_v35  ;;  %6270 = vmatpush3.bf16.msra.mxu0 %v6837_v31  ;;  %v6861_v34 = vld [vmem:[%s9525_s5 + $0x258] sm:$0xff]  }
 0x18d   : > { %1733 = vmatpush1.bf16.msra.mxu1 %v6752_v41  ;;  %v6839_v41 = vld [vmem:[%s9525_s5 + $0x128] sm:$0xff]  }
 0x18e   : > { %1734 = vmatprep.subr.bf16.mxu1 %v6757_v53  ;;  %v6840_v53 = vld [vmem:[%s9525_s5 + $0xc0] sm:$0xff]  }
 0x18f   : > { %6277 = vmatprep.subr.bf16.mxu0 %v6840_v53 }
 0x191   : > { %1735 = vmatpush1.bf16.msra.mxu1 %v6755_v39  ;;  %v6843_v39 = vld [vmem:[%s9525_s5 + $0x130] sm:$0xff]  }
 0x192   : > { %1736 = vmatprep.subr.bf16.mxu1 %v6760_v40  ;;  %v6845_v40 = vld [vmem:[%s9525_s5 + $0x178] sm:$0xff]  }
 0x195   : > { %1737 = vmatpush1.bf16.msra.mxu1 %v6758_v42  ;;  %v6847_v42 = vld [vmem:[%s9525_s5 + $0x138] sm:$0xff]  }
 0x196   : > { %1738 = vmatprep.subr.bf16.mxu1 %v6763_v46  ;;  %v6849_v46 = vld [vmem:[%s9525_s5 + $0x240] sm:$0xff]  }
 0x199   : > { %1739 = vmatpush1.bf16.msra.mxu1 %v6761_v47  ;;  %v1121_v47 = vld [vmem:[%s9524_s4] sm:$0x3] }
 0x19a   : > { %1779 = vmatprep.subr.bf16.mxu1 %v6766_v48  ;;  %v8203_v48 = vrot.slane %v1121_v47, %v7817_v7 }
 0x19c   : > { %1741 = vmatmul.mubr.bf16.vlgmr.msra.gmra.mrb[0].mxu1 %v7849_v38  ;;  %v6775_v38 = vld [vmem:[%s9523_s3 + $0x234] ss:$8 sps:$4 sm:$0xff]  }
 0x19d   : > { %1750 = vmatprep.mubr.bf16.mxu1 %v7894_v21  ;;  %1780 = vmatpush1.bf16.msra.mxu1 %v6764_v49  ;;  %v6773_v21 = vld [vmem:[%s9523_s3 + $0x230] ss:$8 sps:$4 sm:$0xff]   ;;  %v8206_v49 = vrot.slane %v1121_v47, %v7825_v10 }
 0x19e   : > { %1781 = vmatprep.subr.bf16.mxu1 %v6769_v50  ;;  %v6866_v47 = vld [vmem:[%s9525_s5 + $0xb0] sm:$0xff]  }
 0x1a1   : > { %1782 = vmatpush1.bf16.msra.mxu1 %v6767_v51 }
 0x1a2   : > { %1783 = vmatprep.subr.bf16.mxu1 %v6772_v52 }
 0x1a4   : > { %1751 = vmatmul.mubr.bf16.gmra.mrb[4].mxu1 %v7889_v18  ;;  %v6781_v18 = vld [vmem:[%s9523_s3 + $0x254] ss:$8 sps:$4 sm:$0xff]  }
 0x1a5   : > { %1760 = vmatprep.mubr.bf16.mxu1 %v7955_v8  ;;  %1784 = vmatpush1.bf16.msra.mxu1 %v6770_v54  ;;  %v6799_v8 = vld [vmem:[%s9523_s3 + $0x2b4] ss:$8 sps:$4 sm:$0xff]  }
 0x1a6   : > { %1785 = vmatprep.subr.bf16.mxu1 %v6775_v38 }
 0x1a9   : > { %1786 = vmatpush1.bf16.msra.mxu1 %v6773_v21 }
 0x1aa   : > { %1787 = vmatprep.subr.bf16.mxu1 %v6778_v55 }
 0x1ac   : > { %1761 = vmatmul.mubr.bf16.gmra.mrb[8].mxu1 %v7950_v4  ;;  %v6793_v4 = vld [vmem:[%s9523_s3 + $0x294] ss:$8 sps:$4 sm:$0xff]  }
 0x1ad   : > { %1770 = vmatprep.mubr.bf16.mxu1 %v1143_v59  ;;  %1788 = vmatpush1.bf16.msra.mxu1 %v6776_v58 }
 0x1ae   : > { %1789 = vmatprep.subr.bf16.mxu1 %v6781_v18 }
 0x1b1   : > { %1790 = vmatpush1.bf16.msra.mxu1 %v6779_v62  ;;  %v6842_v62 = vld [vmem:[%s9525_s5 + $0x80] sm:$0xff]  }
 0x1b2   : > { %1791 = vmatprep.subr.bf16.mxu1 %v6784_v60  ;;  %v6844_v60 = vld [vmem:[%s9525_s5 + $0xc8] sm:$0xff]  }
 0x1b4   : > { %1771 = vmatmul.mubr.bf16.gmra.mrb[12].mxu1 %v1142_v63 }
 0x1b5   : > { %1792 = vmatpush1.bf16.msra.mxu1 %v6782_v61  ;;  %1811 = vmatprep.mubr.bf16.mxu1 %v7858_v45  ;;  %v6791_v45 = vld [vmem:[%s9523_s3 + $0x290] ss:$8 sps:$4 sm:$0xff]  }
 0x1b6   : > { %1793 = vmatprep.subr.bf16.mxu1 %v6787_v0 }
 0x1b9   : > { %1794 = vmatpush1.bf16.msra.mxu1 %v6785_v1 }
 0x1ba   : > { %1795 = vmatprep.subr.bf16.mxu1 %v6790_v2 }
 0x1bd   : > { %1796 = vmatpush1.bf16.msra.mxu1 %v6788_v3 }
 0x1be   : > { %1797 = vmatprep.subr.bf16.mxu1 %v6793_v4  ;;  %v6846_v4 = vld [vmem:[%s9525_s5 + $0x88] sm:$0xff]  }
 0x1c1   : > { %1798 = vmatpush1.bf16.msra.mxu1 %v6791_v45 }
 0x1c2   : > { %1799 = vmatprep.subr.bf16.mxu1 %v6796_v5 }
 0x1c5   : > { %1800 = vmatpush1.bf16.msra.mxu1 %v6794_v6 }
 0x1c6   : > { %1801 = vmatprep.subr.bf16.mxu1 %v6799_v8  ;;  %v6848_v8 = vld [vmem:[%s9525_s5 + $0xd0] sm:$0xff]  }
 0x1c9   : > { %1802 = vmatpush1.bf16.msra.mxu1 %v6797_v11 }
 0x1ca   : > { %1803 = vmatprep.subr.bf16.mxu1 %v6802_v12 }
 0x1cd   : > { %1804 = vmatpush1.bf16.msra.mxu1 %v6800_v15  ;;  %v6850_v15 = vld [vmem:[%s9525_s5 + $0x90] sm:$0xff]  }
 0x1ce   : > { %1805 = vmatprep.subr.bf16.mxu1 %v6805_v17  ;;  %v6851_v17 = vld [vmem:[%s9525_s5 + $0x200] sm:$0xff]  }
 0x1d1   : > { %1806 = vmatpush1.bf16.msra.mxu1 %v6803_v19 }
 0x1d2   : > { %1807 = vmatprep.subr.bf16.mxu1 %v6808_v20  ;;  %v6852_v20 = vld [vmem:[%s9525_s5 + $0xd8] sm:$0xff]  }
 0x1d5   : > { %1808 = vmatpush1.bf16.msra.mxu1 %v6806_v22  ;;  %v6853_v22 = vld [vmem:[%s9525_s5 + $0x248] sm:$0xff]  }
 0x1d6   : > { %1809 = vmatprep.subr.bf16.mxu1 %v6811_v25 }
 0x1d9   : > { %1810 = vmatpush1.bf16.msra.mxu1 %v6809_v26 }
 0x1da   : > { %6299 = vmatprep.subr.bf16.mxu1 %v6822_v27 }
 0x1dc   : > { %1812 = vmatmul.mubr.bf16.vlgmr.msra.gmra.mrb[0].mxu1 %v7856_v43  ;;  %v6832_v43 = vld [vmem:[%s9525_s5 + $0x158] sm:$0xff]  }
 0x1dd   : > { %1821 = vmatprep.mubr.bf16.mxu1 %v7898_v24  ;;  %6300 = vmatpush3.bf16.msra.mxu1 %v6823_v28  ;;  %v6833_v24 = vld [vmem:[%s9525_s5 + $0x118] sm:$0xff]  }
 0x1de   : > { %6301 = vmatprep.subr.bf16.mxu1 %v6825_v29  ;;  %v6854_v29 = vld [vmem:[%s9525_s5 + $0x98] sm:$0xff]  }
 0x1e1   : > { %6302 = vmatpush3.bf16.msra.mxu1 %v6827_v30  ;;  %v6855_v30 = vld [vmem:[%s9525_s5 + $0x208] sm:$0xff]  }
 0x1e2   : > { %6303 = vmatprep.subr.bf16.mxu1 %v6828_v32 }
 0x1e4   : > { %1822 = vmatmul.mubr.bf16.gmra.mrb[4].mxu1 %v7896_v23  ;;  %v6834_v23 = vld [vmem:[%s9525_s5 + $0x160] sm:$0xff]  }
 0x1e5   : > { %1831 = vmatprep.mubr.bf16.mxu1 %v7965_v16  ;;  %6304 = vmatpush3.bf16.msra.mxu1 %v6829_v33  ;;  %v6835_v16 = vld [vmem:[%s9525_s5 + $0x120] sm:$0xff]  }
 0x1e6   : > { %6305 = vmatprep.subr.bf16.mxu1 %v6832_v43  ;;  %v6856_v43 = vld [vmem:[%s9525_s5 + $0xe0] sm:$0xff]  }
 0x1e9   : > { %6306 = vmatpush3.bf16.msra.mxu1 %v6833_v24  ;;  %v6857_v24 = vld [vmem:[%s9525_s5 + $0x250] sm:$0xff]  }
 0x1ea   : > { %6307 = vmatprep.subr.bf16.mxu1 %v6834_v23  ;;  %v6859_v23 = vld [vmem:[%s9525_s5 + $0x210] sm:$0xff]  }
 0x1ec   : > { %1832 = vmatmul.mubr.bf16.gmra.mrb[8].mxu1 %v7960_v13  ;;  %v6838_v13 = vld [vmem:[%s9525_s5 + $0x168] sm:$0xff]  }
 0x1ed   : > { %1841 = vmatprep.mubr.bf16.mxu1 %v1145_v9  ;;  %6308 = vmatpush3.bf16.msra.mxu1 %v6835_v16  ;;  %v6860_v16 = vld [vmem:[%s9525_s5 + $0xe8] sm:$0xff]  }
 0x1ee   : > { %6309 = vmatprep.subr.bf16.mxu1 %v6838_v13 }
 0x1f1   : > { %6310 = vmatpush3.bf16.msra.mxu1 %v6839_v41 }
 0x1f2   : > { %6311 = vmatprep.subr.bf16.mxu1 %v6841_v37  ;;  %v6862_v37 = vld [vmem:[%s9525_s5 + $0xa8] sm:$0xff]  }
 0x1f4   : > { %1842 = vmatmul.mubr.bf16.gmra.mrb[12].mxu1 %v1144_v14  ;;  %v6858_v14 = vld [vmem:[%s9525_s5 + $0xa0] sm:$0xff]  }
 0x1f5   : > { %6312 = vmatpush3.bf16.msra.mxu1 %v6843_v39  ;;  %v6863_v39 = vld [vmem:[%s9525_s5 + $0x218] sm:$0xff]  }
 0x1f6   : > { %6313 = vmatprep.subr.bf16.mxu1 %v6845_v40 }
 0x1f9   : > { %6314 = vmatpush3.bf16.msra.mxu1 %v6847_v42  ;;  %v6864_v42 = vld [vmem:[%s9525_s5 + $0xf0] sm:$0xff]  }
 0x1fa   : > { %6343 = vmatprep.subr.bf16.mxu1 %v6849_v46  ;;  %v6865_v46 = vld [vmem:[%s9525_s5 + $0x260] sm:$0xff]  }
 0x2af   : > { %v1813_v50 = vpop.f32.mrb[0].mxu1 }
 0x2b0   : > { %v6511_v51 = vadd.f32 %v1813_v50, %v8203_v48  ;;  %v1815_v52 = vpop.f32.mrb[1].mxu1  ;;  %v6867_v50 = vld [vmem:[%s9525_s5 + $0x220] sm:$0xff]  }
 0x2b1   : > { %v6512_v54 = vadd.f32 %v1815_v52, %v8206_v49  ;;  %v8210_v38 = vpop.f32.mrb[2].mxu1  ;;  %v6868_v52 = vld [vmem:[%s9525_s5 + $0xf8] sm:$0xff]  }
 0x2b2   : > { %v1850_v21 = vmax.f32 %v6511_v51, 0.0  ;;  %v1819_v55 = vpop.f32.mrb[3].mxu1  ;;  %v6513_v51 = vadd.f32 %v8210_v38, %v8203_v48  ;;  %v6871_v38 = vld [vmem:[%s9525_s5 + $0x228] sm:$0xff]  }
 0x2b3   : > { %v1851_v57 = vmax.f32 %v6512_v54, 0.0  ;;  %v6514_v58 = vadd.f32 %v1819_v55, %v8206_v49  ;;  %v6869_v54 = vld [vmem:[%s9525_s5 + $0x268] sm:$0xff]   ;;  %v6870_v55 = vld [vmem:[%s9525_s5 + $0xb8] sm:$0xff]  }
 0x2b4   : > { %v2089_v44 = vpack.c.bf16 %v1850_v21, %v1850_v21 }
 0x2b5   : > { %v2090_v18 = vpack.c.bf16 %v1851_v57, %v1851_v57  ;;  %v1853_v59 = vmax.f32 %v6514_v58, 0.0  ;;  %v1852_v57 = vmax.f32 %v6513_v51, 0.0  ;;  %v6872_v58 = vld [vmem:[%s9525_s5 + $0x1c0] sm:$0xff]   ;;  %v6911_v51 = vld [vmem:[%s9525_s5 + $0x338] sm:$0xff]  }
 0x2b7   : > { %v2092_v61 = vpack.c.bf16 %v1853_v59, %v1853_v59  ;;  %v1823_v63 = vpop.f32.mrb[4].mxu1  ;;  %2813 = vmatprep.mubr.bf16.mxu0 %v2090_v18  ;;  %v6873_v18 = vld [vmem:[%s9525_s5 + $0x270] sm:$0xff]  }
 0x2b8   : > { %v6515_v0 = vadd.f32 %v1823_v63, %v8203_v48  ;;  %v1825_v1 = vpop.f32.mrb[5].mxu1  ;;  %2814 = vmatmul.mubr.bf16.vlgmr.msra.gmra.mrb[28].mxu0 %v2089_v44  ;;  %v2091_v44 = vpack.c.bf16 %v1852_v57, %v1852_v57  ;;  %v6915_v57 = vld [vmem:[%s9525_s5 + $0x298] sm:$0xff]  }
 0x2b9   : > { %v6516_v2 = vadd.f32 %v1825_v1, %v8206_v49  ;;  %6278 = vmatpush3.bf16.msra.mxu0 %v6842_v62  ;;  %v1827_v3 = vpop.f32.mrb[6].mxu1  ;;  %2853 = vmatprep.mubr.bf16.mxu0 %v2092_v61  ;;  %v6874_v62 = vld [vmem:[%s9525_s5 + $0x180] sm:$0xff]   ;;  %v6876_v61 = vld [vmem:[%s9525_s5 + $0x1c8] sm:$0xff]   ;;  %v6877_v1 = vld [vmem:[%s9525_s5 + $0x278] sm:$0xff]  }
 0x2ba   : > { %v1854_v45 = vmax.f32 %v6515_v0, 0.0  ;;  %v8225_v5 = vadd.f32 %v1827_v3, %v8203_v48  ;;  %v1829_v6 = vpop.f32.mrb[7].mxu1  ;;  %6279 = vmatprep.subr.bf16.mxu0 %v6844_v60  ;;  %v6875_v60 = vld [vmem:[%s9525_s5 + $0x230] sm:$0xff]   ;;  %v6878_v3 = vld [vmem:[%s9525_s5 + $0x188] sm:$0xff]  }
 0x2bb   : > { %v1855_v11 = vmax.f32 %v6516_v2, 0.0  ;;  %v6518_v21 = vadd.f32 %v1829_v6, %v8206_v49 }
 0x2bc   : > { %v2093_v19 = vpack.c.bf16 %v1854_v45, %v1854_v45 }
 0x2bd   : > { %v2094_v12 = vpack.c.bf16 %v1855_v11, %v1855_v11  ;;  %6280 = vmatpush3.bf16.msra.mxu0 %v6846_v4  ;;  %v1857_v59 = vmax.f32 %v6518_v21, 0.0  ;;  %v6879_v4 = vld [vmem:[%s9525_s5 + $0x238] sm:$0xff]   ;;  %v6883_v11 = vld [vmem:[%s9525_s5 + $0x300] sm:$0xff]   ;;  %v6913_v21 = vld [vmem:[%s9525_s5 + $0x290] sm:$0xff]  }
 0x2be   : > { %6281 = vmatprep.subr.bf16.mxu0 %v6848_v8  ;;  %v6882_v8 = vld [vmem:[%s9525_s5 + $0x190] sm:$0xff]  }
 0x2bf   : > { %v8242_v25 = vpop.f32.mrb[8].mxu1  ;;  %2893 = vmatprep.mubr.bf16.mxu1 %v2094_v12  ;;  %v2096_v63 = vpack.c.bf16 %v1857_v59, %v1857_v59  ;;  %v6919_v59 = vld [vmem:[%s9525_s5 + $0x2a8] sm:$0xff]  }
 0x2c0   : > { %v1835_v26 = vpop.f32.mrb[9].mxu1  ;;  %2894 = vmatmul.mubr.bf16.vlgmr.msra.gmra.mrb[16].mxu1 %v2093_v19  ;;  %v6519_v0 = vadd.f32 %v8242_v25, %v8203_v48  ;;  %v6888_v25 = vld [vmem:[%s9525_s5 + $0x1e0] sm:$0xff]  }
 0x2c1   : > { %v6520_v27 = vadd.f32 %v1835_v26, %v8206_v49  ;;  %6282 = vmatpush3.bf16.msra.mxu0 %v6850_v15  ;;  %6344 = vmatpush3.bf16.msra.mxu1 %v6851_v17  ;;  %v1837_v28 = vpop.f32.mrb[10].mxu1  ;;  %v6884_v15 = vld [vmem:[%s9525_s5 + $0x1d8] sm:$0xff]   ;;  %v6885_v17 = vld [vmem:[%s9525_s5 + $0x348] sm:$0xff]   ;;  %v6889_v26 = vld [vmem:[%s9525_s5 + $0x350] sm:$0xff]  }
 0x2c2   : > { %v8252_v32 = vadd.f32 %v1837_v28, %v8203_v48  ;;  %v1839_v33 = vpop.f32.mrb[11].mxu1  ;;  %6283 = vmatprep.subr.bf16.mxu0 %v6852_v20  ;;  %6345 = vmatprep.subr.bf16.mxu1 %v6853_v22  ;;  %v1858_v45 = vmax.f32 %v6519_v0, 0.0  ;;  %v6886_v20 = vld [vmem:[%s9525_s5 + $0x198] sm:$0xff]   ;;  %v6887_v22 = vld [vmem:[%s9525_s5 + $0x308] sm:$0xff]   ;;  %v6891_v28 = vld [vmem:[%s9525_s5 + $0x310] sm:$0xff]  }
 0x2c3   : > { %v1859_v35 = vmax.f32 %v6520_v27, 0.0  ;;  %v8261_v9 = vadd.f32 %v1839_v33, %v8206_v49  ;;  %v6890_v27 = vld [vmem:[%s9525_s5 + $0x1a0] sm:$0xff]   ;;  %v6894_v33 = vld [vmem:[%s9525_s5 + $0x1a8] sm:$0xff]  }
 0x2c4   : > { %v2097_v12 = vpack.c.bf16 %v1858_v45, %v1858_v45  ;;  %v6933_v45 = vld [vmem:[%s9527_s7 + $0x78] ss:$56 sps:$4 sm:$0xff]  }
 0x2c5   : > { %v2098_v36 = vpack.c.bf16 %v1859_v35, %v1859_v35  ;;  %6284 = vmatpush3.bf16.msra.mxu0 %v6854_v29  ;;  %6346 = vmatpush3.bf16.msra.mxu1 %v6855_v30  ;;  %v6892_v29 = vld [vmem:[%s9525_s5 + $0x1e8] sm:$0xff]   ;;  %v6893_v30 = vld [vmem:[%s9525_s5 + $0x358] sm:$0xff]   ;;  %v6897_v35 = vld [vmem:[%s9525_s5 + $0x360] sm:$0xff]  }
 0x2c6   : > { %6285 = vmatprep.subr.bf16.mxu0 %v6856_v43  ;;  %6347 = vmatprep.subr.bf16.mxu1 %v6857_v24  ;;  %v6895_v43 = vld [vmem:[%s9525_s5 + $0x318] sm:$0xff]   ;;  %v6896_v24 = vld [vmem:[%s9525_s5 + $0x1f0] sm:$0xff]  }
 0x2c7   : > { %v1843_v13 = vpop.f32.mrb[12].mxu1  ;;  %2973 = vmatprep.mubr.bf16.mxu1 %v2098_v36  ;;  %v6898_v36 = vld [vmem:[%s9525_s5 + $0x1b0] sm:$0xff]  }
 0x2c8   : > { %v8276_v31 = vadd.f32 %v1843_v13, %v8203_v48  ;;  %v1845_v41 = vpop.f32.mrb[13].mxu1  ;;  %v6880_v48 = vld [vmem:[%s9525_s5 + $0x1d0] sm:$0xff]   ;;  %v1856_v13 = vmax.f32 %v8225_v5, 0.0  ;;  %v6906_v5 = vld [vmem:[%s9525_s5 + $0x280] sm:$0xff]  }
 0x2c9   : > { %6286 = vmatpush3.bf16.msra.mxu0 %v6858_v14  ;;  %6348 = vmatpush3.bf16.msra.mxu1 %v6859_v23  ;;  %v1847_v53 = vpop.f32.mrb[14].mxu1  ;;  %v6524_v2 = vadd.f32 %v1845_v41, %v8206_v49  ;;  %v6881_v49 = vld [vmem:[%s9525_s5 + $0x340] sm:$0xff]   ;;  %v6900_v23 = vld [vmem:[%s9525_s5 + $0x1f8] sm:$0xff]   ;;  %v6903_v41 = vld [vmem:[%s9525_s5 + $0x328] sm:$0xff]  }
 0x2ca   : > { %v1848_v40 = vpop.f32.mrb[15].mxu1  ;;  %6287 = vmatprep.subr.bf16.mxu0 %v6860_v16  ;;  %6349 = vmatprep.subr.bf16.mxu1 %v6861_v34  ;;  %v6899_v14 = vld [vmem:[%s9525_s5 + $0x320] sm:$0xff]   ;;  %v6901_v16 = vld [vmem:[%s9525_s5 + $0x368] sm:$0xff]   ;;  %v6902_v34 = vld [vmem:[%s9525_s5 + $0x1b8] sm:$0xff]  }
 0x2cb   : > { %v1863_v6 = vmax.f32 %v6524_v2, 0.0  ;;  %v6904_v53 = vld [vmem:[%s9525_s5 + $0x2c0] sm:$0xff]   ;;  %v2095_v40 = vpack.c.bf16 %v1856_v13, %v1856_v13  ;;  %v6974_v13 = vld [vmem:[%s9527_s7 + $0x14] ss:$56 sps:$4 sm:$0xff]  }
 0x2cc   : > { %v6929_v2 = vld [vmem:[%s9527_s7 + $0xc] ss:$56 sps:$4 sm:$0xff]  }
 0x2cd   : > { %6288 = vmatpush3.bf16.msra.mxu0 %v6862_v37  ;;  %6350 = vmatpush3.bf16.msra.mxu1 %v6863_v39  ;;  %v2102_v19 = vpack.c.bf16 %v1863_v6, %v1863_v6  ;;  %v1861_v37 = vmax.f32 %v8261_v9, 0.0  ;;  %v6905_v39 = vld [vmem:[%s9525_s5 + $0x370] sm:$0xff]   ;;  %v6908_v9 = vld [vmem:[%s9525_s5 + $0x2c8] sm:$0xff]   ;;  %v6938_v6 = vld [vmem:[%s9527_s7 + $0xe4] ss:$56 sps:$4 sm:$0xff]  }
 0x2ce   : > { %6289 = vmatprep.subr.bf16.mxu0 %v6864_v42  ;;  %6351 = vmatprep.subr.bf16.mxu1 %v6865_v46  ;;  %v6907_v42 = vld [vmem:[%s9525_s5 + $0x330] sm:$0xff]  }
 0x2cf   : > { %v2100_v46 = vpack.c.bf16 %v1861_v37, %v1861_v37 }
 0x2d1   : > { %6290 = vmatpush3.bf16.msra.mxu0 %v6866_v47  ;;  %6352 = vmatpush3.bf16.msra.mxu1 %v6867_v50  ;;  %v6909_v47 = vld [vmem:[%s9525_s5 + $0x378] sm:$0xff]   ;;  %v6910_v50 = vld [vmem:[%s9525_s5 + $0x288] sm:$0xff]  }
 0x2d2   : > { %6291 = vmatprep.subr.bf16.mxu0 %v6868_v52  ;;  %6353 = vmatprep.subr.bf16.mxu1 %v6869_v54  ;;  %v6912_v52 = vld [vmem:[%s9525_s5 + $0x2d0] sm:$0xff]   ;;  %v1862_v54 = vmax.f32 %v8276_v31, 0.0  ;;  %v6916_v31 = vld [vmem:[%s9525_s5 + $0x2e0] sm:$0xff]  }
 0x2d5   : > { %6292 = vmatpush3.bf16.msra.mxu0 %v6870_v55  ;;  %6354 = vmatpush3.bf16.msra.mxu1 %v6871_v38  ;;  %v6914_v55 = vld [vmem:[%s9525_s5 + $0x2d8] sm:$0xff]   ;;  %v2101_v38 = vpack.c.bf16 %v1862_v54, %v1862_v54 }
 0x2d6   : > { %6321 = vmatprep.subr.bf16.mxu0 %v6872_v58  ;;  %6355 = vmatprep.subr.bf16.mxu1 %v6873_v18  ;;  %v6917_v58 = vld [vmem:[%s9525_s5 + $0x2a0] sm:$0xff]   ;;  %v6918_v18 = vld [vmem:[%s9525_s5 + $0x2e8] sm:$0xff]  }
 0x2d8   : > { %2854 = vmatmul.mubr.bf16.vlgmr.msra.gmra.mrb[32].mxu0 %v2091_v44  ;;  %v6921_v44 = vld [vmem:[%s9525_s5 + $0x2b0] sm:$0xff]  }
 0x2d9   : > { %6322 = vmatpush3.bf16.msra.mxu0 %v6874_v62  ;;  %2933 = vmatprep.mubr.bf16.mxu0 %v2096_v63  ;;  %v6920_v62 = vld [vmem:[%s9525_s5 + $0x2f0] sm:$0xff]   ;;  %v1860_v63 = vmax.f32 %v8252_v32, 0.0  ;;  %v6927_v32 = vld [vmem:[%s9527_s7 + $0x8] ss:$56 sps:$4 sm:$0xff]  }
 0x2da   : > { %6356 = vmatpush3.bf16.msra.mxu1 %v6875_v60  ;;  %6323 = vmatprep.subr.bf16.mxu0 %v6876_v61  ;;  %v6922_v60 = vld [vmem:[%s9525_s5 + $0x2f8] sm:$0xff]  }
 0x2db   : > { %6357 = vmatprep.subr.bf16.mxu1 %v6877_v1  ;;  %v6923_v61 = vld [vmem:[%s9525_s5 + $0x2b8] sm:$0xff]   ;;  %v2099_v0 = vpack.c.bf16 %v1860_v63, %v1860_v63 }
 0x2dc   : > { %v6926_v1 = vld [vmem:[%s9527_s7 + $0x4] ss:$56 sps:$4 sm:$0xff]  }
 0x2dd   : > { %6324 = vmatpush3.bf16.msra.mxu0 %v6878_v3  ;;  %v6924_v3 = vld [vmem:[%s9527_s7] ss:$56 sps:$4 sm:$0xff]  }
 0x2de   : > { %6358 = vmatpush3.bf16.msra.mxu1 %v6879_v4  ;;  %6325 = vmatprep.subr.bf16.mxu0 %v6880_v48  ;;  %v6930_v4 = vld [vmem:[%s9527_s7 + $0x70] ss:$56 sps:$4 sm:$0xff]   ;;  %v6932_v48 = vld [vmem:[%s9527_s7 + $0x74] ss:$56 sps:$4 sm:$0xff]  }
 0x2df   : > { %6387 = vmatprep.subr.bf16.mxu1 %v6881_v49  ;;  %v6935_v49 = vld [vmem:[%s9527_s7 + $0x7c] ss:$56 sps:$4 sm:$0xff]  }
 0x2e1   : > { %2974 = vmatmul.mubr.bf16.vlgmr.msra.gmra.mrb[20].mxu1 %v2097_v12  ;;  %6326 = vmatpush3.bf16.msra.mxu0 %v6882_v8  ;;  %v6941_v8 = vld [vmem:[%s9527_s7 + $0xec] ss:$56 sps:$4 sm:$0xff]   ;;  %v6939_v12 = vld [vmem:[%s9527_s7 + $0xe8] ss:$56 sps:$4 sm:$0xff]  }
 0x2e2   : > { %6388 = vmatpush3.bf16.msra.mxu1 %v6883_v11  ;;  %3053 = vmatprep.mubr.bf16.mxu1 %v2102_v19  ;;  %v6936_v11 = vld [vmem:[%s9527_s7 + $0xe0] ss:$56 sps:$4 sm:$0xff]   ;;  %v6942_v19 = vld [vmem:[%s9527_s7 + $0x150] ss:$56 sps:$4 sm:$0xff]  }
 0x2e3   : > { %6327 = vmatprep.subr.bf16.mxu0 %v6884_v15  ;;  %6389 = vmatprep.subr.bf16.mxu1 %v6885_v17  ;;  %v6944_v15 = vld [vmem:[%s9527_s7 + $0x154] ss:$56 sps:$4 sm:$0xff]  }
 0x2e4   : > { %v6947_v17 = vld [vmem:[%s9527_s7 + $0x15c] ss:$56 sps:$4 sm:$0xff]  }
 0x2e5   : > { %6328 = vmatpush3.bf16.msra.mxu0 %v6886_v20  ;;  %v6945_v20 = vld [vmem:[%s9527_s7 + $0x158] ss:$56 sps:$4 sm:$0xff]  }
 0x2e6   : > { %6390 = vmatpush3.bf16.msra.mxu1 %v6887_v22  ;;  %6329 = vmatprep.subr.bf16.mxu0 %v6888_v25  ;;  %v6950_v22 = vld [vmem:[%s9527_s7 + $0x1c4] ss:$56 sps:$4 sm:$0xff]  }
 0x2e7   : > { %6391 = vmatprep.subr.bf16.mxu1 %v6889_v26  ;;  %v6953_v25 = vld [vmem:[%s9527_s7 + $0x1cc] ss:$56 sps:$4 sm:$0xff]   ;;  %v6948_v26 = vld [vmem:[%s9527_s7 + $0x1c0] ss:$56 sps:$4 sm:$0xff]  }
 0x2e9   : > { %6330 = vmatpush3.bf16.msra.mxu0 %v6890_v27  ;;  %v6951_v27 = vld [vmem:[%s9527_s7 + $0x1c8] ss:$56 sps:$4 sm:$0xff]  }
 0x2ea   : > { %6392 = vmatpush3.bf16.msra.mxu1 %v6891_v28  ;;  %6331 = vmatprep.subr.bf16.mxu0 %v6892_v29  ;;  %v6956_v28 = vld [vmem:[%s9527_s7 + $0x234] ss:$56 sps:$4 sm:$0xff]  }
 0x2eb   : > { %6393 = vmatprep.subr.bf16.mxu1 %v6893_v30  ;;  %v6959_v29 = vld [vmem:[%s9527_s7 + $0x23c] ss:$56 sps:$4 sm:$0xff]   ;;  %v6954_v30 = vld [vmem:[%s9527_s7 + $0x230] ss:$56 sps:$4 sm:$0xff]  }
 0x2ed   : > { %6332 = vmatpush3.bf16.msra.mxu0 %v6894_v33  ;;  %v6957_v33 = vld [vmem:[%s9527_s7 + $0x238] ss:$56 sps:$4 sm:$0xff]  }
 0x2ee   : > { %6394 = vmatpush3.bf16.msra.mxu1 %v6895_v43  ;;  %6333 = vmatprep.subr.bf16.mxu0 %v6896_v24  ;;  %v6962_v43 = vld [vmem:[%s9527_s7 + $0x2a4] ss:$56 sps:$4 sm:$0xff]  }
 0x2ef   : > { %6395 = vmatprep.subr.bf16.mxu1 %v6897_v35  ;;  %v6965_v24 = vld [vmem:[%s9527_s7 + $0x2ac] ss:$56 sps:$4 sm:$0xff]   ;;  %v6960_v35 = vld [vmem:[%s9527_s7 + $0x2a0] ss:$56 sps:$4 sm:$0xff]  }
 0x2f1   : > { %6334 = vmatpush3.bf16.msra.mxu0 %v6898_v36  ;;  %v6963_v36 = vld [vmem:[%s9527_s7 + $0x2a8] ss:$56 sps:$4 sm:$0xff]  }
 0x2f2   : > { %6396 = vmatpush3.bf16.msra.mxu1 %v6899_v14  ;;  %6335 = vmatprep.subr.bf16.mxu0 %v6900_v23  ;;  %v6968_v14 = vld [vmem:[%s9527_s7 + $0x314] ss:$56 sps:$4 sm:$0xff]  }
 0x2f3   : > { %6397 = vmatprep.subr.bf16.mxu1 %v6901_v16  ;;  %v6971_v23 = vld [vmem:[%s9527_s7 + $0x31c] ss:$56 sps:$4 sm:$0xff]   ;;  %v6966_v16 = vld [vmem:[%s9527_s7 + $0x310] ss:$56 sps:$4 sm:$0xff]  }
 0x2f5   : > { %6336 = vmatpush3.bf16.msra.mxu0 %v6902_v34  ;;  %v6969_v34 = vld [vmem:[%s9527_s7 + $0x318] ss:$56 sps:$4 sm:$0xff]  }
 0x2f6   : > { %6398 = vmatpush3.bf16.msra.mxu1 %v6903_v41  ;;  %6365 = vmatprep.subr.bf16.mxu0 %v6904_v53  ;;  %v6977_v41 = vld [vmem:[%s9527_s7 + $0x1c] ss:$56 sps:$4 sm:$0xff]  }
 0x2f7   : > { %6399 = vmatprep.subr.bf16.mxu1 %v6905_v39 }
 0x2f8   : > { %2934 = vmatmul.mubr.bf16.vlgmr.msra.gmra.mrb[36].mxu0 %v2095_v40 }
 0x2f9   : > { %6366 = vmatpush3.bf16.msra.mxu0 %v6906_v5  ;;  %3013 = vmatprep.mubr.bf16.mxu0 %v2100_v46 }
 0x2fa   : > { %6400 = vmatpush3.bf16.msra.mxu1 %v6907_v42  ;;  %6367 = vmatprep.subr.bf16.mxu0 %v6908_v9 }
 0x2fb   : > { %6401 = vmatprep.subr.bf16.mxu1 %v6909_v47 }
 0x2fd   : > { %6368 = vmatpush3.bf16.msra.mxu0 %v6910_v50 }
 0x2fe   : > { %6402 = vmatpush3.bf16.msra.mxu1 %v6911_v51  ;;  %6369 = vmatprep.subr.bf16.mxu0 %v6912_v52  ;;  %v5883_v51 = vld [vmem:[%s9526_s6] ss:$0 sm:$0xff] }
 0x2ff   : > { %3776 = vmatprep.subr.bf16.mxu1 %v6929_v2 }
 0x301   : > { %3054 = vmatmul.mubr.bf16.vlgmr.msra.gmra.mrb[24].mxu1 %v2101_v38  ;;  %6370 = vmatpush3.bf16.msra.mxu0 %v6913_v21 }
 0x302   : > { %6371 = vmatprep.subr.bf16.mxu0 %v6914_v55  ;;  %3808 = vmatprep.mubr.bf16.mxu1 %v7421_v56 }
 0x303   : > { %3777 = vmatpush1.bf16.msra.mxu1 %v6927_v32 }
 0x304   : > { %3778 = vmatprep.subr.bf16.mxu1 %v6935_v49 }
 0x305   : > { %6372 = vmatpush3.bf16.msra.mxu0 %v6915_v57 }
 0x306   : > { %6373 = vmatprep.subr.bf16.mxu0 %v6916_v31 }
 0x307   : > { %3779 = vmatpush1.bf16.msra.mxu1 %v6933_v45 }
 0x308   : > { %3780 = vmatprep.subr.bf16.mxu1 %v6941_v8 }
 0x309   : > { %6374 = vmatpush3.bf16.msra.mxu0 %v6917_v58 }
 0x30a   : > { %6375 = vmatprep.subr.bf16.mxu0 %v6918_v18 }
 0x30b   : > { %3781 = vmatpush1.bf16.msra.mxu1 %v6939_v12 }
 0x30c   : > { %3782 = vmatprep.subr.bf16.mxu1 %v6947_v17 }
 0x30d   : > { %6376 = vmatpush3.bf16.msra.mxu0 %v6919_v59 }
 0x30e   : > { %6377 = vmatprep.subr.bf16.mxu0 %v6920_v62 }
 0x30f   : > { %3783 = vmatpush1.bf16.msra.mxu1 %v6945_v20 }
 0x310   : > { %3784 = vmatprep.subr.bf16.mxu1 %v6953_v25  ;;  %v6975_v25 = vld [vmem:[%s9527_s7 + $0x18] ss:$56 sps:$4 sm:$0xff]  }
 0x311   : > { %6378 = vmatpush3.bf16.msra.mxu0 %v6921_v44 }
 0x312   : > { %6379 = vmatprep.subr.bf16.mxu0 %v6922_v60 }
 0x313   : > { %3785 = vmatpush1.bf16.msra.mxu1 %v6951_v27  ;;  %v6980_v27 = vld [vmem:[%s9527_s7 + $0x84] ss:$56 sps:$4 sm:$0xff]  }
 0x314   : > { %3786 = vmatprep.subr.bf16.mxu1 %v6959_v29  ;;  %v6978_v29 = vld [vmem:[%s9527_s7 + $0x80] ss:$56 sps:$4 sm:$0xff]  }
 0x315   : > { %6380 = vmatpush3.bf16.msra.mxu0 %v6923_v61 }
 0x316   : > { %3735 = vmatprep.subr.bf16.mxu0 %v6926_v1 }
 0x317   : > { %3787 = vmatpush1.bf16.msra.mxu1 %v6957_v33  ;;  %v6986_v33 = vld [vmem:[%s9527_s7 + $0xf4] ss:$56 sps:$4 sm:$0xff]  }
 0x318   : > { %3014 = vmatmul.mubr.bf16.vlgmr.msra.gmra.mrb[40].mxu0 %v2099_v0  ;;  %3788 = vmatprep.subr.bf16.mxu1 %v6965_v24  ;;  %v6984_v24 = vld [vmem:[%s9527_s7 + $0xf0] ss:$56 sps:$4 sm:$0xff]  }
 0x319   : > { %3767 = vmatprep.mubr.bf16.mxu0 %v7421_v56  ;;  %3736 = vmatpush1.bf16.msra.mxu0 %v6924_v3 }
 0x31a   : > { %3737 = vmatprep.subr.bf16.mxu0 %v6932_v48 }
 0x31b   : > { %3789 = vmatpush1.bf16.msra.mxu1 %v6963_v36  ;;  %v6992_v36 = vld [vmem:[%s9527_s7 + $0x164] ss:$56 sps:$4 sm:$0xff]  }
 0x31c   : > { %3790 = vmatprep.subr.bf16.mxu1 %v6971_v23  ;;  %v6990_v23 = vld [vmem:[%s9527_s7 + $0x160] ss:$56 sps:$4 sm:$0xff]  }
 0x31d   : > { %3738 = vmatpush1.bf16.msra.mxu0 %v6930_v4 }
 0x31e   : > { %3739 = vmatprep.subr.bf16.mxu0 %v6938_v6 }
 0x31f   : > { %3791 = vmatpush1.bf16.msra.mxu1 %v6969_v34  ;;  %v6998_v34 = vld [vmem:[%s9527_s7 + $0x1d4] ss:$56 sps:$4 sm:$0xff]  }
 0x320   : > { %3858 = vmatprep.subr.bf16.mxu1 %v6977_v41  ;;  %v6996_v41 = vld [vmem:[%s9527_s7 + $0x1d0] ss:$56 sps:$4 sm:$0xff]  }
 0x321   : > { %3740 = vmatpush1.bf16.msra.mxu0 %v6936_v11 }
 0x322   : > { %3741 = vmatprep.subr.bf16.mxu0 %v6944_v15 }
 0x325   : > { %3742 = vmatpush1.bf16.msra.mxu0 %v6942_v19 }
 0x326   : > { %3743 = vmatprep.subr.bf16.mxu0 %v6950_v22  ;;  %v6972_v22 = vld [vmem:[%s9527_s7 + $0x10] ss:$56 sps:$4 sm:$0xff]  }
 0x329   : > { %3744 = vmatpush1.bf16.msra.mxu0 %v6948_v26 }
 0x32a   : > { %3745 = vmatprep.subr.bf16.mxu0 %v6956_v28  ;;  %v6983_v28 = vld [vmem:[%s9527_s7 + $0x8c] ss:$56 sps:$4 sm:$0xff]  }
 0x32d   : > { %3746 = vmatpush1.bf16.msra.mxu0 %v6954_v30  ;;  %v6981_v30 = vld [vmem:[%s9527_s7 + $0x88] ss:$56 sps:$4 sm:$0xff]  }
 0x32e   : > { %3747 = vmatprep.subr.bf16.mxu0 %v6962_v43  ;;  %v6989_v43 = vld [vmem:[%s9527_s7 + $0xfc] ss:$56 sps:$4 sm:$0xff]  }
 0x331   : > { %3748 = vmatpush1.bf16.msra.mxu0 %v6960_v35  ;;  %v6987_v35 = vld [vmem:[%s9527_s7 + $0xf8] ss:$56 sps:$4 sm:$0xff]  }
 0x332   : > { %3749 = vmatprep.subr.bf16.mxu0 %v6968_v14  ;;  %v6995_v14 = vld [vmem:[%s9527_s7 + $0x16c] ss:$56 sps:$4 sm:$0xff]  }
 0x335   : > { %3750 = vmatpush1.bf16.msra.mxu0 %v6966_v16  ;;  %v6993_v16 = vld [vmem:[%s9527_s7 + $0x168] ss:$56 sps:$4 sm:$0xff]  }
 0x336   : > { %3817 = vmatprep.subr.bf16.mxu0 %v6974_v13  ;;  %v7001_v13 = vld [vmem:[%s9527_s7 + $0x1dc] ss:$56 sps:$4 sm:$0xff]  }
 0x38b   : > { %v6271_v53 = vpop.f32.mrb[28].mxu0 }
 0x38c   : > { %v6272_v37 = vpop.f32.mrb[29].mxu0 }
 0x38d   : > { %v6273_v39 = vadd.f32 %v6272_v37, %v6271_v53  ;;  %v6274_v5 = vpop.f32.mrb[30].mxu0  ;;  %v6999_v53 = vld [vmem:[%s9527_s7 + $0x1d8] ss:$56 sps:$4 sm:$0xff]   ;;  %v7004_v37 = vld [vmem:[%s9527_s7 + $0x244] ss:$56 sps:$4 sm:$0xff]  }
 0x38e   : > { %v6275_v40 = vpop.f32.mrb[31].mxu0  ;;  %v7002_v5 = vld [vmem:[%s9527_s7 + $0x240] ss:$56 sps:$4 sm:$0xff]  }
 0x38f   : > { %v2816_v21 = vadd.f32 %v6273_v39, %v5883_v51  ;;  %v7007_v39 = vld [vmem:[%s9527_s7 + $0x24c] ss:$56 sps:$4 sm:$0xff]   ;;  %v7005_v40 = vld [vmem:[%s9527_s7 + $0x248] ss:$56 sps:$4 sm:$0xff]  }
 0x390   : > { %v7019_v51 = vld [vmem:[%s9527_s7 + $0x32c] ss:$56 sps:$4 sm:$0xff]  }
 0x393   : > { %v6315_v42 = vpop.f32.mrb[16].mxu1 }
 0x394   : > { %v6316_v9 = vpop.f32.mrb[17].mxu1 }
 0x395   : > { %v6317_v46 = vadd.f32 %v6316_v9, %v6315_v42  ;;  %v6318_v47 = vpop.f32.mrb[18].mxu1  ;;  %v7010_v42 = vld [vmem:[%s9527_s7 + $0x2b4] ss:$56 sps:$4 sm:$0xff]  }
 0x396   : > { %v6319_v50 = vpop.f32.mrb[19].mxu1  ;;  %v7013_v9 = vld [vmem:[%s9527_s7 + $0x2bc] ss:$56 sps:$4 sm:$0xff]   ;;  %v7011_v47 = vld [vmem:[%s9527_s7 + $0x2b8] ss:$56 sps:$4 sm:$0xff]  }
 0x397   : > { %v7016_v50 = vld [vmem:[%s9527_s7 + $0x324] ss:$56 sps:$4 sm:$0xff]  }
 0x3ab   : > { %v6293_v52 = vpop.f32.mrb[32].mxu0 }
 0x3ac   : > { %v6294_v54 = vpop.f32.mrb[33].mxu0 }
 0x3ad   : > { %v6295_v55 = vadd.f32 %v6294_v54, %v6293_v52  ;;  %v6296_v38 = vpop.f32.mrb[34].mxu0  ;;  %v7014_v52 = vld [vmem:[%s9527_s7 + $0x320] ss:$56 sps:$4 sm:$0xff]  }
 0x3ae   : > { %v6297_v57 = vpop.f32.mrb[35].mxu0  ;;  %v7017_v54 = vld [vmem:[%s9527_s7 + $0x328] ss:$56 sps:$4 sm:$0xff]  }
 0x3af   : > { %v2856_v31 = vadd.f32 %v6295_v55, %v2816_v21  ;;  %v7022_v21 = vld [vmem:[%s9527_s7 + $0x24] ss:$56 sps:$4 sm:$0xff]   ;;  %v7020_v38 = vld [vmem:[%s9527_s7 + $0x20] ss:$56 sps:$4 sm:$0xff]  }
 0x3b0   : > { %v7025_v55 = vld [vmem:[%s9527_s7 + $0x2c] ss:$56 sps:$4 sm:$0xff]   ;;  %v7023_v57 = vld [vmem:[%s9527_s7 + $0x28] ss:$56 sps:$4 sm:$0xff]  }
 0x3b1   : > { %v2896_v58 = vadd.f32 %v6317_v46, %v2856_v31  ;;  %v7008_v46 = vld [vmem:[%s9527_s7 + $0x2b0] ss:$56 sps:$4 sm:$0xff]   ;;  %v7028_v31 = vld [vmem:[%s9527_s7 + $0x94] ss:$56 sps:$4 sm:$0xff]  }
 0x3b4   : > { %v6359_v18 = vpop.f32.mrb[20].mxu1 }
 0x3b5   : > { %v6360_v59 = vpop.f32.mrb[21].mxu1 }
 0x3b6   : > { %v6361_v62 = vadd.f32 %v6360_v59, %v6359_v18  ;;  %v6362_v44 = vpop.f32.mrb[22].mxu1  ;;  %v7026_v18 = vld [vmem:[%s9527_s7 + $0x90] ss:$56 sps:$4 sm:$0xff]  }
 0x3b7   : > { %v6363_v60 = vpop.f32.mrb[23].mxu1  ;;  %v7029_v59 = vld [vmem:[%s9527_s7 + $0x98] ss:$56 sps:$4 sm:$0xff]   ;;  %v7037_v44 = vld [vmem:[%s9527_s7 + $0x10c] ss:$56 sps:$4 sm:$0xff]  }
 0x3b8   : > { %v7032_v60 = vld [vmem:[%s9527_s7 + $0x100] ss:$56 sps:$4 sm:$0xff]  }
 0x3cb   : > { %v6337_v61 = vpop.f32.mrb[36].mxu0 }
 0x3cc   : > { %v6338_v63 = vpop.f32.mrb[37].mxu0 }
 0x3cd   : > { %v6339_v0 = vadd.f32 %v6338_v63, %v6337_v61  ;;  %v6340_v1 = vpop.f32.mrb[38].mxu0  ;;  %v7035_v61 = vld [vmem:[%s9527_s7 + $0x108] ss:$56 sps:$4 sm:$0xff]   ;;  %v7040_v63 = vld [vmem:[%s9527_s7 + $0x174] ss:$56 sps:$4 sm:$0xff]  }
 0x3ce   : > { %v6341_v2 = vpop.f32.mrb[39].mxu0  ;;  %v7038_v1 = vld [vmem:[%s9527_s7 + $0x170] ss:$56 sps:$4 sm:$0xff]  }
 0x3cf   : > { %v2936_v3 = vadd.f32 %v6339_v0, %v2896_v58  ;;  %v7031_v58 = vld [vmem:[%s9527_s7 + $0x9c] ss:$56 sps:$4 sm:$0xff]   ;;  %v7041_v2 = vld [vmem:[%s9527_s7 + $0x178] ss:$56 sps:$4 sm:$0xff]  }
 0x3d0   : > { %v7043_v0 = vld [vmem:[%s9527_s7 + $0x17c] ss:$56 sps:$4 sm:$0xff]  }
 0x3d1   : > { %v2976_v32 = vadd.f32 %v6361_v62, %v2936_v3  ;;  %v7034_v62 = vld [vmem:[%s9527_s7 + $0x104] ss:$56 sps:$4 sm:$0xff]  }
 0x3d2   : > { %v7046_v3 = vld [vmem:[%s9527_s7 + $0x1e4] ss:$56 sps:$4 sm:$0xff]  }
 0x3d4   : > { %v6403_v4 = vpop.f32.mrb[24].mxu1 }
 0x3d5   : > { %v6404_v48 = vpop.f32.mrb[25].mxu1 }
 0x3d6   : > { %v6405_v45 = vadd.f32 %v6404_v48, %v6403_v4  ;;  %v6406_v49 = vpop.f32.mrb[26].mxu1  ;;  %v7044_v4 = vld [vmem:[%s9527_s7 + $0x1e0] ss:$56 sps:$4 sm:$0xff]  }
 0x3d7   : > { %v6407_v6 = vpop.f32.mrb[27].mxu1  ;;  %v7047_v48 = vld [vmem:[%s9527_s7 + $0x1e8] ss:$56 sps:$4 sm:$0xff]   ;;  %v7055_v49 = vld [vmem:[%s9527_s7 + $0x25c] ss:$56 sps:$4 sm:$0xff]  }
 0x3d8   : > { %v7050_v6 = vld [vmem:[%s9527_s7 + $0x250] ss:$56 sps:$4 sm:$0xff]  }
 0x3eb   : > { %v6381_v8 = vpop.f32.mrb[40].mxu0 }
 0x3ec   : > { %v6382_v11 = vpop.f32.mrb[41].mxu0 }
 0x3ed   : > { %v6383_v12 = vadd.f32 %v6382_v11, %v6381_v8  ;;  %v6384_v15 = vpop.f32.mrb[42].mxu0  ;;  %v7053_v8 = vld [vmem:[%s9527_s7 + $0x258] ss:$56 sps:$4 sm:$0xff]   ;;  %v7058_v11 = vld [vmem:[%s9527_s7 + $0x2c4] ss:$56 sps:$4 sm:$0xff]  }
 0x3ee   : > { %v6385_v17 = vpop.f32.mrb[43].mxu0  ;;  %v7056_v15 = vld [vmem:[%s9527_s7 + $0x2c0] ss:$56 sps:$4 sm:$0xff]  }
 0x3ef   : > { %v3016_v19 = vadd.f32 %v6383_v12, %v2976_v32  ;;  %v7049_v32 = vld [vmem:[%s9527_s7 + $0x1ec] ss:$56 sps:$4 sm:$0xff]   ;;  %v7059_v17 = vld [vmem:[%s9527_s7 + $0x2c8] ss:$56 sps:$4 sm:$0xff]  }
 0x3f0   : > { %v7061_v12 = vld [vmem:[%s9527_s7 + $0x2cc] ss:$56 sps:$4 sm:$0xff]  }
 0x3f1   : > { %v3056_v20 = vadd.f32 %v6405_v45, %v3016_v19  ;;  %v7052_v45 = vld [vmem:[%s9527_s7 + $0x254] ss:$56 sps:$4 sm:$0xff]  }
 0x3f2   : > { %v7064_v19 = vld [vmem:[%s9527_s7 + $0x334] ss:$56 sps:$4 sm:$0xff]  }
 0x3f3   : > { %v8587_v26 = vpack.c.bf16 %v3056_v20, %v3056_v20  ;;  %v7067_v20 = vld [vmem:[%s9527_s7 + $0x33c] ss:$56 sps:$4 sm:$0xff]  }
 0x3f5   : > { %3768 = vmatmul.mubr.bf16.vlgmr.msra.gmra.mrb[44].mxu0 %v8587_v26  ;;  %3809 = vmatmul.mubr.bf16.vlgmr.msra.gmra.mrb[28].mxu1 %v8587_v26 }
 0x3f6   : > { %3818 = vmatpush1.bf16.msra.mxu0 %v6972_v22  ;;  %3859 = vmatpush1.bf16.msra.mxu1 %v6975_v25  ;;  %v7062_v22 = vld [vmem:[%s9527_s7 + $0x330] ss:$56 sps:$4 sm:$0xff]  }
 0x3f7   : > { %3819 = vmatprep.subr.bf16.mxu0 %v6980_v27  ;;  %3860 = vmatprep.subr.bf16.mxu1 %v6983_v28  ;;  %v7065_v25 = vld [vmem:[%s9527_s7 + $0x338] ss:$56 sps:$4 sm:$0xff]   ;;  %v7070_v27 = vld [vmem:[%s9527_s7 + $0x34] ss:$56 sps:$4 sm:$0xff]   ;;  %v7094_v28 = vld [vmem:[%s9529_s9 + $0x4] ss:$24 sps:$4 sm:$0xff]  }
 0x3f8   : > { %3849 = vmatprep.mubr.bf16.mxu0 %v7421_v56  ;;  %3890 = vmatprep.mubr.bf16.mxu1 %v7421_v56 }
 0x3fa   : > { %3820 = vmatpush1.bf16.msra.mxu0 %v6978_v29  ;;  %3861 = vmatpush1.bf16.msra.mxu1 %v6981_v30  ;;  %v7068_v29 = vld [vmem:[%s9527_s7 + $0x30] ss:$56 sps:$4 sm:$0xff]   ;;  %v7073_v30 = vld [vmem:[%s9527_s7 + $0xa4] ss:$56 sps:$4 sm:$0xff]  }
 0x3fb   : > { %3821 = vmatprep.subr.bf16.mxu0 %v6986_v33  ;;  %3862 = vmatprep.subr.bf16.mxu1 %v6989_v43  ;;  %v7092_v33 = vld [vmem:[%s9529_s9] ss:$24 sps:$4 sm:$0xff]   ;;  %v7100_v43 = vld [vmem:[%s9529_s9 + $0x34] ss:$24 sps:$4 sm:$0xff]  }
 0x3fe   : > { %3822 = vmatpush1.bf16.msra.mxu0 %v6984_v24  ;;  %3863 = vmatpush1.bf16.msra.mxu1 %v6987_v35  ;;  %v7071_v24 = vld [vmem:[%s9527_s7 + $0xa0] ss:$56 sps:$4 sm:$0xff]   ;;  %v7076_v35 = vld [vmem:[%s9527_s7 + $0x114] ss:$56 sps:$4 sm:$0xff]  }
 0x3ff   : > { %3823 = vmatprep.subr.bf16.mxu0 %v6992_v36  ;;  %3864 = vmatprep.subr.bf16.mxu1 %v6995_v14  ;;  %v7098_v36 = vld [vmem:[%s9529_s9 + $0x30] ss:$24 sps:$4 sm:$0xff]   ;;  %v7106_v14 = vld [vmem:[%s9529_s9 + $0x64] ss:$24 sps:$4 sm:$0xff]  }
 0x402   : > { %3824 = vmatpush1.bf16.msra.mxu0 %v6990_v23  ;;  %3865 = vmatpush1.bf16.msra.mxu1 %v6993_v16  ;;  %v7079_v23 = vld [vmem:[%s9527_s7 + $0x184] ss:$56 sps:$4 sm:$0xff]   ;;  %v7104_v16 = vld [vmem:[%s9529_s9 + $0x60] ss:$24 sps:$4 sm:$0xff]  }
 0x403   : > { %3825 = vmatprep.subr.bf16.mxu0 %v6998_v34  ;;  %3866 = vmatprep.subr.bf16.mxu1 %v7001_v13  ;;  %v7112_v34 = vld [vmem:[%s9529_s9 + $0x94] ss:$24 sps:$4 sm:$0xff]   ;;  %v7077_v13 = vld [vmem:[%s9527_s7 + $0x180] ss:$56 sps:$4 sm:$0xff]  }
 0x406   : > { %3826 = vmatpush1.bf16.msra.mxu0 %v6996_v41  ;;  %3867 = vmatpush1.bf16.msra.mxu1 %v6999_v53  ;;  %v7082_v41 = vld [vmem:[%s9527_s7 + $0x1f4] ss:$56 sps:$4 sm:$0xff]   ;;  %v7110_v53 = vld [vmem:[%s9529_s9 + $0x90] ss:$24 sps:$4 sm:$0xff]  }
 0x407   : > { %3827 = vmatprep.subr.bf16.mxu0 %v7004_v37  ;;  %3868 = vmatprep.subr.bf16.mxu1 %v7007_v39  ;;  %v7118_v37 = vld [vmem:[%s9529_s9 + $0xc4] ss:$24 sps:$4 sm:$0xff]   ;;  %v7080_v39 = vld [vmem:[%s9527_s7 + $0x1f0] ss:$56 sps:$4 sm:$0xff]  }
 0x40a   : > { %3828 = vmatpush1.bf16.msra.mxu0 %v7002_v5  ;;  %3869 = vmatpush1.bf16.msra.mxu1 %v7005_v40  ;;  %v7085_v5 = vld [vmem:[%s9527_s7 + $0x264] ss:$56 sps:$4 sm:$0xff]   ;;  %v7116_v40 = vld [vmem:[%s9529_s9 + $0xc0] ss:$24 sps:$4 sm:$0xff]  }
 0x40b   : > { %3829 = vmatprep.subr.bf16.mxu0 %v7010_v42  ;;  %3870 = vmatprep.subr.bf16.mxu1 %v7013_v9  ;;  %v7124_v42 = vld [vmem:[%s9529_s9 + $0xf4] ss:$24 sps:$4 sm:$0xff]   ;;  %v7083_v9 = vld [vmem:[%s9527_s7 + $0x260] ss:$56 sps:$4 sm:$0xff]  }
 0x40e   : > { %3830 = vmatpush1.bf16.msra.mxu0 %v7008_v46  ;;  %3871 = vmatpush1.bf16.msra.mxu1 %v7011_v47  ;;  %v7088_v46 = vld [vmem:[%s9527_s7 + $0x2d4] ss:$56 sps:$4 sm:$0xff]   ;;  %v7122_v47 = vld [vmem:[%s9529_s9 + $0xf0] ss:$24 sps:$4 sm:$0xff]  }
 0x40f   : > { %3831 = vmatprep.subr.bf16.mxu0 %v7016_v50  ;;  %3872 = vmatprep.subr.bf16.mxu1 %v7019_v51  ;;  %v7130_v50 = vld [vmem:[%s9529_s9 + $0x124] ss:$24 sps:$4 sm:$0xff]   ;;  %v7086_v51 = vld [vmem:[%s9527_s7 + $0x2d0] ss:$56 sps:$4 sm:$0xff]  }
 0x412   : > { %3832 = vmatpush1.bf16.msra.mxu0 %v7014_v52  ;;  %3873 = vmatpush1.bf16.msra.mxu1 %v7017_v54  ;;  %v7091_v52 = vld [vmem:[%s9527_s7 + $0x344] ss:$56 sps:$4 sm:$0xff]   ;;  %v7128_v54 = vld [vmem:[%s9529_s9 + $0x120] ss:$24 sps:$4 sm:$0xff]  }
 0x413   : > { %3899 = vmatprep.subr.bf16.mxu0 %v7022_v21  ;;  %3940 = vmatprep.subr.bf16.mxu1 %v7025_v55  ;;  %v7136_v21 = vld [vmem:[%s9529_s9 + $0x154] ss:$24 sps:$4 sm:$0xff]   ;;  %v7089_v55 = vld [vmem:[%s9527_s7 + $0x340] ss:$56 sps:$4 sm:$0xff]  }
 0x415   : > { %3850 = vmatmul.mubr.bf16.vlgmr.msra.gmra.mrb[48].mxu0 %v8587_v26  ;;  %3891 = vmatmul.mubr.bf16.vlgmr.msra.gmra.mrb[32].mxu1 %v8587_v26 }
 0x416   : > { %3900 = vmatpush1.bf16.msra.mxu0 %v7020_v38  ;;  %3941 = vmatpush1.bf16.msra.mxu1 %v7023_v57  ;;  %v7097_v38 = vld [vmem:[%s9529_s9 + $0xc] ss:$24 sps:$4 sm:$0xff]   ;;  %v7134_v57 = vld [vmem:[%s9529_s9 + $0x150] ss:$24 sps:$4 sm:$0xff]  }
 0x417   : > { %3901 = vmatprep.subr.bf16.mxu0 %v7028_v31  ;;  %3942 = vmatprep.subr.bf16.mxu1 %v7031_v58  ;;  %v7142_v31 = vld [vmem:[%s9529_s9 + $0x184] ss:$24 sps:$4 sm:$0xff]   ;;  %v7095_v58 = vld [vmem:[%s9529_s9 + $0x8] ss:$24 sps:$4 sm:$0xff]  }
 0x418   : > { %3931 = vmatprep.mubr.bf16.mxu0 %v7421_v56  ;;  %3972 = vmatprep.mubr.bf16.mxu1 %v7421_v56 }
 0x41a   : > { %3902 = vmatpush1.bf16.msra.mxu0 %v7026_v18  ;;  %3943 = vmatpush1.bf16.msra.mxu1 %v7029_v59  ;;  %v7103_v18 = vld [vmem:[%s9529_s9 + $0x3c] ss:$24 sps:$4 sm:$0xff]   ;;  %v7140_v59 = vld [vmem:[%s9529_s9 + $0x180] ss:$24 sps:$4 sm:$0xff]  }
 0x41b   : > { %3903 = vmatprep.subr.bf16.mxu0 %v7034_v62  ;;  %3944 = vmatprep.subr.bf16.mxu1 %v7037_v44  ;;  %v7148_v62 = vld [vmem:[%s9529_s9 + $0x1b4] ss:$24 sps:$4 sm:$0xff]   ;;  %v7101_v44 = vld [vmem:[%s9529_s9 + $0x38] ss:$24 sps:$4 sm:$0xff]  }
 0x41e   : > { %3904 = vmatpush1.bf16.msra.mxu0 %v7032_v60  ;;  %3945 = vmatpush1.bf16.msra.mxu1 %v7035_v61  ;;  %v7109_v60 = vld [vmem:[%s9529_s9 + $0x6c] ss:$24 sps:$4 sm:$0xff]   ;;  %v7146_v61 = vld [vmem:[%s9529_s9 + $0x1b0] ss:$24 sps:$4 sm:$0xff]  }
 0x41f   : > { %3905 = vmatprep.subr.bf16.mxu0 %v7040_v63  ;;  %3946 = vmatprep.subr.bf16.mxu1 %v7043_v0  ;;  %v7107_v63 = vld [vmem:[%s9529_s9 + $0x68] ss:$24 sps:$4 sm:$0xff]   ;;  %v7115_v0 = vld [vmem:[%s9529_s9 + $0x9c] ss:$24 sps:$4 sm:$0xff]  }
 0x422   : > { %3906 = vmatpush1.bf16.msra.mxu0 %v7038_v1  ;;  %3947 = vmatpush1.bf16.msra.mxu1 %v7041_v2  ;;  %v7152_v1 = vld [vmem:[%s9529_s9 + $0x1e0] ss:$24 sps:$4 sm:$0xff]   ;;  %v7160_v2 = vld [vmem:[%s9529_s9 + $0x214] ss:$24 sps:$4 sm:$0xff]  }
 0x423   : > { %3907 = vmatprep.subr.bf16.mxu0 %v7046_v3  ;;  %3948 = vmatprep.subr.bf16.mxu1 %v7049_v32  ;;  %v7113_v3 = vld [vmem:[%s9529_s9 + $0x98] ss:$24 sps:$4 sm:$0xff]   ;;  %v7121_v32 = vld [vmem:[%s9529_s9 + $0xcc] ss:$24 sps:$4 sm:$0xff]  }
 0x426   : > { %3908 = vmatpush1.bf16.msra.mxu0 %v7044_v4  ;;  %3949 = vmatpush1.bf16.msra.mxu1 %v7047_v48  ;;  %v7158_v4 = vld [vmem:[%s9529_s9 + $0x210] ss:$24 sps:$4 sm:$0xff]   ;;  %v7166_v48 = vld [vmem:[%s9529_s9 + $0x244] ss:$24 sps:$4 sm:$0xff]  }
 0x427   : > { %3909 = vmatprep.subr.bf16.mxu0 %v7052_v45  ;;  %3950 = vmatprep.subr.bf16.mxu1 %v7055_v49  ;;  %v7119_v45 = vld [vmem:[%s9529_s9 + $0xc8] ss:$24 sps:$4 sm:$0xff]   ;;  %v7127_v49 = vld [vmem:[%s9529_s9 + $0xfc] ss:$24 sps:$4 sm:$0xff]  }
 0x42a   : > { %3910 = vmatpush1.bf16.msra.mxu0 %v7050_v6  ;;  %3951 = vmatpush1.bf16.msra.mxu1 %v7053_v8  ;;  %v7164_v6 = vld [vmem:[%s9529_s9 + $0x240] ss:$24 sps:$4 sm:$0xff]   ;;  %v7172_v8 = vld [vmem:[%s9529_s9 + $0x274] ss:$24 sps:$4 sm:$0xff]  }
 0x42b   : > { %3911 = vmatprep.subr.bf16.mxu0 %v7058_v11  ;;  %3952 = vmatprep.subr.bf16.mxu1 %v7061_v12  ;;  %v7125_v11 = vld [vmem:[%s9529_s9 + $0xf8] ss:$24 sps:$4 sm:$0xff]   ;;  %v7133_v12 = vld [vmem:[%s9529_s9 + $0x12c] ss:$24 sps:$4 sm:$0xff]  }
 0x42e   : > { %3912 = vmatpush1.bf16.msra.mxu0 %v7056_v15  ;;  %3953 = vmatpush1.bf16.msra.mxu1 %v7059_v17  ;;  %v7170_v15 = vld [vmem:[%s9529_s9 + $0x270] ss:$24 sps:$4 sm:$0xff]   ;;  %v7178_v17 = vld [vmem:[%s9529_s9 + $0x2a4] ss:$24 sps:$4 sm:$0xff]  }
 0x42f   : > { %3913 = vmatprep.subr.bf16.mxu0 %v7064_v19  ;;  %3954 = vmatprep.subr.bf16.mxu1 %v7067_v20  ;;  %v7131_v19 = vld [vmem:[%s9529_s9 + $0x128] ss:$24 sps:$4 sm:$0xff]   ;;  %v7139_v20 = vld [vmem:[%s9529_s9 + $0x15c] ss:$24 sps:$4 sm:$0xff]  }
 0x432   : > { %3914 = vmatpush1.bf16.msra.mxu0 %v7062_v22  ;;  %3955 = vmatpush1.bf16.msra.mxu1 %v7065_v25  ;;  %v7176_v22 = vld [vmem:[%s9529_s9 + $0x2a0] ss:$24 sps:$4 sm:$0xff]   ;;  %v7184_v25 = vld [vmem:[%s9529_s9 + $0x2d4] ss:$24 sps:$4 sm:$0xff]  }
 0x433   : > { %3981 = vmatprep.subr.bf16.mxu0 %v7070_v27  ;;  %4646 = vmatprep.subr.bf16.mxu1 %v7094_v28  ;;  %v7137_v27 = vld [vmem:[%s9529_s9 + $0x158] ss:$24 sps:$4 sm:$0xff]   ;;  %v7145_v28 = vld [vmem:[%s9529_s9 + $0x18c] ss:$24 sps:$4 sm:$0xff]  }
 0x435   : > { %3932 = vmatmul.mubr.bf16.vlgmr.msra.gmra.mrb[52].mxu0 %v8587_v26  ;;  %3973 = vmatmul.mubr.bf16.vlgmr.msra.gmra.mrb[36].mxu1 %v8587_v26 }
 0x436   : > { %3982 = vmatpush1.bf16.msra.mxu0 %v7068_v29  ;;  %4013 = vmatprep.mubr.bf16.mxu0 %v7421_v56  ;;  %v7074_v56 = vld [vmem:[%s9527_s7 + $0x110] ss:$56 sps:$4 sm:$0xff]  }
 0x437   : > { %3983 = vmatprep.subr.bf16.mxu0 %v7073_v30  ;;  %4647 = vmatpush1.bf16.msra.mxu1 %v7092_v33  ;;  %v7182_v29 = vld [vmem:[%s9529_s9 + $0x2d0] ss:$24 sps:$4 sm:$0xff]   ;;  %v7190_v30 = vld [vmem:[%s9529_s9 + $0x14] ss:$24 sps:$4 sm:$0xff]  }
 0x438   : > { %4648 = vmatprep.subr.bf16.mxu1 %v7100_v43  ;;  %v7143_v33 = vld [vmem:[%s9529_s9 + $0x188] ss:$24 sps:$4 sm:$0xff]   ;;  %v7151_v43 = vld [vmem:[%s9529_s9 + $0x1bc] ss:$24 sps:$4 sm:$0xff]  }
 0x43a   : > { %3984 = vmatpush1.bf16.msra.mxu0 %v7071_v24  ;;  %v7149_v24 = vld [vmem:[%s9529_s9 + $0x1b8] ss:$24 sps:$4 sm:$0xff]  }
 0x43b   : > { %3985 = vmatprep.subr.bf16.mxu0 %v7076_v35  ;;  %4649 = vmatpush1.bf16.msra.mxu1 %v7098_v36  ;;  %v7157_v35 = vld [vmem:[%s9529_s9 + $0x1ec] ss:$24 sps:$4 sm:$0xff]   ;;  %v7155_v36 = vld [vmem:[%s9529_s9 + $0x1e8] ss:$24 sps:$4 sm:$0xff]  }
 0x43c   : > { %4650 = vmatprep.subr.bf16.mxu1 %v7106_v14  ;;  %v7163_v14 = vld [vmem:[%s9529_s9 + $0x21c] ss:$24 sps:$4 sm:$0xff]  }
 0x43e   : > { %3986 = vmatpush1.bf16.msra.mxu0 %v7074_v56  ;;  %v7161_v56 = vld [vmem:[%s9529_s9 + $0x218] ss:$24 sps:$4 sm:$0xff]  }
 0x43f   : > { %3987 = vmatprep.subr.bf16.mxu0 %v7079_v23  ;;  %4651 = vmatpush1.bf16.msra.mxu1 %v7104_v16  ;;  %v7169_v23 = vld [vmem:[%s9529_s9 + $0x24c] ss:$24 sps:$4 sm:$0xff]   ;;  %v7167_v16 = vld [vmem:[%s9529_s9 + $0x248] ss:$24 sps:$4 sm:$0xff]  }
 0x440   : > { %4652 = vmatprep.subr.bf16.mxu1 %v7112_v34  ;;  %v7175_v34 = vld [vmem:[%s9529_s9 + $0x27c] ss:$24 sps:$4 sm:$0xff]  }
 0x442   : > { %3988 = vmatpush1.bf16.msra.mxu0 %v7077_v13  ;;  %v7173_v13 = vld [vmem:[%s9529_s9 + $0x278] ss:$24 sps:$4 sm:$0xff]  }
 0x443   : > { %3989 = vmatprep.subr.bf16.mxu0 %v7082_v41  ;;  %4653 = vmatpush1.bf16.msra.mxu1 %v7110_v53  ;;  %v7181_v41 = vld [vmem:[%s9529_s9 + $0x2ac] ss:$24 sps:$4 sm:$0xff]   ;;  %v7179_v53 = vld [vmem:[%s9529_s9 + $0x2a8] ss:$24 sps:$4 sm:$0xff]  }
 0x444   : > { %4654 = vmatprep.subr.bf16.mxu1 %v7118_v37  ;;  %v7187_v37 = vld [vmem:[%s9529_s9 + $0x2dc] ss:$24 sps:$4 sm:$0xff]  }
 0x446   : > { %3990 = vmatpush1.bf16.msra.mxu0 %v7080_v39  ;;  %v7185_v39 = vld [vmem:[%s9529_s9 + $0x2d8] ss:$24 sps:$4 sm:$0xff]  }
 0x447   : > { %3991 = vmatprep.subr.bf16.mxu0 %v7085_v5  ;;  %4655 = vmatpush1.bf16.msra.mxu1 %v7116_v40  ;;  %v3173_v5 = vld [vmem:[%s9528_s8] sm:$0x3] }
 0x448   : > { %4656 = vmatprep.subr.bf16.mxu1 %v7124_v42  ;;  %v9028_v40 = vrot.slane %v3173_v5, %v7817_v7  ;;  %v9031_v42 = vrot.slane %v3173_v5, %v7825_v10  ;;  %v7226_v5 = vld [vmem:[%s9529_s9 + $0x254] ss:$24 sps:$4 sm:$0xff]  }
 0x44a   : > { %3992 = vmatpush1.bf16.msra.mxu0 %v7083_v9 }
 0x44b   : > { %3993 = vmatprep.subr.bf16.mxu0 %v7088_v46  ;;  %4657 = vmatpush1.bf16.msra.mxu1 %v7122_v47 }
 0x44c   : > { %4658 = vmatprep.subr.bf16.mxu1 %v7130_v50 }
 0x44e   : > { %3994 = vmatpush1.bf16.msra.mxu0 %v7086_v51 }
 0x44f   : > { %3995 = vmatprep.subr.bf16.mxu0 %v7091_v52  ;;  %4659 = vmatpush1.bf16.msra.mxu1 %v7128_v54 }
 0x450   : > { %4660 = vmatprep.subr.bf16.mxu1 %v7136_v21 }
 0x452   : > { %3996 = vmatpush1.bf16.msra.mxu0 %v7089_v55 }
 0x453   : > { %4715 = vmatprep.subr.bf16.mxu0 %v7097_v38  ;;  %4661 = vmatpush1.bf16.msra.mxu1 %v7134_v57 }
 0x454   : > { %4662 = vmatprep.subr.bf16.mxu1 %v7142_v31 }
 0x455   : > { %4014 = vmatmul.mubr.bf16.vlgmr.msra.gmra.mrb[56].mxu0 %v8587_v26  ;;  %v7154_v26 = vld [vmem:[%s9529_s9 + $0x1e4] ss:$24 sps:$4 sm:$0xff]  }
 0x456   : > { %4716 = vmatpush1.bf16.msra.mxu0 %v7095_v58 }
 0x457   : > { %4717 = vmatprep.subr.bf16.mxu0 %v7103_v18  ;;  %4663 = vmatpush1.bf16.msra.mxu1 %v7140_v59 }
 0x458   : > { %4664 = vmatprep.subr.bf16.mxu1 %v7148_v62 }
 0x45a   : > { %4718 = vmatpush1.bf16.msra.mxu0 %v7101_v44 }
 0x45b   : > { %4719 = vmatprep.subr.bf16.mxu0 %v7109_v60  ;;  %4665 = vmatpush1.bf16.msra.mxu1 %v7146_v61  ;;  %v7188_v61 = vld [vmem:[%s9529_s9 + $0x10] ss:$24 sps:$4 sm:$0xff]  }
 0x45c   : > { %4666 = vmatprep.subr.bf16.mxu1 %v7154_v26  ;;  %v7193_v26 = vld [vmem:[%s9529_s9 + $0x44] ss:$24 sps:$4 sm:$0xff]  }
 0x45e   : > { %4720 = vmatpush1.bf16.msra.mxu0 %v7107_v63  ;;  %v7191_v63 = vld [vmem:[%s9529_s9 + $0x40] ss:$24 sps:$4 sm:$0xff]  }
 0x45f   : > { %4721 = vmatprep.subr.bf16.mxu0 %v7115_v0  ;;  %4667 = vmatpush1.bf16.msra.mxu1 %v7152_v1  ;;  %v7196_v0 = vld [vmem:[%s9529_s9 + $0x74] ss:$24 sps:$4 sm:$0xff]   ;;  %v7194_v1 = vld [vmem:[%s9529_s9 + $0x70] ss:$24 sps:$4 sm:$0xff]  }
 0x460   : > { %4668 = vmatprep.subr.bf16.mxu1 %v7160_v2  ;;  %v7199_v2 = vld [vmem:[%s9529_s9 + $0xa4] ss:$24 sps:$4 sm:$0xff]  }
 0x462   : > { %4722 = vmatpush1.bf16.msra.mxu0 %v7113_v3  ;;  %v7197_v3 = vld [vmem:[%s9529_s9 + $0xa0] ss:$24 sps:$4 sm:$0xff]  }
 0x463   : > { %4723 = vmatprep.subr.bf16.mxu0 %v7121_v32  ;;  %4669 = vmatpush1.bf16.msra.mxu1 %v7158_v4  ;;  %v7202_v32 = vld [vmem:[%s9529_s9 + $0xd4] ss:$24 sps:$4 sm:$0xff]   ;;  %v7200_v4 = vld [vmem:[%s9529_s9 + $0xd0] ss:$24 sps:$4 sm:$0xff]  }
 0x464   : > { %4670 = vmatprep.subr.bf16.mxu1 %v7166_v48  ;;  %v7205_v48 = vld [vmem:[%s9529_s9 + $0x104] ss:$24 sps:$4 sm:$0xff]  }
 0x466   : > { %4724 = vmatpush1.bf16.msra.mxu0 %v7119_v45  ;;  %v7203_v45 = vld [vmem:[%s9529_s9 + $0x100] ss:$24 sps:$4 sm:$0xff]  }
 0x467   : > { %4725 = vmatprep.subr.bf16.mxu0 %v7127_v49  ;;  %4671 = vmatpush1.bf16.msra.mxu1 %v7164_v6  ;;  %v7208_v49 = vld [vmem:[%s9529_s9 + $0x134] ss:$24 sps:$4 sm:$0xff]   ;;  %v7206_v6 = vld [vmem:[%s9529_s9 + $0x130] ss:$24 sps:$4 sm:$0xff]  }
 0x468   : > { %4672 = vmatprep.subr.bf16.mxu1 %v7172_v8  ;;  %v7211_v8 = vld [vmem:[%s9529_s9 + $0x164] ss:$24 sps:$4 sm:$0xff]  }
 0x46a   : > { %4726 = vmatpush1.bf16.msra.mxu0 %v7125_v11 }
 0x46b   : > { %4727 = vmatprep.subr.bf16.mxu0 %v7133_v12  ;;  %4673 = vmatpush1.bf16.msra.mxu1 %v7170_v15 }
 0x46c   : > { %4674 = vmatprep.subr.bf16.mxu1 %v7178_v17 }
 0x46e   : > { %4728 = vmatpush1.bf16.msra.mxu0 %v7131_v19 }
 0x46f   : > { %4729 = vmatprep.subr.bf16.mxu0 %v7139_v20  ;;  %4675 = vmatpush1.bf16.msra.mxu1 %v7176_v22 }
 0x470   : > { %4676 = vmatprep.subr.bf16.mxu1 %v7184_v25 }
 0x472   : > { %4730 = vmatpush1.bf16.msra.mxu0 %v7137_v27 }
 0x473   : > { %4731 = vmatprep.subr.bf16.mxu0 %v7145_v28  ;;  %4677 = vmatpush1.bf16.msra.mxu1 %v7182_v29  ;;  %v7209_v29 = vld [vmem:[%s9529_s9 + $0x160] ss:$24 sps:$4 sm:$0xff]  }
 0x474   : > { %4786 = vmatprep.subr.bf16.mxu1 %v7190_v30 }
 0x476   : > { %4732 = vmatpush1.bf16.msra.mxu0 %v7143_v33 }
 0x477   : > { %4733 = vmatprep.subr.bf16.mxu0 %v7151_v43 }
 0x47a   : > { %4734 = vmatpush1.bf16.msra.mxu0 %v7149_v24 }
 0x47b   : > { %4735 = vmatprep.subr.bf16.mxu0 %v7157_v35  ;;  %v7214_v35 = vld [vmem:[%s9529_s9 + $0x194] ss:$24 sps:$4 sm:$0xff]  }
 0x47e   : > { %4736 = vmatpush1.bf16.msra.mxu0 %v7155_v36 }
 0x47f   : > { %4737 = vmatprep.subr.bf16.mxu0 %v7163_v14 }
 0x482   : > { %4738 = vmatpush1.bf16.msra.mxu0 %v7161_v56 }
 0x483   : > { %4739 = vmatprep.subr.bf16.mxu0 %v7169_v23 }
 0x486   : > { %4740 = vmatpush1.bf16.msra.mxu0 %v7167_v16  ;;  %v7212_v16 = vld [vmem:[%s9529_s9 + $0x190] ss:$24 sps:$4 sm:$0xff]  }
 0x487   : > { %4741 = vmatprep.subr.bf16.mxu0 %v7175_v34  ;;  %v7217_v34 = vld [vmem:[%s9529_s9 + $0x1c4] ss:$24 sps:$4 sm:$0xff]  }
 0x48a   : > { %4742 = vmatpush1.bf16.msra.mxu0 %v7173_v13  ;;  %v7215_v13 = vld [vmem:[%s9529_s9 + $0x1c0] ss:$24 sps:$4 sm:$0xff]  }
 0x48b   : > { %4743 = vmatprep.subr.bf16.mxu0 %v7181_v41  ;;  %v7220_v41 = vld [vmem:[%s9529_s9 + $0x1f4] ss:$24 sps:$4 sm:$0xff]  }
 0x48e   : > { %4744 = vmatpush1.bf16.msra.mxu0 %v7179_v53  ;;  %v7218_v53 = vld [vmem:[%s9529_s9 + $0x1f0] ss:$24 sps:$4 sm:$0xff]  }
 0x48f   : > { %4745 = vmatprep.subr.bf16.mxu0 %v7187_v37  ;;  %v7223_v37 = vld [vmem:[%s9529_s9 + $0x224] ss:$24 sps:$4 sm:$0xff]  }
 0x492   : > { %4746 = vmatpush1.bf16.msra.mxu0 %v7185_v39  ;;  %v7221_v39 = vld [vmem:[%s9529_s9 + $0x220] ss:$24 sps:$4 sm:$0xff]  }
 0x4c8   : > { %v3769_v9 = vpop.f32.mrb[44].mxu0  ;;  %v3810_v46 = vpop.f32.mrb[28].mxu1 }
 0x4c9   : > { %v4033_v47 = vadd.f32 %v9028_v40, %v3769_v9  ;;  %v4035_v50 = vadd.f32 %v9028_v40, %v3810_v46  ;;  %v3771_v51 = vpop.f32.mrb[45].mxu0  ;;  %v3812_v52 = vpop.f32.mrb[29].mxu1  ;;  %v7224_v9 = vld [vmem:[%s9529_s9 + $0x250] ss:$24 sps:$4 sm:$0xff]   ;;  %v7229_v46 = vld [vmem:[%s9529_s9 + $0x284] ss:$24 sps:$4 sm:$0xff]  }
 0x4ca   : > { %v4034_v54 = vadd.f32 %v9031_v42, %v3771_v51  ;;  %v4036_v21 = vadd.f32 %v9031_v42, %v3812_v52  ;;  %v3773_v55 = vpop.f32.mrb[46].mxu0  ;;  %v3814_v38 = vpop.f32.mrb[30].mxu1  ;;  %v7230_v51 = vld [vmem:[%s9529_s9 + $0x2b0] ss:$24 sps:$4 sm:$0xff]   ;;  %v7235_v52 = vld [vmem:[%s9529_s9 + $0x2e4] ss:$24 sps:$4 sm:$0xff]  }
 0x4cb   : > { %v4047_v57 = vmax.f32 %v4033_v47, 0.0  ;;  %v4049_v31 = vmax.f32 %v4035_v50, 0.0  ;;  %v3774_v58 = vpop.f32.mrb[47].mxu0  ;;  %v3815_v18 = vpop.f32.mrb[31].mxu1  ;;  %v7227_v47 = vld [vmem:[%s9529_s9 + $0x280] ss:$24 sps:$4 sm:$0xff]  }
 0x4cc   : > { %v4048_v59 = vmax.f32 %v4034_v54, 0.0  ;;  %v4050_v62 = vmax.f32 %v4036_v21, 0.0  ;;  %v7232_v50 = vld [vmem:[%s9529_s9 + $0x2b4] ss:$24 sps:$4 sm:$0xff]  }
 0x4cd   : > { %v9037_v44 = vpack.c.bf16 %v4049_v31, %v4047_v57 }
 0x4ce   : > { %v9039_v60 = vpack.c.bf16 %v4050_v62, %v4048_v59 }
 0x4d0   : > { %4678 = vmatprep.mubr.bf16.mxu1 %v9039_v60  ;;  %4747 = vmatprep.mubr.bf16.mxu0 %v9039_v60 }
 0x4d1   : > { %4679 = vmatmul.mubr.bf16.vlgmr.msra.gmra.mrb[40].mxu1 %v9037_v44  ;;  %4748 = vmatmul.mubr.bf16.vlgmr.msra.gmra.mrb[60].mxu0 %v9037_v44 }
 0x4d2   : > { %4787 = vmatpush1.bf16.msra.mxu1 %v7188_v61  ;;  %v7233_v61 = vld [vmem:[%s9529_s9 + $0x2e0] ss:$24 sps:$4 sm:$0xff]  }
 0x4d3   : > { %4788 = vmatprep.subr.bf16.mxu1 %v7193_v26 }
 0x4d6   : > { %4789 = vmatpush1.bf16.msra.mxu1 %v7191_v63 }
 0x4d7   : > { %4790 = vmatprep.subr.bf16.mxu1 %v7196_v0 }
 0x4da   : > { %4791 = vmatpush1.bf16.msra.mxu1 %v7194_v1 }
 0x4db   : > { %4792 = vmatprep.subr.bf16.mxu1 %v7199_v2 }
 0x4de   : > { %4793 = vmatpush1.bf16.msra.mxu1 %v7197_v3 }
 0x4df   : > { %4794 = vmatprep.subr.bf16.mxu1 %v7202_v32 }
 0x4e2   : > { %4795 = vmatpush1.bf16.msra.mxu1 %v7200_v4 }
 0x4e3   : > { %4796 = vmatprep.subr.bf16.mxu1 %v7205_v48 }
 0x4e6   : > { %4797 = vmatpush1.bf16.msra.mxu1 %v7203_v45 }
 0x4e7   : > { %4798 = vmatprep.subr.bf16.mxu1 %v7208_v49 }
 0x4e8   : > { %v3851_v11 = vpop.f32.mrb[48].mxu0  ;;  %v3892_v12 = vpop.f32.mrb[32].mxu1 }
 0x4e9   : > { %v4037_v15 = vadd.f32 %v9028_v40, %v3851_v11  ;;  %v4039_v17 = vadd.f32 %v9028_v40, %v3892_v12  ;;  %v3853_v19 = vpop.f32.mrb[49].mxu0  ;;  %v3894_v20 = vpop.f32.mrb[33].mxu1 }
 0x4ea   : > { %v4038_v22 = vadd.f32 %v9031_v42, %v3853_v19  ;;  %v4040_v25 = vadd.f32 %v9031_v42, %v3894_v20  ;;  %v3855_v27 = vpop.f32.mrb[50].mxu0  ;;  %v3896_v28 = vpop.f32.mrb[34].mxu1  ;;  %4799 = vmatpush1.bf16.msra.mxu1 %v7206_v6  ;;  %v7244_v20 = vld [vmem:[%s9531_s11 + $0x34] ss:$12 sps:$4 sm:$0xff]  }
 0x4eb   : > { %v4051_v30 = vmax.f32 %v4037_v15, 0.0  ;;  %v4053_v33 = vmax.f32 %v4039_v17, 0.0  ;;  %v3856_v43 = vpop.f32.mrb[51].mxu0  ;;  %v3897_v24 = vpop.f32.mrb[35].mxu1  ;;  %4800 = vmatprep.subr.bf16.mxu1 %v7211_v8  ;;  %v7245_v27 = vld [vmem:[%s9531_s11 + $0x48] ss:$12 sps:$4 sm:$0xff]  }
 0x4ec   : > { %v4052_v36 = vmax.f32 %v4038_v22, 0.0  ;;  %v4054_v14 = vmax.f32 %v4040_v25, 0.0  ;;  %v7242_v22 = vld [vmem:[%s9531_s11 + $0x30] ss:$12 sps:$4 sm:$0xff]   ;;  %v7247_v25 = vld [vmem:[%s9531_s11 + $0x4c] ss:$12 sps:$4 sm:$0xff]  }
 0x4ed   : > { %v9097_v56 = vpack.c.bf16 %v4053_v33, %v4051_v30  ;;  %v7250_v28 = vld [vmem:[%s9531_s11 + $0x64] ss:$12 sps:$4 sm:$0xff]   ;;  %v7253_v30 = vld [vmem:[%s9531_s11 + $0x7c] ss:$12 sps:$4 sm:$0xff]   ;;  %v7256_v43 = vld [vmem:[%s9531_s11 + $0x94] ss:$12 sps:$4 sm:$0xff]  }
 0x4ee   : > { %v9099_v23 = vpack.c.bf16 %v4054_v14, %v4052_v36  ;;  %4801 = vmatpush1.bf16.msra.mxu1 %v7209_v29  ;;  %v7248_v29 = vld [vmem:[%s9531_s11 + $0x60] ss:$12 sps:$4 sm:$0xff]   ;;  %v7251_v33 = vld [vmem:[%s9531_s11 + $0x78] ss:$12 sps:$4 sm:$0xff]   ;;  %v7254_v24 = vld [vmem:[%s9531_s11 + $0x90] ss:$12 sps:$4 sm:$0xff]  }
 0x4ef   : > { %4802 = vmatprep.subr.bf16.mxu1 %v7214_v35  ;;  %v9205_v35 = vld [vmem:[%s9531_s11 + $0xc8] ss:$12 sps:$4 sm:$0xff]   ;;  %v7259_v14 = vld [vmem:[%s9531_s11 + $0xac] ss:$12 sps:$4 sm:$0xff]  }
 0x4f0   : > { %4686 = vmatprep.mubr.bf16.mxu1 %v9099_v23  ;;  %4757 = vmatprep.mubr.bf16.mxu0 %v9099_v23  ;;  %v9210_v36 = vld [vmem:[%s9531_s11 + $0x8] ss:$12 sps:$4 sm:$0xff]  }
 0x4f1   : > { %4687 = vmatmul.mubr.bf16.gmra.mrb[44].mxu1 %v9097_v56  ;;  %4758 = vmatmul.mubr.bf16.gmra.mrb[64].mxu0 %v9097_v56 }
 0x4f2   : > { %4803 = vmatpush1.bf16.msra.mxu1 %v7212_v16  ;;  %v7257_v16 = vld [vmem:[%s9531_s11 + $0xa8] ss:$12 sps:$4 sm:$0xff]  }
 0x4f3   : > { %4804 = vmatprep.subr.bf16.mxu1 %v7217_v34  ;;  %v9234_v34 = vld [vmem:[%s9531_s11 + $0xf8] ss:$12 sps:$4 sm:$0xff]  }
 0x4f6   : > { %4805 = vmatpush1.bf16.msra.mxu1 %v7215_v13  ;;  %v7262_v13 = vld [vmem:[%s9531_s11 + $0xc4] ss:$12 sps:$4 sm:$0xff]  }
 0x4f7   : > { %4806 = vmatprep.subr.bf16.mxu1 %v7220_v41  ;;  %v9243_v41 = vld [vmem:[%s9531_s11 + $0x38] ss:$12 sps:$4 sm:$0xff]  }
 0x4fa   : > { %4807 = vmatpush1.bf16.msra.mxu1 %v7218_v53  ;;  %v7260_v53 = vld [vmem:[%s9531_s11 + $0xc0] ss:$12 sps:$4 sm:$0xff]  }
 0x4fb   : > { %4808 = vmatprep.subr.bf16.mxu1 %v7223_v37  ;;  %v7267_v37 = vld [vmem:[%s9531_s11 + $0xdc] ss:$12 sps:$4 sm:$0xff]  }
 0x4fe   : > { %4809 = vmatpush1.bf16.msra.mxu1 %v7221_v39  ;;  %v7265_v39 = vld [vmem:[%s9531_s11 + $0xd8] ss:$12 sps:$4 sm:$0xff]  }
 0x4ff   : > { %4810 = vmatprep.subr.bf16.mxu1 %v7226_v5  ;;  %v7272_v5 = vld [vmem:[%s9531_s11 + $0xf4] ss:$12 sps:$4 sm:$0xff]  }
 0x502   : > { %4811 = vmatpush1.bf16.msra.mxu1 %v7224_v9  ;;  %v7270_v9 = vld [vmem:[%s9531_s11 + $0xf0] ss:$12 sps:$4 sm:$0xff]  }
 0x503   : > { %4812 = vmatprep.subr.bf16.mxu1 %v7229_v46  ;;  %v7277_v46 = vld [vmem:[%s9531_s11 + $0x10c] ss:$12 sps:$4 sm:$0xff]  }
 0x506   : > { %4813 = vmatpush1.bf16.msra.mxu1 %v7227_v47  ;;  %v7275_v47 = vld [vmem:[%s9531_s11 + $0x108] ss:$12 sps:$4 sm:$0xff]  }
 0x507   : > { %4814 = vmatprep.subr.bf16.mxu1 %v7232_v50  ;;  %v9271_v50 = vld [vmem:[%s9531_s11 + $0x110] ss:$12 sps:$4 sm:$0xff]  }
 0x508   : > { %v3933_v54 = vpop.f32.mrb[52].mxu0  ;;  %v3974_v21 = vpop.f32.mrb[36].mxu1 }
 0x509   : > { %v4041_v55 = vadd.f32 %v9028_v40, %v3933_v54  ;;  %v4043_v38 = vadd.f32 %v9028_v40, %v3974_v21  ;;  %v3935_v57 = vpop.f32.mrb[53].mxu0  ;;  %v3976_v31 = vpop.f32.mrb[37].mxu1  ;;  %v7280_v54 = vld [vmem:[%s9531_s11 + $0x120] ss:$12 sps:$4 sm:$0xff]   ;;  %v9289_v21 = vld [vmem:[%s9531_s11 + $0x128] ss:$12 sps:$4 sm:$0xff]  }
 0x50a   : > { %v4042_v58 = vadd.f32 %v9031_v42, %v3935_v57  ;;  %v4044_v18 = vadd.f32 %v9031_v42, %v3976_v31  ;;  %v3937_v59 = vpop.f32.mrb[54].mxu0  ;;  %v3978_v62 = vpop.f32.mrb[38].mxu1  ;;  %4815 = vmatpush1.bf16.msra.mxu1 %v7230_v51  ;;  %v9276_v51 = vld [vmem:[%s9531_s11 + $0x50] ss:$12 sps:$4 sm:$0xff]   ;;  %v9307_v31 = vld [vmem:[%s9531_s11 + $0x140] ss:$12 sps:$4 sm:$0xff]  }
 0x50b   : > { %v4055_v26 = vmax.f32 %v4041_v55, 0.0  ;;  %v4057_v63 = vmax.f32 %v4043_v38, 0.0  ;;  %v3938_v0 = vpop.f32.mrb[55].mxu0  ;;  %v3979_v1 = vpop.f32.mrb[39].mxu1  ;;  %4816 = vmatprep.subr.bf16.mxu1 %v7235_v52  ;;  %v7282_v52 = vld [vmem:[%s9531_s11 + $0x124] ss:$12 sps:$4 sm:$0xff]  }
 0x50c   : > { %v4056_v2 = vmax.f32 %v4042_v58, 0.0  ;;  %v4058_v3 = vmax.f32 %v4044_v18, 0.0  ;;  %v9294_v55 = vld [vmem:[%s9531_s11 + $0x68] ss:$12 sps:$4 sm:$0xff]   ;;  %v7285_v38 = vld [vmem:[%s9531_s11 + $0x138] ss:$12 sps:$4 sm:$0xff]  }
 0x50d   : > { %v4162_v32 = vpack.c.bf16 %v4057_v63, %v4055_v26  ;;  %v7287_v57 = vld [vmem:[%s9531_s11 + $0x13c] ss:$12 sps:$4 sm:$0xff]   ;;  %v9312_v58 = vld [vmem:[%s9531_s11 + $0x80] ss:$12 sps:$4 sm:$0xff]   ;;  %v9325_v62 = vld [vmem:[%s9531_s11 + $0x158] ss:$12 sps:$4 sm:$0xff]  }
 0x50e   : > { %v4163_v4 = vpack.c.bf16 %v4058_v3, %v4056_v2  ;;  %4817 = vmatpush1.bf16.msra.mxu1 %v7233_v61  ;;  %v7292_v18 = vld [vmem:[%s9531_s11 + $0x154] ss:$12 sps:$4 sm:$0xff]   ;;  %v7290_v59 = vld [vmem:[%s9531_s11 + $0x150] ss:$12 sps:$4 sm:$0xff]   ;;  %v9330_v61 = vld [vmem:[%s9531_s11 + $0x98] ss:$12 sps:$4 sm:$0xff]  }
 0x50f   : > { %6467 = vmatprep.subr.bf16.mxu1 %v9205_v35  ;;  %v7297_v26 = vld [vmem:[%s9531_s11 + $0x16c] ss:$12 sps:$4 sm:$0xff]   ;;  %v7295_v63 = vld [vmem:[%s9531_s11 + $0x168] ss:$12 sps:$4 sm:$0xff]   ;;  %v9343_v0 = vld [vmem:[%s9531_s11 + $0x170] ss:$12 sps:$4 sm:$0xff]  }
 0x510   : > { %4696 = vmatprep.mubr.bf16.mxu1 %v4163_v4  ;;  %4767 = vmatprep.mubr.bf16.mxu0 %v4163_v4  ;;  %v9348_v1 = vld [vmem:[%s9531_s11 + $0xb0] ss:$12 sps:$4 sm:$0xff]  }
 0x511   : > { %4697 = vmatmul.mubr.bf16.gmra.mrb[48].mxu1 %v4162_v32  ;;  %4768 = vmatmul.mubr.bf16.gmra.mrb[68].mxu0 %v4162_v32 }
 0x528   : > { %v4015_v48 = vpop.f32.mrb[56].mxu0 }
 0x529   : > { %v4045_v45 = vadd.f32 %v9028_v40, %v4015_v48  ;;  %v4017_v49 = vpop.f32.mrb[57].mxu0  ;;  %v7236_v40 = vld [vmem:[%s9531_s11] ss:$12 sps:$4 sm:$0xff]  }
 0x52a   : > { %v4046_v6 = vadd.f32 %v9031_v42, %v4017_v49  ;;  %v4019_v8 = vpop.f32.mrb[58].mxu0  ;;  %v7238_v42 = vld [vmem:[%s9531_s11 + $0x4] ss:$12 sps:$4 sm:$0xff]  }
 0x52b   : > { %v4059_v11 = vmax.f32 %v4045_v45, 0.0  ;;  %v4020_v12 = vpop.f32.mrb[59].mxu0  ;;  %5271 = vmatprep.subr.bf16.mxu0 %v7238_v42 }
 0x52c   : > { %v4060_v15 = vmax.f32 %v4046_v6, 0.0  ;;  %5272 = vmatpush1.bf16.msra.mxu0 %v7236_v40 }
 0x52d   : > { %v4164_v19 = vpack.c.bf16 %v4059_v11, %v4059_v11 }
 0x52e   : > { %v4165_v17 = vpack.c.bf16 %v4060_v15, %v4060_v15 }
 0x530   : > { %4706 = vmatprep.mubr.bf16.mxu1 %v4165_v17  ;;  %4777 = vmatprep.mubr.bf16.mxu0 %v4165_v17 }
 0x531   : > { %4707 = vmatmul.mubr.bf16.gmra.mrb[52].mxu1 %v4164_v19  ;;  %4778 = vmatmul.mubr.bf16.gmra.mrb[72].mxu0 %v4164_v19 }
 0x532   : > { %4818 = vmatprep.mubr.bf16.mxu1 %v9039_v60  ;;  %v7241_v60 = vld [vmem:[%s9531_s11 + $0x1c] ss:$12 sps:$4 sm:$0xff]  }
 0x533   : > { %5273 = vmatprep.subr.bf16.mxu0 %v7241_v60 }
 0x539   : > { %4819 = vmatmul.mubr.bf16.vlgmr.msra.gmra.mrb[56].mxu1 %v9037_v44  ;;  %v7239_v44 = vld [vmem:[%s9531_s11 + $0x18] ss:$12 sps:$4 sm:$0xff]  }
 0x53a   : > { %4828 = vmatprep.mubr.bf16.mxu1 %v9099_v23  ;;  %5274 = vmatpush1.bf16.msra.mxu0 %v7239_v44  ;;  %v9225_v23 = vld [vmem:[%s9531_s11 + $0x20] ss:$12 sps:$4 sm:$0xff]  }
 0x53b   : > { %5275 = vmatprep.subr.bf16.mxu0 %v7244_v20  ;;  %6475 = vmatpush3.bf16.msra.mxu1 %v9210_v36 }
 0x53e   : > { %5276 = vmatpush1.bf16.msra.mxu0 %v7242_v22 }
 0x53f   : > { %5277 = vmatprep.subr.bf16.mxu0 %v7247_v25 }
 0x541   : > { %4829 = vmatmul.mubr.bf16.gmra.mrb[60].mxu1 %v9097_v56  ;;  %v9218_v56 = vld [vmem:[%s9531_s11 + $0xe0] ss:$12 sps:$4 sm:$0xff]  }
 0x542   : > { %4838 = vmatprep.mubr.bf16.mxu1 %v4163_v4  ;;  %5278 = vmatpush1.bf16.msra.mxu0 %v7245_v27 }
 0x543   : > { %5279 = vmatprep.subr.bf16.mxu0 %v7250_v28  ;;  %6468 = vmatprep.subr.bf16.mxu1 %v9218_v56 }
 0x544   : > { %6476 = vmatpush3.bf16.msra.mxu1 %v9225_v23 }
 0x545   : > { %6469 = vmatprep.subr.bf16.mxu1 %v9234_v34 }
 0x546   : > { %5280 = vmatpush1.bf16.msra.mxu0 %v7248_v29 }
 0x547   : > { %5281 = vmatprep.subr.bf16.mxu0 %v7253_v30 }
 0x548   : > { %6477 = vmatpush3.bf16.msra.mxu1 %v9243_v41 }
 0x549   : > { %4839 = vmatmul.mubr.bf16.gmra.mrb[64].mxu1 %v4162_v32  ;;  %6470 = vmatprep.subr.bf16.mxu1 %v9271_v50 }
 0x54a   : > { %4848 = vmatprep.mubr.bf16.mxu1 %v4165_v17  ;;  %5282 = vmatpush1.bf16.msra.mxu0 %v7251_v33 }
 0x54b   : > { %5283 = vmatprep.subr.bf16.mxu0 %v7256_v43 }
 0x54c   : > { %6478 = vmatpush3.bf16.msra.mxu1 %v9276_v51 }
 0x54d   : > { %6471 = vmatprep.subr.bf16.mxu1 %v9289_v21 }
 0x54e   : > { %5284 = vmatpush1.bf16.msra.mxu0 %v7254_v24 }
 0x54f   : > { %5285 = vmatprep.subr.bf16.mxu0 %v7259_v14 }
 0x550   : > { %6479 = vmatpush3.bf16.msra.mxu1 %v9294_v55 }
 0x551   : > { %4849 = vmatmul.mubr.bf16.gmra.mrb[68].mxu1 %v4164_v19  ;;  %6472 = vmatprep.subr.bf16.mxu1 %v9307_v31 }
 0x552   : > { %5286 = vmatpush1.bf16.msra.mxu0 %v7257_v16 }
 0x553   : > { %5287 = vmatprep.subr.bf16.mxu0 %v7262_v13 }
 0x554   : > { %6480 = vmatpush3.bf16.msra.mxu1 %v9312_v58 }
 0x555   : > { %6473 = vmatprep.subr.bf16.mxu1 %v9325_v62 }
 0x556   : > { %5288 = vmatpush1.bf16.msra.mxu0 %v7260_v53 }
 0x557   : > { %5289 = vmatprep.subr.bf16.mxu0 %v7267_v37 }
 0x558   : > { %6481 = vmatpush3.bf16.msra.mxu1 %v9330_v61 }
 0x559   : > { %6474 = vmatprep.subr.bf16.mxu1 %v9343_v0 }
 0x55a   : > { %5290 = vmatpush1.bf16.msra.mxu0 %v7265_v39 }
 0x55b   : > { %5291 = vmatprep.subr.bf16.mxu0 %v7272_v5 }
 0x55c   : > { %6482 = vmatpush3.bf16.msra.mxu1 %v9348_v1 }
 0x55e   : > { %5292 = vmatpush1.bf16.msra.mxu0 %v7270_v9 }
 0x55f   : > { %5293 = vmatprep.subr.bf16.mxu0 %v7277_v46 }
 0x562   : > { %5294 = vmatpush1.bf16.msra.mxu0 %v7275_v47 }
 0x563   : > { %5295 = vmatprep.subr.bf16.mxu0 %v7282_v52 }
 0x566   : > { %5296 = vmatpush1.bf16.msra.mxu0 %v7280_v54 }
 0x567   : > { %5297 = vmatprep.subr.bf16.mxu0 %v7287_v57 }
 0x56a   : > { %5298 = vmatpush1.bf16.msra.mxu0 %v7285_v38 }
 0x56b   : > { %5299 = vmatprep.subr.bf16.mxu0 %v7292_v18 }
 0x56e   : > { %5300 = vmatpush1.bf16.msra.mxu0 %v7290_v59 }
 0x56f   : > { %5301 = vmatprep.subr.bf16.mxu0 %v7297_v26 }
 0x572   : > { %5302 = vmatpush1.bf16.msra.mxu0 %v7295_v63 }
 0x573   : > { %6409 = vmatprep.subr.bf16.mxu0 %v9205_v35  ;;  %v4157_v35 = vld [vmem:[%s9530_s10] sm:$0x3] }
 0x574   : > { %v9377_v37 = vrot.slane %v4157_v35, %v7817_v7  ;;  %v9380_v39 = vrot.slane %v4157_v35, %v7825_v10 }
 0x5a4   : > { %v4680_v2 = vpop.f32.mrb[40].mxu1  ;;  %v4749_v3 = vpop.f32.mrb[60].mxu0 }
 0x5a5   : > { %v4681_v32 = vpop.f32.mrb[41].mxu1  ;;  %v4751_v4 = vpop.f32.mrb[61].mxu0  ;;  %v4880_v9 = vadd.f32 %v9377_v37, %v4749_v3 }
 0x5a6   : > { %v4682_v48 = vpop.f32.mrb[42].mxu1  ;;  %v4753_v45 = vpop.f32.mrb[62].mxu0  ;;  %v4881_v52 = vadd.f32 %v9380_v39, %v4751_v4 }
 0x5a7   : > { %v4684_v49 = vpop.f32.mrb[43].mxu1  ;;  %v4755_v6 = vpop.f32.mrb[63].mxu0  ;;  %v4884_v57 = vadd.f32 %v9377_v37, %v4753_v45  ;;  %v4908_v2 = vmax.f32 %v4880_v9, 0.0 }
 0x5a8   : > { %v4885_v7 = vadd.f32 %v9380_v39, %v4755_v6 }
 0x5c4   : > { %v4688_v8 = vpop.f32.mrb[44].mxu1  ;;  %v4759_v11 = vpop.f32.mrb[64].mxu0 }
 0x5c5   : > { %v4690_v12 = vpop.f32.mrb[45].mxu1  ;;  %v4761_v15 = vpop.f32.mrb[65].mxu0  ;;  %v4888_v6 = vadd.f32 %v9377_v37, %v4759_v11 }
 0x5c6   : > { %v4692_v17 = vpop.f32.mrb[46].mxu1  ;;  %v4763_v19 = vpop.f32.mrb[66].mxu0 }
 0x5c7   : > { %v4694_v40 = vpop.f32.mrb[47].mxu1  ;;  %v4765_v42 = vpop.f32.mrb[67].mxu0 }
 0x5c8   : > { %v4893_v11 = vadd.f32 %v9380_v39, %v4765_v42 }
 0x5e4   : > { %v4698_v60 = vpop.f32.mrb[48].mxu1  ;;  %v9353_v44 = vpop.f32.mrb[68].mxu0 }
 0x5e5   : > { %v4700_v20 = vpop.f32.mrb[49].mxu1  ;;  %v9355_v22 = vpop.f32.mrb[69].mxu0 }
 0x5e6   : > { %v9357_v25 = vpop.f32.mrb[50].mxu1  ;;  %v9359_v27 = vpop.f32.mrb[70].mxu0 }
 0x5e7   : > { %v9361_v28 = vpop.f32.mrb[51].mxu1  ;;  %v9363_v29 = vpop.f32.mrb[71].mxu0 }
 0x604   : > { %v9365_v30 = vpop.f32.mrb[52].mxu1  ;;  %v9367_v33 = vpop.f32.mrb[72].mxu0 }
 0x605   : > { %v9369_v43 = vpop.f32.mrb[53].mxu1  ;;  %v9371_v24 = vpop.f32.mrb[73].mxu0 }
 0x606   : > { %v4712_v14 = vpop.f32.mrb[54].mxu1  ;;  %v4783_v16 = vpop.f32.mrb[74].mxu0 }
 0x607   : > { %v4713_v13 = vpop.f32.mrb[55].mxu1  ;;  %v4784_v53 = vpop.f32.mrb[75].mxu0  ;;  %v4913_v16 = vmax.f32 %v4885_v7, 0.0 }
 0x60c   : > { %v4820_v5 = vpop.f32.mrb[56].mxu1 }
 0x60d   : > { %v4857_v46 = vadd.f32 %v4820_v5, %v4682_v48  ;;  %v4822_v47 = vpop.f32.mrb[57].mxu1  ;;  %v4909_v48 = vmax.f32 %v4881_v52, 0.0 }
 0x60e   : > { %v4858_v54 = vadd.f32 %v4822_v47, %v4684_v49  ;;  %v4824_v38 = vpop.f32.mrb[58].mxu1  ;;  %v4912_v49 = vmax.f32 %v4884_v57, 0.0 }
 0x60f   : > { %v4882_v18 = vadd.f32 %v9377_v37, %v4857_v46  ;;  %v4859_v59 = vadd.f32 %v4824_v38, %v4688_v8  ;;  %v4826_v26 = vpop.f32.mrb[59].mxu1  ;;  %v4889_v46 = vadd.f32 %v9380_v39, %v4761_v15  ;;  %v4892_v38 = vadd.f32 %v9377_v37, %v4763_v19 }
 0x610   : > { %v4883_v10 = vadd.f32 %v9380_v39, %v4858_v54  ;;  %v4860_v63 = vadd.f32 %v4826_v26, %v4690_v12  ;;  %v4916_v15 = vmax.f32 %v4888_v6, 0.0 }
 0x611   : > { %v4910_v32 = vmax.f32 %v4882_v18, 0.0  ;;  %v4886_v3 = vadd.f32 %v9377_v37, %v4859_v59  ;;  %v4917_v19 = vmax.f32 %v4889_v46, 0.0 }
 0x612   : > { %v4911_v35 = vmax.f32 %v4883_v10, 0.0  ;;  %v4887_v4 = vadd.f32 %v9380_v39, %v4860_v63  ;;  %v4920_v63 = vmax.f32 %v4892_v38, 0.0 }
 0x613   : > { %v9390_v14 = vpack.c.bf16 %v4910_v32, %v4908_v2  ;;  %v4914_v45 = vmax.f32 %v4886_v3, 0.0  ;;  %v4921_v32 = vmax.f32 %v4893_v11, 0.0 }
 0x614   : > { %v4915_v8 = vmax.f32 %v4887_v4, 0.0  ;;  %v4830_v13 = vpop.f32.mrb[60].mxu1  ;;  %v9392_v53 = vpack.c.bf16 %v4911_v35, %v4909_v48 }
 0x615   : > { %v5003_v12 = vpack.c.bf16 %v4914_v45, %v4912_v49  ;;  %v4861_v5 = vadd.f32 %v4830_v13, %v4692_v17  ;;  %v4832_v9 = vpop.f32.mrb[61].mxu1  ;;  %v4897_v49 = vadd.f32 %v9380_v39, %v9355_v22 }
 0x616   : > { %v4862_v47 = vadd.f32 %v4832_v9, %v4694_v40  ;;  %v4834_v52 = vpop.f32.mrb[62].mxu1  ;;  %5303 = vmatprep.mubr.bf16.mxu0 %v9392_v53  ;;  %v5004_v54 = vpack.c.bf16 %v4915_v8, %v4913_v16 }
 0x617   : > { %v4890_v57 = vadd.f32 %v9377_v37, %v4861_v5  ;;  %v4863_v18 = vadd.f32 %v4834_v52, %v4698_v60  ;;  %v4836_v59 = vpop.f32.mrb[63].mxu1  ;;  %5304 = vmatmul.mubr.bf16.vlgmr.msra.gmra.mrb[76].mxu0 %v9390_v14  ;;  %v4925_v9 = vmax.f32 %v4897_v49, 0.0 }
 0x618   : > { %v4891_v17 = vadd.f32 %v9380_v39, %v4862_v47  ;;  %v4864_v26 = vadd.f32 %v4836_v59, %v4700_v20  ;;  %5312 = vmatprep.mubr.bf16.mxu0 %v5004_v54  ;;  %6410 = vmatpush3.bf16.msra.mxu0 %v9210_v36  ;;  %v4896_v36 = vadd.f32 %v9377_v37, %v9353_v44 }
 0x619   : > { %v4918_v40 = vmax.f32 %v4890_v57, 0.0  ;;  %v4894_v7 = vadd.f32 %v9377_v37, %v4863_v18  ;;  %5413 = vmatprep.mubr.bf16.mxu1 %v5004_v54  ;;  %6411 = vmatprep.subr.bf16.mxu0 %v9218_v56 }
 0x61a   : > { %v4919_v60 = vmax.f32 %v4891_v17, 0.0  ;;  %v4895_v10 = vadd.f32 %v9380_v39, %v4864_v26  ;;  %5414 = vmatmul.mubr.bf16.vlgmr.msra.gmra.mrb[72].mxu1 %v5003_v12 }
 0x61b   : > { %v4922_v42 = vmax.f32 %v4894_v7, 0.0  ;;  %v5005_v2 = vpack.c.bf16 %v4918_v40, %v4916_v15 }
 0x61c   : > { %v4923_v20 = vmax.f32 %v4895_v10, 0.0  ;;  %v4840_v3 = vpop.f32.mrb[64].mxu1  ;;  %v5006_v48 = vpack.c.bf16 %v4919_v60, %v4917_v19  ;;  %6412 = vmatpush3.bf16.msra.mxu0 %v9225_v23  ;;  %v4900_v23 = vadd.f32 %v9377_v37, %v9359_v27 }
 0x61d   : > { %v4865_v35 = vadd.f32 %v4840_v3, %v9357_v25  ;;  %v4842_v56 = vpop.f32.mrb[65].mxu1  ;;  %6413 = vmatprep.subr.bf16.mxu0 %v9234_v34  ;;  %v5007_v4 = vpack.c.bf16 %v4922_v42, %v4920_v63  ;;  %v4901_v34 = vadd.f32 %v9380_v39, %v9363_v29  ;;  %v4904_v29 = vadd.f32 %v9377_v37, %v9367_v33 }
 0x61e   : > { %v4866_v45 = vadd.f32 %v4842_v56, %v9361_v28  ;;  %v4844_v16 = vpop.f32.mrb[66].mxu1  ;;  %5421 = vmatprep.mubr.bf16.mxu1 %v5006_v48  ;;  %v5008_v8 = vpack.c.bf16 %v4923_v20, %v4921_v32  ;;  %v4924_v28 = vmax.f32 %v4896_v36, 0.0  ;;  %v4928_v46 = vmax.f32 %v4900_v23, 0.0 }
 0x61f   : > { %v4898_v13 = vadd.f32 %v9377_v37, %v4865_v35  ;;  %v4867_v44 = vadd.f32 %v4844_v16, %v9365_v30  ;;  %v4846_v25 = vpop.f32.mrb[67].mxu1  ;;  %5313 = vmatmul.mubr.bf16.gmra.mrb[80].mxu0 %v5003_v12  ;;  %v4929_v52 = vmax.f32 %v4901_v34, 0.0  ;;  %v4932_v26 = vmax.f32 %v4904_v29, 0.0 }
 0x620   : > { %v4899_v6 = vadd.f32 %v9380_v39, %v4866_v45  ;;  %v4868_v22 = vadd.f32 %v4846_v25, %v9369_v43  ;;  %5322 = vmatprep.mubr.bf16.mxu0 %v5006_v48  ;;  %6414 = vmatpush3.bf16.msra.mxu0 %v9243_v41  ;;  %v4905_v41 = vadd.f32 %v9380_v39, %v9371_v24 }
 0x621   : > { %v4926_v5 = vmax.f32 %v4898_v13, 0.0  ;;  %v4902_v27 = vadd.f32 %v9377_v37, %v4867_v44  ;;  %6415 = vmatprep.subr.bf16.mxu0 %v9271_v50 }
 0x622   : > { %v4927_v30 = vmax.f32 %v4899_v6, 0.0  ;;  %v4903_v12 = vadd.f32 %v9380_v39, %v4868_v22  ;;  %5422 = vmatmul.mubr.bf16.gmra.mrb[76].mxu1 %v5005_v2  ;;  %v4933_v24 = vmax.f32 %v4905_v41, 0.0 }
 0x623   : > { %v4930_v47 = vmax.f32 %v4902_v27, 0.0  ;;  %5429 = vmatprep.mubr.bf16.mxu1 %v5008_v8  ;;  %v5009_v43 = vpack.c.bf16 %v4926_v5, %v4924_v28 }
 0x624   : > { %v4931_v54 = vmax.f32 %v4903_v12, 0.0  ;;  %v4850_v38 = vpop.f32.mrb[68].mxu1  ;;  %v5010_v57 = vpack.c.bf16 %v4927_v30, %v4925_v9  ;;  %6416 = vmatpush3.bf16.msra.mxu0 %v9276_v51 }
 0x625   : > { %v4906_v50 = vadd.f32 %v9377_v37, %v4850_v38  ;;  %v4852_v18 = vpop.f32.mrb[69].mxu1  ;;  %6417 = vmatprep.subr.bf16.mxu0 %v9289_v21  ;;  %v5011_v59 = vpack.c.bf16 %v4930_v47, %v4928_v46  ;;  %v9446_v21 = vld [vmem:[%s9532_s12] ss:$0 sm:$0xff] }
 0x626   : > { %v4907_v33 = vadd.f32 %v9380_v39, %v4852_v18  ;;  %v4854_v11 = vpop.f32.mrb[70].mxu1  ;;  %v5012_v17 = vpack.c.bf16 %v4931_v54, %v4929_v52 }
 0x627   : > { %v4934_v15 = vmax.f32 %v4906_v50, 0.0  ;;  %v4855_v40 = vpop.f32.mrb[71].mxu1  ;;  %5323 = vmatmul.mubr.bf16.gmra.mrb[84].mxu0 %v5005_v2 }
 0x628   : > { %v4935_v7 = vmax.f32 %v4907_v33, 0.0  ;;  %5332 = vmatprep.mubr.bf16.mxu0 %v5008_v8  ;;  %6418 = vmatpush3.bf16.msra.mxu0 %v9294_v55 }
 0x629   : > { %v5013_v51 = vpack.c.bf16 %v4934_v15, %v4932_v26  ;;  %6419 = vmatprep.subr.bf16.mxu0 %v9307_v31 }
 0x62a   : > { %v5014_v37 = vpack.c.bf16 %v4935_v7, %v4933_v24  ;;  %5430 = vmatmul.mubr.bf16.gmra.mrb[80].mxu1 %v5007_v4 }
 0x62b   : > { %5437 = vmatprep.mubr.bf16.mxu1 %v5010_v57 }
 0x62c   : > { %6420 = vmatpush3.bf16.msra.mxu0 %v9312_v58 }
 0x62d   : > { %6421 = vmatprep.subr.bf16.mxu0 %v9325_v62 }
 0x62f   : > { %5333 = vmatmul.mubr.bf16.gmra.mrb[88].mxu0 %v5007_v4 }
 0x630   : > { %5342 = vmatprep.mubr.bf16.mxu0 %v5010_v57  ;;  %6422 = vmatpush3.bf16.msra.mxu0 %v9330_v61 }
 0x631   : > { %6423 = vmatprep.subr.bf16.mxu0 %v9343_v0 }
 0x632   : > { %5438 = vmatmul.mubr.bf16.gmra.mrb[84].mxu1 %v5009_v43 }
 0x633   : > { %5445 = vmatprep.mubr.bf16.mxu1 %v5012_v17 }
 0x634   : > { %6424 = vmatpush3.bf16.msra.mxu0 %v9348_v1 }
 0x637   : > { %5343 = vmatmul.mubr.bf16.gmra.mrb[92].mxu0 %v5009_v43 }
 0x638   : > { %5352 = vmatprep.mubr.bf16.mxu0 %v5012_v17 }
 0x63a   : > { %5446 = vmatmul.mubr.bf16.gmra.mrb[88].mxu1 %v5011_v59 }
 0x63b   : > { %5453 = vmatprep.mubr.bf16.mxu1 %v5014_v37 }
 0x63f   : > { %5353 = vmatmul.mubr.bf16.gmra.mrb[96].mxu0 %v5011_v59 }
 0x640   : > { %5362 = vmatprep.mubr.bf16.mxu0 %v5014_v37 }
 0x642   : > { %5454 = vmatmul.mubr.bf16.gmra.mrb[92].mxu1 %v5013_v51 }
 0x647   : > { %5363 = vmatmul.mubr.bf16.gmra.mrb[100].mxu0 %v5013_v51 }
 0x648   : > { %5405 = vmatprep.mubr.bf16.mxu0 %v9392_v53 }
 0x64f   : > { %5406 = vmatmul.mubr.bf16.vlgmr.msra.gmra.mrb[104].mxu0 %v9390_v14 }
 0x6ea   : > { %v5305_v55 = vpop.f32.mrb[76].mxu0 }
 0x6eb   : > { %v5306_v31 = vpop.f32.mrb[77].mxu0 }
 0x6ec   : > { %v5481_v58 = vadd.f32 %v9446_v21, %v5306_v31  ;;  %v9449_v62 = vpop.f32.mrb[78].mxu0 }
 0x6ed   : > { %v6431_v61 = vpop.f32.mrb[72].mxu1  ;;  %v5310_v0 = vpop.f32.mrb[79].mxu0 }
 0x6ee   : > { %v5509_v1 = vsub.f32 0.0, %v5481_v58  ;;  %v5483_v39 = vadd.f32 %v9446_v21, %v5310_v0  ;;  %v6432_v19 = vpop.f32.mrb[73].mxu1 }
 0x6ef   : > { %v6433_v53 = vadd.f32 %v6432_v19, %v6431_v61  ;;  %v6434_v60 = vpop.f32.mrb[74].mxu1 }
 0x6f0   : > { %v5537_v14 = vmul.f32 1.442695, %v5509_v1  ;;  %v5511_v10 = vsub.f32 0.0, %v5483_v39  ;;  %v6435_v63 = vpop.f32.mrb[75].mxu1 }
 0x6f1   : > { %v6436_v42 = vadd.f32 %v6435_v63, %v6434_v60 }
 0x6f2   : > { %7300 = vpow2.f32 %v5537_v14  ;;  %v5541_v2 = vmul.f32 1.442695, %v5511_v10  ;;  %v9452_v32 = vpop.f32.mrb[80].mxu0 }
 0x6f3   : > { %v5316_v20 = vpop.f32.mrb[81].mxu0 }
 0x6f4   : > { %7302 = vpow2.f32 %v5541_v2  ;;  %v5485_v3 = vadd.f32 %v9446_v21, %v5316_v20  ;;  %v5318_v48 = vpop.f32.mrb[82].mxu0 }
 0x6f5   : > { %v5464_v36 = vadd.f32 %v6433_v53, %v5318_v48  ;;  %v6437_v35 = vpop.f32.mrb[76].mxu1  ;;  %v5320_v56 = vpop.f32.mrb[83].mxu0 }
 0x6f6   : > { %v5513_v4 = vsub.f32 0.0, %v5485_v3  ;;  %v5487_v49 = vadd.f32 %v9446_v21, %v5320_v56  ;;  %v6438_v45 = vpop.f32.mrb[77].mxu1 }
 0x6f7   : > { %v5486_v16 = vadd.f32 %v9446_v21, %v5464_v36  ;;  %v6439_v8 = vadd.f32 %v6438_v45, %v6437_v35  ;;  %v6440_v23 = vpop.f32.mrb[78].mxu1 }
 0x6f8   : > { %v5545_v13 = vmul.f32 1.442695, %v5513_v4  ;;  %v5515_v44 = vsub.f32 0.0, %v5487_v49  ;;  %v6441_v25 = vpop.f32.mrb[79].mxu1 }
 0x6f9   : > { %v5514_v34 = vsub.f32 0.0, %v5486_v16  ;;  %v6442_v6 = vadd.f32 %v6441_v25, %v6440_v23 }
 0x6fa   : > { %7304 = vpow2.f32 %v5545_v13  ;;  %v5549_v22 = vmul.f32 1.442695, %v5515_v44  ;;  %v5324_v28 = vpop.f32.mrb[84].mxu0 }
 0x6fb   : > { %v5547_v5 = vmul.f32 1.442695, %v5514_v34  ;;  %v5465_v27 = vadd.f32 %v6436_v42, %v5324_v28  ;;  %v5326_v9 = vpop.f32.mrb[85].mxu0 }
 0x6fc   : > { %v7301_v30 = vpop.eup %7300  ;;  %7306 = vpow2.f32 %v5549_v22  ;;  %v5489_v12 = vadd.f32 %v9446_v21, %v5326_v9  ;;  %v5328_v46 = vpop.f32.mrb[86].mxu0 }
 0x6fd   : > { %v5593_v29 = vadd.f32 1.0, %v7301_v30  ;;  %7308 = vpow2.f32 %v5547_v5  ;;  %v5488_v47 = vadd.f32 %v9446_v21, %v5465_v27  ;;  %v5466_v43 = vadd.f32 %v6439_v8, %v5328_v46  ;;  %v6443_v52 = vpop.f32.mrb[80].mxu1  ;;  %v5330_v41 = vpop.f32.mrb[87].mxu0 }
 0x6fe   : > { %v7303_v54 = vpop.eup %7302  ;;  %v5517_v38 = vsub.f32 0.0, %v5489_v12  ;;  %v5491_v57 = vadd.f32 %v9446_v21, %v5330_v41  ;;  %v6444_v50 = vpop.f32.mrb[81].mxu1 }
 0x6ff   : > { %7310 = vrcp.f32 %v5593_v29  ;;  %v5595_v18 = vadd.f32 1.0, %v7303_v54  ;;  %v5516_v59 = vsub.f32 0.0, %v5488_v47  ;;  %v5490_v33 = vadd.f32 %v9446_v21, %v5466_v43  ;;  %v6446_v11 = vpop.f32.mrb[82].mxu1 }
 0x700   : > { %v5553_v17 = vmul.f32 1.442695, %v5517_v38  ;;  %v5519_v26 = vsub.f32 0.0, %v5491_v57  ;;  %v6445_v15 = vadd.f32 %v6444_v50, %v6443_v52  ;;  %v6447_v40 = vpop.f32.mrb[83].mxu1 }
 0x701   : > { %7312 = vrcp.f32 %v5595_v18  ;;  %v5551_v24 = vmul.f32 1.442695, %v5516_v59  ;;  %v5518_v7 = vsub.f32 0.0, %v5490_v33  ;;  %v6448_v51 = vadd.f32 %v6447_v40, %v6446_v11 }
 0x702   : > { %7314 = vpow2.f32 %v5553_v17  ;;  %v5557_v37 = vmul.f32 1.442695, %v5519_v26  ;;  %v5334_v55 = vpop.f32.mrb[88].mxu0 }
 0x703   : > { %7316 = vpow2.f32 %v5551_v24  ;;  %v5555_v31 = vmul.f32 1.442695, %v5518_v7  ;;  %v5467_v58 = vadd.f32 %v6442_v6, %v5334_v55  ;;  %v5336_v61 = vpop.f32.mrb[89].mxu0 }
 0x704   : > { %v7305_v0 = vpop.eup %7304  ;;  %7318 = vpow2.f32 %v5557_v37  ;;  %v5493_v1 = vadd.f32 %v9446_v21, %v5336_v61  ;;  %v5338_v39 = vpop.f32.mrb[90].mxu0 }
 0x705   : > { %v5597_v19 = vadd.f32 1.0, %v7305_v0  ;;  %7320 = vpow2.f32 %v5555_v31  ;;  %v5492_v53 = vadd.f32 %v9446_v21, %v5467_v58  ;;  %v5468_v60 = vadd.f32 %v6445_v15, %v5338_v39  ;;  %v6449_v14 = vpop.f32.mrb[84].mxu1  ;;  %v5340_v10 = vpop.f32.mrb[91].mxu0 }
 0x706   : > { %v7307_v63 = vpop.eup %7306  ;;  %v5521_v42 = vsub.f32 0.0, %v5493_v1  ;;  %v5495_v2 = vadd.f32 %v9446_v21, %v5340_v10  ;;  %v6450_v20 = vpop.f32.mrb[85].mxu1 }
 0x707   : > { %v7309_v3 = vpop.eup %7308  ;;  %7322 = vrcp.f32 %v5597_v19  ;;  %v5599_v48 = vadd.f32 1.0, %v7307_v63  ;;  %v5520_v36 = vsub.f32 0.0, %v5492_v53  ;;  %v5494_v35 = vadd.f32 %v9446_v21, %v5468_v60  ;;  %v6452_v56 = vpop.f32.mrb[86].mxu1 }
 0x708   : > { %v5598_v4 = vadd.f32 1.0, %v7309_v3  ;;  %v5561_v49 = vmul.f32 1.442695, %v5521_v42  ;;  %v5523_v45 = vsub.f32 0.0, %v5495_v2  ;;  %v6451_v16 = vadd.f32 %v6450_v20, %v6449_v14  ;;  %v6453_v8 = vpop.f32.mrb[87].mxu1 }
 0x709   : > { %v7311_v23 = vpop.eup %7310  ;;  %7324 = vrcp.f32 %v5599_v48  ;;  %v5559_v13 = vmul.f32 1.442695, %v5520_v36  ;;  %v5522_v44 = vsub.f32 0.0, %v5494_v35  ;;  %v6454_v25 = vadd.f32 %v6453_v8, %v6452_v56 }
 0x70a   : > { %5649 = vst [vmem:[%s9469_s27] sm:$0xff] %v7311_v23  ;;  %7326 = vrcp.f32 %v5598_v4  ;;  %v5565_v34 = vmul.f32 1.442695, %v5523_v45  ;;  %v5344_v6 = vpop.f32.mrb[92].mxu0 }
 0x70b   : > { %v7313_v22 = vpop.eup %7312  ;;  %7328 = vpow2.f32 %v5559_v13  ;;  %v5563_v28 = vmul.f32 1.442695, %v5522_v44  ;;  %v5469_v5 = vadd.f32 %v6448_v51, %v5344_v6  ;;  %v5346_v27 = vpop.f32.mrb[93].mxu0 }
 0x70c   : > { %v7315_v9 = vpop.eup %7314  ;;  %5651 = vst [vmem:[%s9469_s27 + $0x10] sm:$0xff] %v7313_v22  ;;  %7330 = vpow2.f32 %v5561_v49  ;;  %v5497_v30 = vadd.f32 %v9446_v21, %v5346_v27  ;;  %v5348_v12 = vpop.f32.mrb[94].mxu0 }
 0x70d   : > { %v7317_v46 = vpop.eup %7316  ;;  %v5601_v29 = vadd.f32 1.0, %v7315_v9  ;;  %7332 = vpow2.f32 %v5563_v28  ;;  %v5496_v47 = vadd.f32 %v9446_v21, %v5469_v5  ;;  %v5470_v43 = vadd.f32 %v6451_v16, %v5348_v12  ;;  %v6455_v52 = vpop.f32.mrb[88].mxu1 }
 0x70e   : > { %v5350_v41 = vpop.f32.mrb[95].mxu0  ;;  %v7319_v54 = vpop.eup %7318  ;;  %v5600_v38 = vadd.f32 1.0, %v7317_v46  ;;  %7334 = vpow2.f32 %v5565_v34  ;;  %v5525_v57 = vsub.f32 0.0, %v5497_v30 }
 0x70f   : > { %v5499_v50 = vadd.f32 %v9446_v21, %v5350_v41  ;;  %v6456_v18 = vpop.f32.mrb[89].mxu1  ;;  %v7321_v59 = vpop.eup %7320  ;;  %7336 = vrcp.f32 %v5601_v29  ;;  %v5603_v33 = vadd.f32 1.0, %v7319_v54  ;;  %v5524_v11 = vsub.f32 0.0, %v5496_v47 }
 0x710   : > { %v5498_v17 = vadd.f32 %v9446_v21, %v5470_v43  ;;  %v6458_v26 = vpop.f32.mrb[90].mxu1  ;;  %7338 = vrcp.f32 %v5600_v38  ;;  %v5602_v15 = vadd.f32 1.0, %v7321_v59  ;;  %v5569_v40 = vmul.f32 1.442695, %v5525_v57 }
 0x711   : > { %v5527_v24 = vsub.f32 0.0, %v5499_v50  ;;  %v6459_v7 = vpop.f32.mrb[91].mxu1  ;;  %v7323_v51 = vpop.eup %7322  ;;  %7340 = vrcp.f32 %v5603_v33  ;;  %v5567_v37 = vmul.f32 1.442695, %v5524_v11  ;;  %v6457_v31 = vadd.f32 %v6456_v18, %v6455_v52 }
 0x712   : > { %v5526_v55 = vsub.f32 0.0, %v5498_v17  ;;  %5653 = vst [vmem:[%s9469_s27 + $0x20] sm:$0xff] %v7323_v51  ;;  %7342 = vrcp.f32 %v5602_v15  ;;  %v6460_v61 = vadd.f32 %v6459_v7, %v6458_v26  ;;  %v5354_v0 = vpop.f32.mrb[96].mxu0 }
 0x713   : > { %v5573_v58 = vmul.f32 1.442695, %v5527_v24  ;;  %v7325_v1 = vpop.eup %7324  ;;  %7344 = vpow2.f32 %v5567_v37  ;;  %v5471_v19 = vadd.f32 %v6454_v25, %v5354_v0  ;;  %v5356_v53 = vpop.f32.mrb[97].mxu0 }
 0x714   : > { %v5571_v39 = vmul.f32 1.442695, %v5526_v55  ;;  %v7327_v60 = vpop.eup %7326  ;;  %5655 = vst [vmem:[%s9469_s27 + $0x30] sm:$0xff] %v7325_v1  ;;  %7346 = vpow2.f32 %v5569_v40  ;;  %v5501_v14 = vadd.f32 %v9446_v21, %v5356_v53  ;;  %v5358_v10 = vpop.f32.mrb[98].mxu0 }
 0x715   : > { %v7329_v63 = vpop.eup %7328  ;;  %5654 = vst [vmem:[%s9469_s27 + $0x28] sm:$0xff] %v7327_v60  ;;  %v5500_v42 = vadd.f32 %v9446_v21, %v5471_v19  ;;  %v5472_v2 = vadd.f32 %v6457_v31, %v5358_v10  ;;  %v6461_v20 = vpop.f32.mrb[92].mxu1 }
 0x716   : > { %7348 = vpow2.f32 %v5571_v39  ;;  %v5360_v3 = vpop.f32.mrb[99].mxu0  ;;  %v7331_v48 = vpop.eup %7330  ;;  %v5604_v36 = vadd.f32 1.0, %v7329_v63  ;;  %v5529_v35 = vsub.f32 0.0, %v5501_v14 }
 0x717   : > { %7350 = vpow2.f32 %v5573_v58  ;;  %v5503_v56 = vadd.f32 %v9446_v21, %v5360_v3  ;;  %v6462_v4 = vpop.f32.mrb[93].mxu1  ;;  %v7333_v49 = vpop.eup %7332  ;;  %v5605_v45 = vadd.f32 1.0, %v7331_v48  ;;  %v5528_v16 = vsub.f32 0.0, %v5500_v42 }
 0x718   : > { %v5502_v8 = vadd.f32 %v9446_v21, %v5472_v2  ;;  %v6463_v23 = vadd.f32 %v6462_v4, %v6461_v20  ;;  %v6464_v13 = vpop.f32.mrb[94].mxu1  ;;  %v7335_v44 = vpop.eup %7334  ;;  %7352 = vrcp.f32 %v5604_v36  ;;  %v5606_v25 = vadd.f32 1.0, %v7333_v49 }
 0x719   : > { %v5577_v34 = vmul.f32 1.442695, %v5529_v35  ;;  %v5531_v6 = vsub.f32 0.0, %v5503_v56  ;;  %v6465_v22 = vpop.f32.mrb[95].mxu1  ;;  %v7337_v28 = vpop.eup %7336  ;;  %7354 = vrcp.f32 %v5605_v45  ;;  %v5607_v5 = vadd.f32 1.0, %v7335_v44 }
 0x71a   : > { %v5575_v27 = vmul.f32 1.442695, %v5528_v16  ;;  %v5530_v9 = vsub.f32 0.0, %v5502_v8  ;;  %v7339_v30 = vpop.eup %7338  ;;  %5657 = vst [vmem:[%s9469_s27 + $0x40] sm:$0xff] %v7337_v28  ;;  %7356 = vrcp.f32 %v5606_v25  ;;  %v6466_v12 = vadd.f32 %v6465_v22, %v6464_v13  ;;  %v5364_v46 = vpop.f32.mrb[100].mxu0 }
 0x71b   : > { %v7341_v29 = vpop.eup %7340  ;;  %5656 = vst [vmem:[%s9469_s27 + $0x38] sm:$0xff] %v7339_v30  ;;  %7358 = vrcp.f32 %v5607_v5  ;;  %v5581_v43 = vmul.f32 1.442695, %v5531_v6  ;;  %v5473_v52 = vadd.f32 %v6460_v61, %v5364_v46  ;;  %v5366_v41 = vpop.f32.mrb[101].mxu0 }
 0x71c   : > { %v5579_v47 = vmul.f32 1.442695, %v5530_v9  ;;  %v7343_v54 = vpop.eup %7342  ;;  %5659 = vst [vmem:[%s9469_s27 + $0x50] sm:$0xff] %v7341_v29  ;;  %7360 = vpow2.f32 %v5575_v27  ;;  %v5508_v38 = vadd.f32 %v6466_v12, %v9446_v21  ;;  %v5505_v57 = vadd.f32 %v9446_v21, %v5366_v41  ;;  %v5368_v50 = vpop.f32.mrb[102].mxu0 }
 0x71d   : > { %v7345_v18 = vpop.eup %7344  ;;  %5658 = vst [vmem:[%s9469_s27 + $0x48] sm:$0xff] %v7343_v54  ;;  %7362 = vpow2.f32 %v5577_v34  ;;  %v5504_v59 = vadd.f32 %v9446_v21, %v5473_v52  ;;  %v5474_v33 = vadd.f32 %v6463_v23, %v5368_v50  ;;  %v5370_v11 = vpop.f32.mrb[103].mxu0 }
 0x71e   : > { %v7347_v17 = vpop.eup %7346  ;;  %v5608_v26 = vadd.f32 1.0, %v7345_v18  ;;  %7364 = vpow2.f32 %v5579_v47  ;;  %v5536_v15 = vsub.f32 0.0, %v5508_v38  ;;  %v5533_v40 = vsub.f32 0.0, %v5505_v57 }
 0x71f   : > { %v5609_v7 = vadd.f32 1.0, %v7347_v17  ;;  %7366 = vpow2.f32 %v5581_v43  ;;  %v5532_v51 = vsub.f32 0.0, %v5504_v59  ;;  %v5506_v37 = vadd.f32 %v9446_v21, %v5474_v33 }
 0x720   : > { %v7349_v24 = vpop.eup %7348  ;;  %7368 = vrcp.f32 %v5608_v26  ;;  %v5591_v58 = vmul.f32 1.442695, %v5536_v15  ;;  %v5585_v19 = vmul.f32 1.442695, %v5533_v40  ;;  %v5507_v53 = vadd.f32 %v9446_v21, %v5370_v11 }
 0x721   : > { %v7351_v55 = vpop.eup %7350  ;;  %v5610_v31 = vadd.f32 1.0, %v7349_v24  ;;  %7370 = vrcp.f32 %v5609_v7  ;;  %v5583_v0 = vmul.f32 1.442695, %v5532_v51  ;;  %v5534_v1 = vsub.f32 0.0, %v5506_v37 }
 0x722   : > { %v5611_v61 = vadd.f32 1.0, %v7351_v55  ;;  %v7353_v39 = vpop.eup %7352  ;;  %v6425_v60 = vpop.f32.mrb[104].mxu0  ;;  %v5535_v2 = vsub.f32 0.0, %v5507_v53 }
 0x723   : > { %7372 = vrcp.f32 %v5610_v31  ;;  %v7355_v14 = vpop.eup %7354  ;;  %5660 = vst [vmem:[%s9469_s27 + $0x58] sm:$0xff] %v7353_v39  ;;  %v5587_v10 = vmul.f32 1.442695, %v5534_v1  ;;  %v6426_v63 = vpop.f32.mrb[105].mxu0 }
 0x724   : > { %7374 = vrcp.f32 %v5611_v61  ;;  %v7357_v42 = vpop.eup %7356  ;;  %5661 = vst [vmem:[%s9469_s27 + $0x60] sm:$0xff] %v7355_v14  ;;  %v6427_v20 = vadd.f32 %v6426_v63, %v6425_v60  ;;  %v6428_v3 = vpop.f32.mrb[106].mxu0  ;;  %v5589_v56 = vmul.f32 1.442695, %v5535_v2 }
 0x725   : > { %7376 = vpow2.f32 %v5591_v58  ;;  %v7359_v48 = vpop.eup %7358  ;;  %5662 = vst [vmem:[%s9469_s27 + $0x68] sm:$0xff] %v7357_v42  ;;  %v6429_v36 = vpop.f32.mrb[107].mxu0 }
 0x726   : > { %7378 = vpow2.f32 %v5583_v0  ;;  %v7361_v35 = vpop.eup %7360  ;;  %5663 = vst [vmem:[%s9469_s27 + $0x70] sm:$0xff] %v7359_v48  ;;  %v5462_v4 = vadd.f32 %v6427_v20, %v9449_v62  ;;  %v6430_v49 = vadd.f32 %v6429_v36, %v6428_v3 }
 0x727   : > { %7380 = vpow2.f32 %v5585_v19  ;;  %v7363_v45 = vpop.eup %7362  ;;  %v5612_v16 = vadd.f32 1.0, %v7361_v35 }
 0x728   : > { %7382 = vpow2.f32 %v5587_v10  ;;  %v7365_v8 = vpop.eup %7364  ;;  %v5613_v23 = vadd.f32 1.0, %v7363_v45  ;;  %v5482_v13 = vadd.f32 %v9446_v21, %v5462_v4  ;;  %v5463_v44 = vadd.f32 %v6430_v49, %v9452_v32 }
 0x729   : > { %7384 = vpow2.f32 %v5589_v56  ;;  %v7367_v25 = vpop.eup %7366  ;;  %v5614_v34 = vadd.f32 1.0, %v7365_v8 }
 0x72a   : > { %7386 = vrcp.f32 %v5612_v16  ;;  %v7369_v6 = vpop.eup %7368  ;;  %v5615_v62 = vadd.f32 1.0, %v7367_v25  ;;  %v5510_v22 = vsub.f32 0.0, %v5482_v13  ;;  %v5484_v28 = vadd.f32 %v9446_v21, %v5463_v44 }
 0x72b   : > { %7388 = vrcp.f32 %v5613_v23  ;;  %v7371_v5 = vpop.eup %7370  ;;  %5664 = vst [vmem:[%s9469_s27 + $0x78] sm:$0xff] %v7369_v6 }
 0x72c   : > { %7390 = vrcp.f32 %v5614_v34  ;;  %5665 = vst [vmem:[%s9469_s27 + $0x80] sm:$0xff] %v7371_v5  ;;  %v5539_v9 = vmul.f32 1.442695, %v5510_v22  ;;  %v5512_v30 = vsub.f32 0.0, %v5484_v28 }
 0x72d   : > { %v7373_v27 = vpop.eup %7372  ;;  %7392 = vrcp.f32 %v5615_v62 }
 0x72e   : > { %v7375_v32 = vpop.eup %7374  ;;  %5666 = vst [vmem:[%s9469_s27 + $0x88] sm:$0xff] %v7373_v27  ;;  %7394 = vpow2.f32 %v5539_v9  ;;  %v5543_v46 = vmul.f32 1.442695, %v5512_v30 }
 0x72f   : > { %v7377_v12 = vpop.eup %7376  ;;  %5667 = vst [vmem:[%s9469_s27 + $0x90] sm:$0xff] %v7375_v32 }
 0x730   : > { %v7379_v29 = vpop.eup %7378  ;;  %v5620_v47 = vadd.f32 1.0, %v7377_v12  ;;  %7396 = vpow2.f32 %v5543_v46 }
 0x731   : > { %v7381_v43 = vpop.eup %7380  ;;  %v5616_v21 = vadd.f32 1.0, %v7379_v29 }
 0x732   : > { %v7383_v52 = vpop.eup %7382  ;;  %7398 = vrcp.f32 %v5620_v47  ;;  %v5617_v41 = vadd.f32 1.0, %v7381_v43 }
 0x733   : > { %v7385_v54 = vpop.eup %7384  ;;  %7400 = vrcp.f32 %v5616_v21  ;;  %v5618_v38 = vadd.f32 1.0, %v7383_v52 }
 0x734   : > { %v7387_v57 = vpop.eup %7386  ;;  %7402 = vrcp.f32 %v5617_v41  ;;  %v5619_v50 = vadd.f32 1.0, %v7385_v54 }
 0x735   : > { %v7389_v18 = vpop.eup %7388  ;;  %5668 = vst [vmem:[%s9469_s27 + $0x98] sm:$0xff] %v7387_v57  ;;  %7404 = vrcp.f32 %v5618_v38 }
 0x736   : > { %v7391_v59 = vpop.eup %7390  ;;  %5669 = vst [vmem:[%s9469_s27 + $0xa0] sm:$0xff] %v7389_v18  ;;  %7406 = vrcp.f32 %v5619_v50 }
 0x737   : > { %v7393_v33 = vpop.eup %7392  ;;  %5670 = vst [vmem:[%s9469_s27 + $0xa8] sm:$0xff] %v7391_v59 }
 0x738   : > { %5671 = vst [vmem:[%s9469_s27 + $0xb0] sm:$0xff] %v7393_v33  ;;  %v7395_v11 = vpop.eup %7394 }
 0x739   : > { %v5594_v17 = vadd.f32 1.0, %v7395_v11 }
 0x73a   : > { %v7397_v26 = vpop.eup %7396 }
 0x73b   : > { %7408 = vrcp.f32 %v5594_v17  ;;  %v5596_v40 = vadd.f32 1.0, %v7397_v26 }
 0x73c   : > { %v7399_v15 = vpop.eup %7398 }
 0x73d   : > { %v7401_v24 = vpop.eup %7400  ;;  %5676 = vst [vmem:[%s9469_s27 + $0xd8] sm:$0xff] %v7399_v15  ;;  %7410 = vrcp.f32 %v5596_v40 }
 0x73e   : > { %v7403_v7 = vpop.eup %7402  ;;  %5672 = vst [vmem:[%s9469_s27 + $0xb8] sm:$0xff] %v7401_v24 }
 0x73f   : > { %v7405_v51 = vpop.eup %7404  ;;  %5673 = vst [vmem:[%s9469_s27 + $0xc0] sm:$0xff] %v7403_v7 }
 0x740   : > { %v7407_v37 = vpop.eup %7406  ;;  %5674 = vst [vmem:[%s9469_s27 + $0xc8] sm:$0xff] %v7405_v51 }
 0x741   : > { %5675 = vst [vmem:[%s9469_s27 + $0xd0] sm:$0xff] %v7407_v37 }
 0x745   : > { %v7409_v55 = vpop.eup %7408 }
 0x746   : > { %5650 = vst [vmem:[%s9469_s27 + $0x8] sm:$0xff] %v7409_v55 }
 0x747   : > { %v7411_v31 = vpop.eup %7410 }
 0x748   : > { %5652 = vst [vmem:[%s9469_s27 + $0x18] sm:$0xff] %v7411_v31 }
 0x749 PF: > { %s23_s25 = sadd.s32 1, %s7418_s25  }
 0x74a   : > { %p20_p4 = scmp.ge.s32.totalorder %s23_s25, 4  }
 0x74c   :  { %22 = sbr.rel (!%p20_p4) target bundleno = 1 (0x1), region = 102 }

</bundles_post_ra>
